<compile_context>
chip_gen: v6e
topology: v6e:2x2x1
jax: 0.10.0
libtpu: 0.0.40
codegen_flags: <defaults>
</compile_context>

<pallas_src>
import functools
import math

import numpy as np

import jax
import jax.numpy as jnp
from jax.experimental import pallas as pl
from jax.experimental.pallas import tpu as pltpu


# ----------------------------------------------------------------------------- helpers
def _round_up(x, m):
    return ((x + m - 1) // m) * m


def _cdiv(a, b):
    return -(-a // b)


def _detect_vmem_limit():
    # Generation-aware scoped-VMEM budget: ~75% of physical, capped at 100 MiB.
    # v5e/v6e (128 MiB) -> 96 MiB, v7x (64 MiB) -> 48 MiB, unknown -> conservative 48 MiB.
    cap = 64 * 1024 * 1024
    try:
        info = pltpu.get_tpu_info()
        cap = int(getattr(info, "vmem_capacity_bytes", cap) or cap)
    except Exception:
        pass
    return int(min(100 * 1024 * 1024, max(32 * 1024 * 1024, (cap * 3) // 4)))


_VMEM_LIMIT_BYTES = _detect_vmem_limit()


def _pick_row_tile(n, max_tile=1024):
    t = min(max_tile, _round_up(n, 8))
    if n > 8 and _cdiv(n, t) < 2:
        # guarantee >=2 steps on the parallel axis so both v7x TensorCores get work
        t = _round_up(_cdiv(n, 2), 8)
    return max(8, t)


# ----------------------------------------------------------------------------- GA tables
def _build_ga_tables():
    gen_metric = np.array([1.0, -1.0, -1.0, -1.0], dtype=np.float64)  # Cl(1,3)

    def popcount(x):
        return bin(x).count("1")

    grades = np.array([popcount(k) for k in range(16)], dtype=np.int32)
    blade_metric = np.array(
        [np.prod([gen_metric[i] for i in range(4) if (k >> i) & 1]) if k else 1.0
         for k in range(16)],
        dtype=np.float32,
    )
    cayley = np.zeros((16, 16, 16), dtype=np.float32)
    for a in range(16):
        for b in range(16):
            s = 0
            t = a >> 1
            while t:
                s += popcount(t & b)
                t >>= 1
            sign = -1.0 if (s & 1) else 1.0
            for i in range(4):
                if ((a >> i) & 1) and ((b >> i) & 1):
                    sign *= gen_metric[i]
            cayley[a, b, a ^ b] = sign
    return grades, blade_metric, cayley


GRADES, _BLADE_METRIC_NP, _CAYLEY_NP = _build_ga_tables()
BLADE_METRIC = jnp.asarray(_BLADE_METRIC_NP)          # (16,) sign of <e_A, e_A>


@functools.lru_cache(maxsize=None)
def _gp_tables(c):
    """Block-diagonal expand / tile / Cayley / gate-select tables for c multivector channels."""
    E = np.zeros((c * 16, c * 256), np.float32)
    F = np.zeros((c * 16, c * 256), np.float32)
    CAY = np.zeros((c * 256, c * 16), np.float32)
    SEL = np.zeros((c * 16, c * 16), np.float32)
    cay2 = _CAYLEY_NP.reshape(256, 16)
    for ch in range(c):
        for i in range(16):
            for j in range(16):
                E[ch * 16 + i, ch * 256 + i * 16 + j] = 1.0
                F[ch * 16 + j, ch * 256 + i * 16 + j] = 1.0
        CAY[ch * 256:(ch + 1) * 256, ch * 16:(ch + 1) * 16] = cay2
        SEL[ch * 16 + 0, ch * 16:(ch + 1) * 16] = 1.0     # broadcast scalar blade over channel
    return (jnp.asarray(E, jnp.bfloat16), jnp.asarray(F, jnp.bfloat16),
            jnp.asarray(CAY, jnp.bfloat16), jnp.asarray(SEL, jnp.bfloat16))


@functools.lru_cache(maxsize=None)
def _qkv_layout(c_mv, c_s, heads, scale):
    """Column permutation of the qkv EquiLinear output -> per-head packed (q|k|v) x heads x Dp.

    Folds the attention scale into the q columns and the blade metric into the k mv columns.
    """
    cph, sph = c_mv // heads, c_s // heads
    dp = _round_up(cph * 16 + sph, 128)
    idx = np.zeros((3 * heads * dp,), np.int32)
    mult = np.zeros((3 * heads * dp,), np.float32)     # 0 for pad columns
    for w in range(3):                                 # 0=q, 1=k, 2=v
        for h in range(heads):
            base = (w * heads + h) * dp
            for cc in range(cph):
                for k in range(16):
                    col = base + cc * 16 + k
                    idx[col] = (w * c_mv + h * cph + cc) * 16 + k
                    m = 1.0
                    if w == 0:
                        m = scale
                    elif w == 1:
                        m = float(_BLADE_METRIC_NP[k])
                    mult[col] = m
            for ss in range(sph):
                col = base + cph * 16 + ss
                idx[col] = 3 * c_mv * 16 + w * c_s + h * sph + ss
                mult[col] = scale if w == 0 else 1.0
    return idx, mult, dp


@functools.lru_cache(maxsize=None)
def _attn_out_layout(c_mv, c_s, heads):
    """Row permutation so the attention out-projection consumes the per-head packed layout."""
    cph, sph = c_mv // heads, c_s // heads
    dp = _round_up(cph * 16 + sph, 128)
    idx = np.zeros((heads * dp,), np.int32)
    valid = np.zeros((heads * dp,), np.float32)
    for h in range(heads):
        base = h * dp
        for cc in range(cph):
            for k in range(16):
                idx[base + cc * 16 + k] = (h * cph + cc) * 16 + k
                valid[base + cc * 16 + k] = 1.0
        for ss in range(sph):
            idx[base + cph * 16 + ss] = c_mv * 16 + h * sph + ss
            valid[base + cph * 16 + ss] = 1.0
    return idx, valid, dp


# ----------------------------------------------------------------------------- Pallas kernels
def _packed_linear_kernel(x_ref, w_ref, b_ref, o_ref):
    # x: (TN, K) f32/bf16, w: (K, D) bf16, b: (1, D) f32, o: (TN, D) out_dtype
    x = x_ref[...].astype(jnp.bfloat16)
    acc = jnp.dot(x, w_ref[...], preferred_element_type=jnp.float32) + b_ref[...]
    o_ref[...] = acc.astype(o_ref.dtype)


def _packed_linear(x, w, b, out_dtype):
    # x: (N, K), w: (K, D) f32, b: (D,) f32
    N, K = x.shape
    D = w.shape[1]
    TN = _pick_row_tile(N)
    Np = _round_up(N, TN)
    if Np != N:
        x = jnp.pad(x, ((0, Np - N), (0, 0)))
    out = pl.pallas_call(
        _packed_linear_kernel,
        out_shape=jax.ShapeDtypeStruct((Np, D), out_dtype),
        grid=(Np // TN,),
        in_specs=[
            pl.BlockSpec((TN, K), lambda i: (i, 0)),
            pl.BlockSpec((K, D), lambda i: (0, 0)),
            pl.BlockSpec((1, D), lambda i: (0, 0)),
        ],
        out_specs=pl.BlockSpec((TN, D), lambda i: (i, 0)),
        compiler_params=pltpu.CompilerParams(
            dimension_semantics=("parallel",),
            vmem_limit_bytes=_VMEM_LIMIT_BYTES,
        ),
    )(x, w.astype(jnp.bfloat16), b.reshape(1, D).astype(jnp.float32))
    return out[:N] if Np != N else out


def _flash_kernel(q_ref, k_ref, v_ref, o_ref, m_sc, l_sc, acc_sc, *, seq_len, tkv, need_mask):
    # q: (1, tq, Dp) bf16, k/v: (1, tkv, Dp) bf16, o: (1, tq, Dp) bf16
    # metric / softmax scale are already folded into the qkv projection weights.
    ki = pl.program_id(3)

    @pl.when(ki == 0)
    def _():
        m_sc[...] = jnp.full_like(m_sc, -jnp.inf)
        l_sc[...] = jnp.zeros_like(l_sc)
        acc_sc[...] = jnp.zeros_like(acc_sc)

    q = q_ref[0]
    k = k_ref[0]
    v = v_ref[0]
    s = jnp.einsum("qd,kd->qk", q, k, preferred_element_type=jnp.float32)
    if need_mask:
        col = ki * tkv + jax.lax.broadcasted_iota(jnp.int32, s.shape, 1)
        s = jnp.where(col < seq_len, s, -jnp.inf)
    m_prev = m_sc[...]
    m_new = jnp.maximum(m_prev, jnp.max(s, axis=-1, keepdims=True))
    alpha = jnp.exp(m_prev - m_new)
    p = jnp.exp(s - m_new)
    l_sc[...] = alpha * l_sc[...] + jnp.sum(p, axis=-1, keepdims=True)
    acc_sc[...] = alpha * acc_sc[...] + jnp.dot(
        p.astype(jnp.bfloat16), v, preferred_element_type=jnp.float32)
    m_sc[...] = m_new

    @pl.when(ki == pl.num_programs(3) - 1)
    def _():
        o_ref[0] = (acc_sc[...] * pl.reciprocal(l_sc[...], approx=True)).astype(o_ref.dtype)


def _seq_tiles(seq_len):
    if seq_len <= 512:
        ipad = _round_up(seq_len, 8)
        return ipad, ipad, ipad
    ipad = _round_up(seq_len, 256)
    return ipad, 256, 256


def _flash_attention(qkv, heads, dp, seq_len):
    # qkv: (B, I, 3*H*Dp) bf16 in per-head packed layout -> out (B, I, H*Dp) bf16
    B = qkv.shape[0]
    ipad, tq, tkv = _seq_tiles(seq_len)
    if ipad != seq_len:
        qkv = jnp.pad(qkv, ((0, 0), (0, ipad - seq_len), (0, 0)))
    kern = functools.partial(_flash_kernel, seq_len=seq_len, tkv=tkv,
                             need_mask=(ipad != seq_len))
    out = pl.pallas_call(
        kern,
        out_shape=jax.ShapeDtypeStruct((B, ipad, heads * dp), jnp.bfloat16),
        grid=(B, heads, ipad // tq, ipad // tkv),
        in_specs=[
            pl.BlockSpec((1, tq, dp), lambda b, h, qi, ki: (b, qi, h)),
            pl.BlockSpec((1, tkv, dp), lambda b, h, qi, ki: (b, ki, heads + h)),
            pl.BlockSpec((1, tkv, dp), lambda b, h, qi, ki: (b, ki, 2 * heads + h)),
        ],
        out_specs=pl.BlockSpec((1, tq, dp), lambda b, h, qi, ki: (b, qi, h)),
        scratch_shapes=[
            pltpu.VMEM((tq, 1), jnp.float32),
            pltpu.VMEM((tq, 1), jnp.float32),
            pltpu.VMEM((tq, dp), jnp.float32),
        ],
        compiler_params=pltpu.CompilerParams(
            dimension_semantics=("parallel", "parallel", "parallel", "arbitrary"),
            vmem_limit_bytes=_VMEM_LIMIT_BYTES,
        ),
    )(qkv, qkv, qkv)
    return out[:, :seq_len] if ipad != seq_len else out


def _gp_gated_kernel(x_ref, e_ref, f_ref, c_ref, sel_ref, o_ref, *, cg):
    # x: (TM, 2*cg + cs) bf16, e/f: (cg, cg*16) bf16, c: (cg*16, cg) bf16, sel: (cg, cg) bf16
    # o: (TM, cg + cs) bf16; cg = mv_channels*16
    l = x_ref[:, :cg].astype(jnp.bfloat16)
    r = x_ref[:, cg:2 * cg].astype(jnp.bfloat16)
    # lane-dense per-channel outer product via block-diagonal expand/tile matmuls
    lexp = jnp.dot(l, e_ref[...], preferred_element_type=jnp.float32)
    rtil = jnp.dot(r, f_ref[...], preferred_element_type=jnp.float32)
    lr = (lexp * rtil).astype(jnp.bfloat16)
    # single matmul against the block-diagonal flattened Cayley table
    gp = jnp.dot(lr, c_ref[...], preferred_element_type=jnp.float32)          # (TM, cg)
    # scalar-gated nonlinearity fused in: gate = gelu(scalar blade) broadcast per channel
    # TODO(synk): tanh-approximate GELU used in-kernel (exact erf GELU in reference impl).
    gate = jax.nn.gelu(
        jnp.dot(gp.astype(jnp.bfloat16), sel_ref[...], preferred_element_type=jnp.float32),
        approximate=True)
    o_ref[:, :cg] = (gp * gate).astype(o_ref.dtype)
    s = x_ref[:, 2 * cg:].astype(jnp.float32)
    o_ref[:, cg:] = jax.nn.gelu(s, approximate=True).astype(o_ref.dtype)


def _geo_bilinear_gated(h1, c_mv, c_s):
    # h1: (N, 2*c_mv*16 + c_s) bf16 -> (N, c_mv*16 + c_s) bf16
    N, D1 = h1.shape
    cg = c_mv * 16
    assert D1 == 2 * cg + c_s
    E, F, CAY, SEL = _gp_tables(c_mv)
    Dh = cg + c_s
    TM = _pick_row_tile(N, max_tile=512)
    Np = _round_up(N, TM)
    if Np != N:
        h1 = jnp.pad(h1, ((0, Np - N), (0, 0)))
    out = pl.pallas_call(
        functools.partial(_gp_gated_kernel, cg=cg),
        out_shape=jax.ShapeDtypeStruct((Np, Dh), jnp.bfloat16),
        grid=(Np // TM,),
        in_specs=[
            pl.BlockSpec((TM, D1), lambda i: (i, 0)),
            pl.BlockSpec(E.shape, lambda i: (0, 0)),
            pl.BlockSpec(F.shape, lambda i: (0, 0)),
            pl.BlockSpec(CAY.shape, lambda i: (0, 0)),
            pl.BlockSpec(SEL.shape, lambda i: (0, 0)),
        ],
        out_specs=pl.BlockSpec((TM, Dh), lambda i: (i, 0)),
        compiler_params=pltpu.CompilerParams(
            dimension_semantics=("parallel",),
            vmem_limit_bytes=_VMEM_LIMIT_BYTES,
        ),
    )(h1, E, F, CAY, SEL)
    return out[:N] if Np != N else out


# ----------------------------------------------------------------------------- modules (plain-JAX glue)
def init_equi_linear(key, cin_mv, cout_mv, cin_s, cout_s):
    ks = jax.random.split(key, 4)
    return dict(
        # TODO(synk): lgatr's EquiLinear may use extra (symmetry-breaking) basis maps beyond
        # the 5 grade projections used here.
        w_mv=jax.random.normal(ks[0], (5, cin_mv, cout_mv), jnp.float32) / np.sqrt(cin_mv),
        w_s2mv=jax.random.normal(ks[1], (cin_s, cout_mv), jnp.float32) / np.sqrt(cin_s),
        w_mv2s=jax.random.normal(ks[2], (cin_mv, cout_s), jnp.float32) / np.sqrt(cin_mv),
        w_s2s=jax.random.normal(ks[3], (cin_s, cout_s), jnp.float32) / np.sqrt(cin_s),
        b_mv=jnp.zeros((cout_mv,), jnp.float32),
        b_s=jnp.zeros((cout_s,), jnp.float32),
    )


def _fused_packed_weight(p):
    """Stacked fused weight (Cin*16+Sin, Cout*16+Sout) + bias: the whole EquiLinear is one
    lane-dense matmul on packed [mv_flat | scalars] features."""
    w_mv = p["w_mv"][GRADES]                      # (16, Cin, Cout)
    _, Cin, Cout = w_mv.shape
    Sin, Sout = p["w_s2s"].shape
    eye16 = jnp.eye(16, dtype=jnp.float32)
    e0 = eye16[0]                                 # one-hot on the scalar blade
    w_mm = jnp.einsum("kio,kl->ikol", w_mv, eye16).reshape(Cin * 16, Cout * 16)
    w_mv2s = jnp.einsum("io,k->iko", p["w_mv2s"], e0).reshape(Cin * 16, Sout)
    w_s2mv = jnp.einsum("so,l->sol", p["w_s2mv"], e0).reshape(Sin, Cout * 16)
    top = jnp.concatenate([w_mm, w_mv2s], axis=1)
    bot = jnp.concatenate([w_s2mv, p["w_s2s"]], axis=1)
    w = jnp.concatenate([top, bot], axis=0)                     # (Cin*16+Sin, Cout*16+Sout)
    b_mv_full = jnp.einsum("o,k->ok", p["b_mv"], e0).reshape(Cout * 16)
    b = jnp.concatenate([b_mv_full, p["b_s"]], axis=0)          # (Cout*16+Sout,)
    return w, b, Cout, Sout


def equi_layer_norm_packed(h, c_mv, c_s, eps=1e-6):
    # TODO(synk): exact lgatr EquiLayerNorm convention (indefinite norm handling, learnable
    # scale) assumed: normalize by sqrt(mean_channels |<x,x>|).
    hf = h.astype(jnp.float32)
    pref = h.shape[:-1]
    mv = hf[..., :c_mv * 16].reshape(*pref, c_mv, 16)
    s = hf[..., c_mv * 16:]
    sq = jnp.sum(BLADE_METRIC * mv * mv, axis=-1)
    d = jnp.sqrt(jnp.mean(jnp.abs(sq), axis=-1, keepdims=True) + eps)
    mv = (mv / d[..., None]).reshape(*pref, c_mv * 16)
    sd = jnp.sqrt(jnp.mean(s * s, axis=-1, keepdims=True) + eps)
    s = s / sd
    return jnp.concatenate([mv, s], axis=-1).astype(jnp.bfloat16)


def self_attention_packed(p, h, c_mv, c_s, heads):
    B, I, Dh = h.shape
    N = B * I
    cph, sph = c_mv // heads, c_s // heads
    # TODO(synk): lgatr's exact attention normalizer convention assumed as 1/sqrt(per-head dims)
    scale = 1.0 / math.sqrt(cph * 16 + sph)

    # qkv projection emitting the per-head packed layout, with metric & scale folded in
    w, b, _, _ = _fused_packed_weight(p["qkv"])
    idx, mult, dp = _qkv_layout(c_mv, c_s, heads, scale)
    wq = w[:, idx] * mult
    bq = b[idx] * mult
    qkv = _packed_linear(h.reshape(N, Dh), wq, bq, jnp.bfloat16).reshape(B, I, 3 * heads * dp)

    attn = _flash_attention(qkv, heads, dp, I)                    # (B, I, H*Dp) bf16

    # out projection directly consuming the per-head packed layout (weight rows permuted)
    wo, bo, co, so = _fused_packed_weight(p["out"])
    ridx, rvalid, _ = _attn_out_layout(c_mv, c_s, heads)
    wo2 = wo[ridx, :] * rvalid[:, None]
    out = _packed_linear(attn.reshape(N, heads * dp), wo2, bo, jnp.bfloat16)
    return out.reshape(B, I, co * 16 + so)


def geo_mlp_packed(p, h, c_mv, c_s):
    B, I, Dh = h.shape
    N = B * I
    w1, b1, c1, s1 = _fused_packed_weight(p["lin1"])
    assert c1 == 2 * c_mv and s1 == c_s
    h1 = _packed_linear(h.reshape(N, Dh), w1, b1, jnp.bfloat16)   # (N, 2*c_mv*16 + c_s)
    # TODO(synk): lgatr GeometricBilinear also includes an equivariant join term; only the
    # geometric product branch is implemented here.
    g = _geo_bilinear_gated(h1, c_mv, c_s)                        # (N, c_mv*16 + c_s)
    w2, b2, c2, s2 = _fused_packed_weight(p["lin2"])
    out = _packed_linear(g, w2, b2, jnp.bfloat16)
    return out.reshape(B, I, c2 * 16 + s2)


def init_block(key, hid_mv, hid_s):
    k1, k2, k3, k4 = jax.random.split(key, 4)
    return dict(
        attn=dict(
            qkv=init_equi_linear(k1, hid_mv, 3 * hid_mv, hid_s, 3 * hid_s),
            out=init_equi_linear(k2, hid_mv, hid_mv, hid_s, hid_s),
        ),
        mlp=dict(
            lin1=init_equi_linear(k3, hid_mv, 2 * hid_mv, hid_s, hid_s),
            lin2=init_equi_linear(k4, hid_mv, hid_mv, hid_s, hid_s),
        ),
    )


def gatr_block(p, h, c_mv, c_s, heads):
    n = equi_layer_norm_packed(h, c_mv, c_s)
    a = self_attention_packed(p["attn"], n, c_mv, c_s, heads)
    h = h + a
    n = equi_layer_norm_packed(h, c_mv, c_s)
    m = geo_mlp_packed(p["mlp"], n, c_mv, c_s)
    return h + m


def init_gatr(key, in_mv, out_mv, hid_mv, in_s, out_s, hid_s, num_blocks):
    keys = jax.random.split(key, num_blocks + 2)
    return dict(
        lin_in=init_equi_linear(keys[0], in_mv, hid_mv, in_s, hid_s),
        blocks=[init_block(keys[1 + i], hid_mv, hid_s) for i in range(num_blocks)],
        lin_out=init_equi_linear(keys[-1], hid_mv, out_mv, hid_s, out_s),
    )


def gatr_forward(params, multivectors, scalars, attention_mask=None, *, num_heads=2):
    # reinsert_mv_channels / reinsert_s_channels default to None -> no reinserted qk features.
    # checkpoint_blocks / dropout have no effect on forward (eval) semantics.
    # TODO(synk): attention_mask is only supported as None here.
    B, I, cin, _ = multivectors.shape
    x = jnp.concatenate([multivectors.reshape(B, I, cin * 16), scalars], axis=-1)

    w, b, c_mv, c_s = _fused_packed_weight(params["lin_in"])
    assert c_mv % num_heads == 0 and c_s % num_heads == 0
    h = _packed_linear(x.reshape(B * I, -1), w, b, jnp.bfloat16).reshape(B, I, c_mv * 16 + c_s)

    for bp in params["blocks"]:
        h = gatr_block(bp, h, c_mv, c_s, num_heads)

    w, b, co, so = _fused_packed_weight(params["lin_out"])
    out = _packed_linear(h.reshape(B * I, -1), w, b, jnp.float32).reshape(B, I, co * 16 + so)
    out_mv = out[..., :co * 16].reshape(B, I, co, 16)
    out_s = out[..., co * 16:]
    return out_mv, out_s


# ----------------------------------------------------------------------------- main
if __name__ == "__main__":
    B, I = 2, 8
    IN_MV, HID_MV, OUT_MV = 4, 8, 4
    IN_S, HID_S, OUT_S = 4, 8, 4
    NUM_BLOCKS, NUM_HEADS = 2, 2

    key = jax.random.PRNGKey(0)
    k_mv, k_s, k_par = jax.random.split(key, 3)
    mv = jax.random.normal(k_mv, (B, I, IN_MV, 16), jnp.float32)
    s = jax.random.normal(k_s, (B, I, IN_S), jnp.float32)

    params = init_gatr(k_par, IN_MV, OUT_MV, HID_MV, IN_S, OUT_S, HID_S, NUM_BLOCKS)

    fwd = jax.jit(functools.partial(gatr_forward, num_heads=NUM_HEADS))
    out_mv, out_s = fwd(params, mv, s)
    jax.block_until_ready((out_mv, out_s))

    assert out_mv.shape == (B, I, OUT_MV, 16), out_mv.shape
    assert out_s.shape == (B, I, OUT_S), out_s.shape
    assert bool(jnp.all(jnp.isfinite(out_mv))) and bool(jnp.all(jnp.isfinite(out_s)))
    print("KERNEL_OK")
</pallas_src>

<mosaic_0001>
module attributes {stable_mosaic.version = 11 : i64} {
  func.func @_packed_linear_kernel(%arg0: i32, %arg1: memref<8x68xf32, #tpu.memory_space<vmem>>, %arg2: memref<68x136xbf16, #tpu.memory_space<vmem>>, %arg3: memref<1x136xf32, #tpu.memory_space<vmem>>, %arg4: memref<8x136xbf16, #tpu.memory_space<vmem>>) attributes {dimension_semantics = [#tpu.dimension_semantics<parallel>], iteration_bounds = array<i64: 2>, scalar_prefetch = 0 : i64, scratch_operands = 0 : i64, tpu.core_type = #tpu.core_type<tc>, window_params = [{transform_indices = @transform_0, window_bounds = array<i64: 8, 68>}, {pipeline_mode = #tpu.pipeline_mode<synchronous>, transform_indices = @transform_1, window_bounds = array<i64: 68, 136>}, {pipeline_mode = #tpu.pipeline_mode<synchronous>, transform_indices = @transform_2, window_bounds = array<i64: 1, 136>}, {transform_indices = @transform_3, window_bounds = array<i64: 8, 136>}]} {
    %c0 = arith.constant 0 : index
    %c0_0 = arith.constant 0 : index
    %0 = vector.load %arg1[%c0, %c0_0] : memref<8x68xf32, #tpu.memory_space<vmem>>, vector<8x68xf32>
    %1 = arith.truncf %0 : vector<8x68xf32> to vector<8x68xbf16>
    %c0_1 = arith.constant 0 : index
    %c0_2 = arith.constant 0 : index
    %2 = vector.load %arg2[%c0_1, %c0_2] : memref<68x136xbf16, #tpu.memory_space<vmem>>, vector<68x136xbf16>
    %cst = arith.constant dense<0.000000e+00> : vector<8x136xf32>
    %3 = tpu.matmul %1, %2, %cst {dimension_numbers = #tpu.dot_dimension_numbers<[1], [0], [0], [1], [0, 0, 1, 1], [], []>} : vector<8x68xbf16>, vector<68x136xbf16>, vector<8x136xf32> -> vector<8x136xf32>
    %c0_3 = arith.constant 0 : index
    %c0_4 = arith.constant 0 : index
    %4 = vector.load %arg3[%c0_3, %c0_4] : memref<1x136xf32, #tpu.memory_space<vmem>>, vector<1x136xf32>
    %5 = vector.broadcast %4 : vector<1x136xf32> to vector<8x136xf32>
    %6 = arith.addf %3, %5 : vector<8x136xf32>
    %7 = arith.truncf %6 : vector<8x136xf32> to vector<8x136xbf16>
    %c0_5 = arith.constant 0 : index
    %c0_6 = arith.constant 0 : index
    %8 = vector.load %arg4[%c0_5, %c0_6] : memref<8x136xbf16, #tpu.memory_space<vmem>>, vector<8x136xbf16>
    tpu.vector_store %arg4[%c0_5, %c0_6], %7 {strides = array<i32>} : memref<8x136xbf16, #tpu.memory_space<vmem>>, vector<8x136xbf16>,
    return
  }
  func.func @transform_0(%arg0: i32) -> (i32, i32) {
    %c0_i32 = arith.constant 0 : i32
    %c0_i32_0 = arith.constant 0 : i32
    return %arg0, %c0_i32 : i32, i32
  }
  func.func @transform_1(%arg0: i32) -> (i32, i32) {
    %c0_i32 = arith.constant 0 : i32
    %c0_i32_0 = arith.constant 0 : i32
    %c0_i32_1 = arith.constant 0 : i32
    return %c0_i32, %c0_i32_0 : i32, i32
  }
  func.func @transform_2(%arg0: i32) -> (i32, i32) {
    %c0_i32 = arith.constant 0 : i32
    %c0_i32_0 = arith.constant 0 : i32
    %c0_i32_1 = arith.constant 0 : i32
    return %c0_i32, %c0_i32_0 : i32, i32
  }
  func.func @transform_3(%arg0: i32) -> (i32, i32) {
    %c0_i32 = arith.constant 0 : i32
    %c0_i32_0 = arith.constant 0 : i32
    return %arg0, %c0_i32 : i32, i32
  }
}

module attributes {stable_mosaic.version = 11 : i64} {
  func.func @_flash_kernel(%arg0: i32, %arg1: i32, %arg2: i32, %arg3: i32, %arg4: memref<1x8x128xbf16, #tpu.memory_space<vmem>>, %arg5: memref<1x8x128xbf16, #tpu.memory_space<vmem>>, %arg6: memref<1x8x128xbf16, #tpu.memory_space<vmem>>, %arg7: memref<1x8x128xbf16, #tpu.memory_space<vmem>>, %arg8: memref<8x1xf32, #tpu.memory_space<vmem>>, %arg9: memref<8x1xf32, #tpu.memory_space<vmem>>, %arg10: memref<8x128xf32, #tpu.memory_space<vmem>>) attributes {dimension_semantics = [#tpu.dimension_semantics<parallel>, #tpu.dimension_semantics<parallel>, #tpu.dimension_semantics<parallel>, #tpu.dimension_semantics<arbitrary>], iteration_bounds = array<i64: 2, 2, 1, 1>, scalar_prefetch = 0 : i64, scratch_operands = 3 : i64, tpu.core_type = #tpu.core_type<tc>, window_params = [{transform_indices = @transform_0, window_bounds = array<i64: 1, 8, 128>}, {transform_indices = @transform_1, window_bounds = array<i64: 1, 8, 128>}, {transform_indices = @transform_2, window_bounds = array<i64: 1, 8, 128>}, {transform_indices = @transform_3, window_bounds = array<i64: 1, 8, 128>}]} {
    %c0_i32 = arith.constant 0 : i32
    %0 = arith.cmpi eq, %arg3, %c0_i32 : i32
    %1 = arith.extui %0 : i1 to i32
    %c0_i32_0 = arith.constant 0 : i32
    %2 = arith.cmpi ne, %1, %c0_i32_0 : i32
    scf.if %2 {
      %cst_26 = arith.constant 0xFF800000 : f32
      %36 = vector.broadcast %cst_26 : f32 to vector<8x1xf32>
      %c0_27 = arith.constant 0 : index
      %c0_28 = arith.constant 0 : index
      %37 = vector.load %arg8[%c0_27, %c0_28] : memref<8x1xf32, #tpu.memory_space<vmem>>, vector<8x1xf32>
      tpu.vector_store %arg8[%c0_27, %c0_28], %36 {strides = array<i32>} : memref<8x1xf32, #tpu.memory_space<vmem>>, vector<8x1xf32>,
      %cst_29 = arith.constant 0.000000e+00 : f32
      %38 = vector.broadcast %cst_29 : f32 to vector<8x1xf32>
      %c0_30 = arith.constant 0 : index
      %c0_31 = arith.constant 0 : index
      %39 = vector.load %arg9[%c0_30, %c0_31] : memref<8x1xf32, #tpu.memory_space<vmem>>, vector<8x1xf32>
      tpu.vector_store %arg9[%c0_30, %c0_31], %38 {strides = array<i32>} : memref<8x1xf32, #tpu.memory_space<vmem>>, vector<8x1xf32>,
      %cst_32 = arith.constant 0.000000e+00 : f32
      %40 = vector.broadcast %cst_32 : f32 to vector<8x128xf32>
      %c0_33 = arith.constant 0 : index
      %c0_34 = arith.constant 0 : index
      %41 = vector.load %arg10[%c0_33, %c0_34] : memref<8x128xf32, #tpu.memory_space<vmem>>, vector<8x128xf32>
      tpu.vector_store %arg10[%c0_33, %c0_34], %40 {strides = array<i32>} : memref<8x128xf32, #tpu.memory_space<vmem>>, vector<8x128xf32>,
    } else {
    }
    %c0 = arith.constant 0 : index
    %c0_1 = arith.constant 0 : index
    %c0_2 = arith.constant 0 : index
    %3 = vector.load %arg4[%c0, %c0_1, %c0_2] : memref<1x8x128xbf16, #tpu.memory_space<vmem>>, vector<1x8x128xbf16>
    %4 = vector.shape_cast %3 : vector<1x8x128xbf16> to vector<8x128xbf16>
    %c0_3 = arith.constant 0 : index
    %c0_4 = arith.constant 0 : index
    %c0_5 = arith.constant 0 : index
    %5 = vector.load %arg5[%c0_3, %c0_4, %c0_5] : memref<1x8x128xbf16, #tpu.memory_space<vmem>>, vector<1x8x128xbf16>
    %6 = vector.shape_cast %5 : vector<1x8x128xbf16> to vector<8x128xbf16>
    %c0_6 = arith.constant 0 : index
    %c0_7 = arith.constant 0 : index
    %c0_8 = arith.constant 0 : index
    %7 = vector.load %arg6[%c0_6, %c0_7, %c0_8] : memref<1x8x128xbf16, #tpu.memory_space<vmem>>, vector<1x8x128xbf16>
    %8 = vector.shape_cast %7 : vector<1x8x128xbf16> to vector<8x128xbf16>
    "tpu.trace_start"() <{level = 10 : i32, message = "qd,kd->qk"}> : () -> ()
    %cst = arith.constant dense<0.000000e+00> : vector<8x8xf32>
    %9 = tpu.matmul %4, %6, %cst {dimension_numbers = #tpu.dot_dimension_numbers<[1], [1], [0], [0], [0, 0, 1, 0], [], []>} : vector<8x128xbf16>, vector<8x128xbf16>, vector<8x8xf32> -> vector<8x8xf32>
    "tpu.trace_stop"() : () -> ()
    %c0_9 = arith.constant 0 : index
    %c0_10 = arith.constant 0 : index
    %10 = vector.load %arg8[%c0_9, %c0_10] : memref<8x1xf32, #tpu.memory_space<vmem>>, vector<8x1xf32>
    %cst_11 = arith.constant dense<0xFF800000> : vector<8xf32>
    %11 = vector.multi_reduction <maximumf>, %9, %cst_11 [1] : vector<8x8xf32> to vector<8xf32>
    %12 = vector.shape_cast %11 : vector<8xf32> to vector<8x1xf32>
    %13 = arith.maximumf %10, %12 : vector<8x1xf32>
    %14 = arith.subf %10, %13 : vector<8x1xf32>
    %15 = math.exp %14 : vector<8x1xf32>
    %16 = vector.broadcast %13 : vector<8x1xf32> to vector<8x8xf32>
    %17 = arith.subf %9, %16 : vector<8x8xf32>
    %18 = math.exp %17 : vector<8x8xf32>
    %c0_12 = arith.constant 0 : index
    %c0_13 = arith.constant 0 : index
    %19 = vector.load %arg9[%c0_12, %c0_13] : memref<8x1xf32, #tpu.memory_space<vmem>>, vector<8x1xf32>
    %20 = arith.mulf %15, %19 : vector<8x1xf32>
    %cst_14 = arith.constant dense<0.000000e+00> : vector<8xf32>
    %21 = vector.multi_reduction <add>, %18, %cst_14 [1] : vector<8x8xf32> to vector<8xf32>
    %22 = vector.shape_cast %21 : vector<8xf32> to vector<8x1xf32>
    %23 = arith.addf %20, %22 : vector<8x1xf32>
    %c0_15 = arith.constant 0 : index
    %c0_16 = arith.constant 0 : index
    %24 = vector.load %arg9[%c0_15, %c0_16] : memref<8x1xf32, #tpu.memory_space<vmem>>, vector<8x1xf32>
    tpu.vector_store %arg9[%c0_15, %c0_16], %23 {strides = array<i32>} : memref<8x1xf32, #tpu.memory_space<vmem>>, vector<8x1xf32>,
    %c0_17 = arith.constant 0 : index
    %c0_18 = arith.constant 0 : index
    %25 = vector.load %arg10[%c0_17, %c0_18] : memref<8x128xf32, #tpu.memory_space<vmem>>, vector<8x128xf32>
    %26 = vector.broadcast %15 : vector<8x1xf32> to vector<8x128xf32>
    %27 = arith.mulf %26, %25 : vector<8x128xf32>
    %28 = arith.truncf %18 : vector<8x8xf32> to vector<8x8xbf16>
    %cst_19 = arith.constant dense<0.000000e+00> : vector<8x128xf32>
    %29 = tpu.matmul %28, %8, %cst_19 {dimension_numbers = #tpu.dot_dimension_numbers<[1], [0], [0], [1], [0, 0, 1, 1], [], []>} : vector<8x8xbf16>, vector<8x128xbf16>, vector<8x128xf32> -> vector<8x128xf32>
    %30 = arith.addf %27, %29 : vector<8x128xf32>
    %c0_20 = arith.constant 0 : index
    %c0_21 = arith.constant 0 : index
    %31 = vector.load %arg10[%c0_20, %c0_21] : memref<8x128xf32, #tpu.memory_space<vmem>>, vector<8x128xf32>
    tpu.vector_store %arg10[%c0_20, %c0_21], %30 {strides = array<i32>} : memref<8x128xf32, #tpu.memory_space<vmem>>, vector<8x128xf32>,
    %c0_22 = arith.constant 0 : index
    %c0_23 = arith.constant 0 : index
    %32 = vector.load %arg8[%c0_22, %c0_23] : memref<8x1xf32, #tpu.memory_space<vmem>>, vector<8x1xf32>
    tpu.vector_store %arg8[%c0_22, %c0_23], %13 {strides = array<i32>} : memref<8x1xf32, #tpu.memory_space<vmem>>, vector<8x1xf32>,
    %c0_i32_24 = arith.constant 0 : i32
    %33 = arith.cmpi eq, %arg3, %c0_i32_24 : i32
    %34 = arith.extui %33 : i1 to i32
    %c0_i32_25 = arith.constant 0 : i32
    %35 = arith.cmpi ne, %34, %c0_i32_25 : i32
    scf.if %35 {
      %c0_26 = arith.constant 0 : index
      %c0_27 = arith.constant 0 : index
      %36 = vector.load %arg10[%c0_26, %c0_27] : memref<8x128xf32, #tpu.memory_space<vmem>>, vector<8x128xf32>
      %c0_28 = arith.constant 0 : index
      %c0_29 = arith.constant 0 : index
      %37 = vector.load %arg9[%c0_28, %c0_29] : memref<8x1xf32, #tpu.memory_space<vmem>>, vector<8x1xf32>
      %38 = tpu.reciprocal %37 {approx = true} : vector<8x1xf32> -> vector<8x1xf32>
      %39 = vector.broadcast %38 : vector<8x1xf32> to vector<8x128xf32>
      %40 = arith.mulf %36, %39 : vector<8x128xf32>
      %41 = arith.truncf %40 : vector<8x128xf32> to vector<8x128xbf16>
      %c0_30 = arith.constant 0 : index
      %c0_31 = arith.constant 0 : index
      %c0_32 = arith.constant 0 : index
      %42 = vector.load %arg7[%c0_30, %c0_31, %c0_32] : memref<1x8x128xbf16, #tpu.memory_space<vmem>>, vector<1x8x128xbf16>
      %43 = vector.shape_cast %42 : vector<1x8x128xbf16> to vector<8x128xbf16>
      %44 = vector.shape_cast %41 : vector<8x128xbf16> to vector<1x8x128xbf16>
      tpu.vector_store %arg7[%c0_30, %c0_31, %c0_32], %44 {strides = array<i32>} : memref<1x8x128xbf16, #tpu.memory_space<vmem>>, vector<1x8x128xbf16>,
    } else {
    }
    return
  }
  func.func @transform_0(%arg0: i32, %arg1: i32, %arg2: i32, %arg3: i32) -> (i32, i32, i32) {
    %c0_i32 = arith.constant 0 : i32
    return %arg0, %arg2, %arg1 : i32, i32, i32
  }
  func.func @transform_1(%arg0: i32, %arg1: i32, %arg2: i32, %arg3: i32) -> (i32, i32, i32) {
    %c2_i32 = arith.constant 2 : i32
    %0 = arith.addi %c2_i32, %arg1 : i32
    %c0_i32 = arith.constant 0 : i32
    return %arg0, %arg3, %0 : i32, i32, i32
  }
  func.func @transform_2(%arg0: i32, %arg1: i32, %arg2: i32, %arg3: i32) -> (i32, i32, i32) {
    %c4_i32 = arith.constant 4 : i32
    %0 = arith.addi %c4_i32, %arg1 : i32
    %c0_i32 = arith.constant 0 : i32
    return %arg0, %arg3, %0 : i32, i32, i32
  }
  func.func @transform_3(%arg0: i32, %arg1: i32, %arg2: i32, %arg3: i32) -> (i32, i32, i32) {
    %c0_i32 = arith.constant 0 : i32
    return %arg0, %arg2, %arg1 : i32, i32, i32
  }
}

module attributes {stable_mosaic.version = 11 : i64} {
  func.func @_packed_linear_kernel(%arg0: i32, %arg1: memref<8x136xbf16, #tpu.memory_space<vmem>>, %arg2: memref<136x768xbf16, #tpu.memory_space<vmem>>, %arg3: memref<1x768xf32, #tpu.memory_space<vmem>>, %arg4: memref<8x768xbf16, #tpu.memory_space<vmem>>) attributes {dimension_semantics = [#tpu.dimension_semantics<parallel>], iteration_bounds = array<i64: 2>, scalar_prefetch = 0 : i64, scratch_operands = 0 : i64, tpu.core_type = #tpu.core_type<tc>, window_params = [{transform_indices = @transform_0, window_bounds = array<i64: 8, 136>}, {pipeline_mode = #tpu.pipeline_mode<synchronous>, transform_indices = @transform_1, window_bounds = array<i64: 136, 768>}, {pipeline_mode = #tpu.pipeline_mode<synchronous>, transform_indices = @transform_2, window_bounds = array<i64: 1, 768>}, {transform_indices = @transform_3, window_bounds = array<i64: 8, 768>}]} {
    %c0 = arith.constant 0 : index
    %c0_0 = arith.constant 0 : index
    %0 = vector.load %arg1[%c0, %c0_0] : memref<8x136xbf16, #tpu.memory_space<vmem>>, vector<8x136xbf16>
    %c0_1 = arith.constant 0 : index
    %c0_2 = arith.constant 0 : index
    %1 = vector.load %arg2[%c0_1, %c0_2] : memref<136x768xbf16, #tpu.memory_space<vmem>>, vector<136x768xbf16>
    %cst = arith.constant dense<0.000000e+00> : vector<8x768xf32>
    %2 = tpu.matmul %0, %1, %cst {dimension_numbers = #tpu.dot_dimension_numbers<[1], [0], [0], [1], [0, 0, 1, 1], [], []>} : vector<8x136xbf16>, vector<136x768xbf16>, vector<8x768xf32> -> vector<8x768xf32>
    %c0_3 = arith.constant 0 : index
    %c0_4 = arith.constant 0 : index
    %3 = vector.load %arg3[%c0_3, %c0_4] : memref<1x768xf32, #tpu.memory_space<vmem>>, vector<1x768xf32>
    %4 = vector.broadcast %3 : vector<1x768xf32> to vector<8x768xf32>
    %5 = arith.addf %2, %4 : vector<8x768xf32>
    %6 = arith.truncf %5 : vector<8x768xf32> to vector<8x768xbf16>
    %c0_5 = arith.constant 0 : index
    %c0_6 = arith.constant 0 : index
    %7 = vector.load %arg4[%c0_5, %c0_6] : memref<8x768xbf16, #tpu.memory_space<vmem>>, vector<8x768xbf16>
    tpu.vector_store %arg4[%c0_5, %c0_6], %6 {strides = array<i32>} : memref<8x768xbf16, #tpu.memory_space<vmem>>, vector<8x768xbf16>,
    return
  }
  func.func @transform_0(%arg0: i32) -> (i32, i32) {
    %c0_i32 = arith.constant 0 : i32
    %c0_i32_0 = arith.constant 0 : i32
    return %arg0, %c0_i32 : i32, i32
  }
  func.func @transform_1(%arg0: i32) -> (i32, i32) {
    %c0_i32 = arith.constant 0 : i32
    %c0_i32_0 = arith.constant 0 : i32
    %c0_i32_1 = arith.constant 0 : i32
    return %c0_i32, %c0_i32_0 : i32, i32
  }
  func.func @transform_2(%arg0: i32) -> (i32, i32) {
    %c0_i32 = arith.constant 0 : i32
    %c0_i32_0 = arith.constant 0 : i32
    %c0_i32_1 = arith.constant 0 : i32
    return %c0_i32, %c0_i32_0 : i32, i32
  }
  func.func @transform_3(%arg0: i32) -> (i32, i32) {
    %c0_i32 = arith.constant 0 : i32
    %c0_i32_0 = arith.constant 0 : i32
    return %arg0, %c0_i32 : i32, i32
  }
}

module attributes {stable_mosaic.version = 11 : i64} {
  func.func @_packed_linear_kernel(%arg0: i32, %arg1: memref<8x256xbf16, #tpu.memory_space<vmem>>, %arg2: memref<256x136xbf16, #tpu.memory_space<vmem>>, %arg3: memref<1x136xf32, #tpu.memory_space<vmem>>, %arg4: memref<8x136xbf16, #tpu.memory_space<vmem>>) attributes {dimension_semantics = [#tpu.dimension_semantics<parallel>], iteration_bounds = array<i64: 2>, scalar_prefetch = 0 : i64, scratch_operands = 0 : i64, tpu.core_type = #tpu.core_type<tc>, window_params = [{transform_indices = @transform_0, window_bounds = array<i64: 8, 256>}, {pipeline_mode = #tpu.pipeline_mode<synchronous>, transform_indices = @transform_1, window_bounds = array<i64: 256, 136>}, {pipeline_mode = #tpu.pipeline_mode<synchronous>, transform_indices = @transform_2, window_bounds = array<i64: 1, 136>}, {transform_indices = @transform_3, window_bounds = array<i64: 8, 136>}]} {
    %c0 = arith.constant 0 : index
    %c0_0 = arith.constant 0 : index
    %0 = vector.load %arg1[%c0, %c0_0] : memref<8x256xbf16, #tpu.memory_space<vmem>>, vector<8x256xbf16>
    %c0_1 = arith.constant 0 : index
    %c0_2 = arith.constant 0 : index
    %1 = vector.load %arg2[%c0_1, %c0_2] : memref<256x136xbf16, #tpu.memory_space<vmem>>, vector<256x136xbf16>
    %cst = arith.constant dense<0.000000e+00> : vector<8x136xf32>
    %2 = tpu.matmul %0, %1, %cst {dimension_numbers = #tpu.dot_dimension_numbers<[1], [0], [0], [1], [0, 0, 1, 1], [], []>} : vector<8x256xbf16>, vector<256x136xbf16>, vector<8x136xf32> -> vector<8x136xf32>
    %c0_3 = arith.constant 0 : index
    %c0_4 = arith.constant 0 : index
    %3 = vector.load %arg3[%c0_3, %c0_4] : memref<1x136xf32, #tpu.memory_space<vmem>>, vector<1x136xf32>
    %4 = vector.broadcast %3 : vector<1x136xf32> to vector<8x136xf32>
    %5 = arith.addf %2, %4 : vector<8x136xf32>
    %6 = arith.truncf %5 : vector<8x136xf32> to vector<8x136xbf16>
    %c0_5 = arith.constant 0 : index
    %c0_6 = arith.constant 0 : index
    %7 = vector.load %arg4[%c0_5, %c0_6] : memref<8x136xbf16, #tpu.memory_space<vmem>>, vector<8x136xbf16>
    tpu.vector_store %arg4[%c0_5, %c0_6], %6 {strides = array<i32>} : memref<8x136xbf16, #tpu.memory_space<vmem>>, vector<8x136xbf16>,
    return
  }
  func.func @transform_0(%arg0: i32) -> (i32, i32) {
    %c0_i32 = arith.constant 0 : i32
    %c0_i32_0 = arith.constant 0 : i32
    return %arg0, %c0_i32 : i32, i32
  }
  func.func @transform_1(%arg0: i32) -> (i32, i32) {
    %c0_i32 = arith.constant 0 : i32
    %c0_i32_0 = arith.constant 0 : i32
    %c0_i32_1 = arith.constant 0 : i32
    return %c0_i32, %c0_i32_0 : i32, i32
  }
  func.func @transform_2(%arg0: i32) -> (i32, i32) {
    %c0_i32 = arith.constant 0 : i32
    %c0_i32_0 = arith.constant 0 : i32
    %c0_i32_1 = arith.constant 0 : i32
    return %c0_i32, %c0_i32_0 : i32, i32
  }
  func.func @transform_3(%arg0: i32) -> (i32, i32) {
    %c0_i32 = arith.constant 0 : i32
    %c0_i32_0 = arith.constant 0 : i32
    return %arg0, %c0_i32 : i32, i32
  }
}

module attributes {stable_mosaic.version = 11 : i64} {
  func.func @_packed_linear_kernel(%arg0: i32, %arg1: memref<8x136xbf16, #tpu.memory_space<vmem>>, %arg2: memref<136x264xbf16, #tpu.memory_space<vmem>>, %arg3: memref<1x264xf32, #tpu.memory_space<vmem>>, %arg4: memref<8x264xbf16, #tpu.memory_space<vmem>>) attributes {dimension_semantics = [#tpu.dimension_semantics<parallel>], iteration_bounds = array<i64: 2>, scalar_prefetch = 0 : i64, scratch_operands = 0 : i64, tpu.core_type = #tpu.core_type<tc>, window_params = [{transform_indices = @transform_0, window_bounds = array<i64: 8, 136>}, {pipeline_mode = #tpu.pipeline_mode<synchronous>, transform_indices = @transform_1, window_bounds = array<i64: 136, 264>}, {pipeline_mode = #tpu.pipeline_mode<synchronous>, transform_indices = @transform_2, window_bounds = array<i64: 1, 264>}, {transform_indices = @transform_3, window_bounds = array<i64: 8, 264>}]} {
    %c0 = arith.constant 0 : index
    %c0_0 = arith.constant 0 : index
    %0 = vector.load %arg1[%c0, %c0_0] : memref<8x136xbf16, #tpu.memory_space<vmem>>, vector<8x136xbf16>
    %c0_1 = arith.constant 0 : index
    %c0_2 = arith.constant 0 : index
    %1 = vector.load %arg2[%c0_1, %c0_2] : memref<136x264xbf16, #tpu.memory_space<vmem>>, vector<136x264xbf16>
    %cst = arith.constant dense<0.000000e+00> : vector<8x264xf32>
    %2 = tpu.matmul %0, %1, %cst {dimension_numbers = #tpu.dot_dimension_numbers<[1], [0], [0], [1], [0, 0, 1, 1], [], []>} : vector<8x136xbf16>, vector<136x264xbf16>, vector<8x264xf32> -> vector<8x264xf32>
    %c0_3 = arith.constant 0 : index
    %c0_4 = arith.constant 0 : index
    %3 = vector.load %arg3[%c0_3, %c0_4] : memref<1x264xf32, #tpu.memory_space<vmem>>, vector<1x264xf32>
    %4 = vector.broadcast %3 : vector<1x264xf32> to vector<8x264xf32>
    %5 = arith.addf %2, %4 : vector<8x264xf32>
    %6 = arith.truncf %5 : vector<8x264xf32> to vector<8x264xbf16>
    %c0_5 = arith.constant 0 : index
    %c0_6 = arith.constant 0 : index
    %7 = vector.load %arg4[%c0_5, %c0_6] : memref<8x264xbf16, #tpu.memory_space<vmem>>, vector<8x264xbf16>
    tpu.vector_store %arg4[%c0_5, %c0_6], %6 {strides = array<i32>} : memref<8x264xbf16, #tpu.memory_space<vmem>>, vector<8x264xbf16>,
    return
  }
  func.func @transform_0(%arg0: i32) -> (i32, i32) {
    %c0_i32 = arith.constant 0 : i32
    %c0_i32_0 = arith.constant 0 : i32
    return %arg0, %c0_i32 : i32, i32
  }
  func.func @transform_1(%arg0: i32) -> (i32, i32) {
    %c0_i32 = arith.constant 0 : i32
    %c0_i32_0 = arith.constant 0 : i32
    %c0_i32_1 = arith.constant 0 : i32
    return %c0_i32, %c0_i32_0 : i32, i32
  }
  func.func @transform_2(%arg0: i32) -> (i32, i32) {
    %c0_i32 = arith.constant 0 : i32
    %c0_i32_0 = arith.constant 0 : i32
    %c0_i32_1 = arith.constant 0 : i32
    return %c0_i32, %c0_i32_0 : i32, i32
  }
  func.func @transform_3(%arg0: i32) -> (i32, i32) {
    %c0_i32 = arith.constant 0 : i32
    %c0_i32_0 = arith.constant 0 : i32
    return %arg0, %c0_i32 : i32, i32
  }
}

module attributes {stable_mosaic.version = 11 : i64} {
  func.func @_gp_gated_kernel(%arg0: i32, %arg1: memref<8x264xbf16, #tpu.memory_space<vmem>>, %arg2: memref<128x2048xbf16, #tpu.memory_space<vmem>>, %arg3: memref<128x2048xbf16, #tpu.memory_space<vmem>>, %arg4: memref<2048x128xbf16, #tpu.memory_space<vmem>>, %arg5: memref<128x128xbf16, #tpu.memory_space<vmem>>, %arg6: memref<8x136xbf16, #tpu.memory_space<vmem>>) attributes {dimension_semantics = [#tpu.dimension_semantics<parallel>], iteration_bounds = array<i64: 2>, scalar_prefetch = 0 : i64, scratch_operands = 0 : i64, tpu.core_type = #tpu.core_type<tc>, window_params = [{transform_indices = @transform_0, window_bounds = array<i64: 8, 264>}, {pipeline_mode = #tpu.pipeline_mode<synchronous>, transform_indices = @transform_1, window_bounds = array<i64: 128, 2048>}, {pipeline_mode = #tpu.pipeline_mode<synchronous>, transform_indices = @transform_2, window_bounds = array<i64: 128, 2048>}, {pipeline_mode = #tpu.pipeline_mode<synchronous>, transform_indices = @transform_3, window_bounds = array<i64: 2048, 128>}, {pipeline_mode = #tpu.pipeline_mode<synchronous>, transform_indices = @transform_4, window_bounds = array<i64: 128, 128>}, {transform_indices = @transform_5, window_bounds = array<i64: 8, 136>}]} {
    %c0 = arith.constant 0 : index
    %c0_0 = arith.constant 0 : index
    %0 = vector.load %arg1[%c0, %c0_0] : memref<8x264xbf16, #tpu.memory_space<vmem>>, vector<8x128xbf16>
    %c0_1 = arith.constant 0 : index
    %c128 = arith.constant 128 : index
    %1 = vector.load %arg1[%c0_1, %c128] : memref<8x264xbf16, #tpu.memory_space<vmem>>, vector<8x128xbf16>
    %c0_2 = arith.constant 0 : index
    %c0_3 = arith.constant 0 : index
    %2 = vector.load %arg2[%c0_2, %c0_3] : memref<128x2048xbf16, #tpu.memory_space<vmem>>, vector<128x2048xbf16>
    %cst = arith.constant dense<0.000000e+00> : vector<8x2048xf32>
    %3 = tpu.matmul %0, %2, %cst {dimension_numbers = #tpu.dot_dimension_numbers<[1], [0], [0], [1], [0, 0, 1, 1], [], []>} : vector<8x128xbf16>, vector<128x2048xbf16>, vector<8x2048xf32> -> vector<8x2048xf32>
    %c0_4 = arith.constant 0 : index
    %c0_5 = arith.constant 0 : index
    %4 = vector.load %arg3[%c0_4, %c0_5] : memref<128x2048xbf16, #tpu.memory_space<vmem>>, vector<128x2048xbf16>
    %cst_6 = arith.constant dense<0.000000e+00> : vector<8x2048xf32>
    %5 = tpu.matmul %1, %4, %cst_6 {dimension_numbers = #tpu.dot_dimension_numbers<[1], [0], [0], [1], [0, 0, 1, 1], [], []>} : vector<8x128xbf16>, vector<128x2048xbf16>, vector<8x2048xf32> -> vector<8x2048xf32>
    %6 = arith.mulf %3, %5 : vector<8x2048xf32>
    %7 = arith.truncf %6 : vector<8x2048xf32> to vector<8x2048xbf16>
    %c0_7 = arith.constant 0 : index
    %c0_8 = arith.constant 0 : index
    %8 = vector.load %arg4[%c0_7, %c0_8] : memref<2048x128xbf16, #tpu.memory_space<vmem>>, vector<2048x128xbf16>
    %cst_9 = arith.constant dense<0.000000e+00> : vector<8x128xf32>
    %9 = tpu.matmul %7, %8, %cst_9 {dimension_numbers = #tpu.dot_dimension_numbers<[1], [0], [0], [1], [0, 0, 1, 1], [], []>} : vector<8x2048xbf16>, vector<2048x128xbf16>, vector<8x128xf32> -> vector<8x128xf32>
    %10 = arith.truncf %9 : vector<8x128xf32> to vector<8x128xbf16>
    %c0_10 = arith.constant 0 : index
    %c0_11 = arith.constant 0 : index
    %11 = vector.load %arg5[%c0_10, %c0_11] : memref<128x128xbf16, #tpu.memory_space<vmem>>, vector<128x128xbf16>
    %cst_12 = arith.constant dense<0.000000e+00> : vector<8x128xf32>
    %12 = tpu.matmul %10, %11, %cst_12 {dimension_numbers = #tpu.dot_dimension_numbers<[1], [0], [0], [1], [0, 0, 1, 1], [], []>} : vector<8x128xbf16>, vector<128x128xbf16>, vector<8x128xf32> -> vector<8x128xf32>
    %13 = arith.mulf %12, %12 : vector<8x128xf32>
    %14 = arith.mulf %12, %13 : vector<8x128xf32>
    %cst_13 = arith.constant 4.471500e-02 : f32
    %15 = vector.broadcast %cst_13 : f32 to vector<8x128xf32>
    %16 = arith.mulf %15, %14 : vector<8x128xf32>
    %17 = arith.addf %12, %16 : vector<8x128xf32>
    %cst_14 = arith.constant 0.797884583 : f32
    %18 = vector.broadcast %cst_14 : f32 to vector<8x128xf32>
    %19 = arith.mulf %18, %17 : vector<8x128xf32>
    %20 = math.tanh %19 : vector<8x128xf32>
    %cst_15 = arith.constant 1.000000e+00 : f32
    %21 = vector.broadcast %cst_15 : f32 to vector<8x128xf32>
    %22 = arith.addf %21, %20 : vector<8x128xf32>
    %cst_16 = arith.constant 5.000000e-01 : f32
    %23 = vector.broadcast %cst_16 : f32 to vector<8x128xf32>
    %24 = arith.mulf %23, %22 : vector<8x128xf32>
    %25 = arith.mulf %12, %24 : vector<8x128xf32>
    %26 = arith.mulf %9, %25 : vector<8x128xf32>
    %27 = arith.truncf %26 : vector<8x128xf32> to vector<8x128xbf16>
    %c0_17 = arith.constant 0 : index
    %c0_18 = arith.constant 0 : index
    %28 = vector.load %arg6[%c0_17, %c0_18] : memref<8x136xbf16, #tpu.memory_space<vmem>>, vector<8x128xbf16>
    tpu.vector_store %arg6[%c0_17, %c0_18], %27 {strides = array<i32>} : memref<8x136xbf16, #tpu.memory_space<vmem>>, vector<8x128xbf16>,
    %c0_19 = arith.constant 0 : index
    %c256 = arith.constant 256 : index
    %29 = vector.load %arg1[%c0_19, %c256] : memref<8x264xbf16, #tpu.memory_space<vmem>>, vector<8x8xbf16>
    %30 = arith.extf %29 : vector<8x8xbf16> to vector<8x8xf32>
    %31 = arith.mulf %30, %30 : vector<8x8xf32>
    %32 = arith.mulf %30, %31 : vector<8x8xf32>
    %cst_20 = arith.constant 4.471500e-02 : f32
    %33 = vector.broadcast %cst_20 : f32 to vector<8x8xf32>
    %34 = arith.mulf %33, %32 : vector<8x8xf32>
    %35 = arith.addf %30, %34 : vector<8x8xf32>
    %cst_21 = arith.constant 0.797884583 : f32
    %36 = vector.broadcast %cst_21 : f32 to vector<8x8xf32>
    %37 = arith.mulf %36, %35 : vector<8x8xf32>
    %38 = math.tanh %37 : vector<8x8xf32>
    %cst_22 = arith.constant 1.000000e+00 : f32
    %39 = vector.broadcast %cst_22 : f32 to vector<8x8xf32>
    %40 = arith.addf %39, %38 : vector<8x8xf32>
    %cst_23 = arith.constant 5.000000e-01 : f32
    %41 = vector.broadcast %cst_23 : f32 to vector<8x8xf32>
    %42 = arith.mulf %41, %40 : vector<8x8xf32>
    %43 = arith.mulf %30, %42 : vector<8x8xf32>
    %44 = arith.truncf %43 : vector<8x8xf32> to vector<8x8xbf16>
    %c0_24 = arith.constant 0 : index
    %c128_25 = arith.constant 128 : index
    %45 = vector.load %arg6[%c0_24, %c128_25] : memref<8x136xbf16, #tpu.memory_space<vmem>>, vector<8x8xbf16>
    tpu.vector_store %arg6[%c0_24, %c128_25], %44 {strides = array<i32>} : memref<8x136xbf16, #tpu.memory_space<vmem>>, vector<8x8xbf16>,
    return
  }
  func.func @transform_0(%arg0: i32) -> (i32, i32) {
    %c0_i32 = arith.constant 0 : i32
    %c0_i32_0 = arith.constant 0 : i32
    return %arg0, %c0_i32 : i32, i32
  }
  func.func @transform_1(%arg0: i32) -> (i32, i32) {
    %c0_i32 = arith.constant 0 : i32
    %c0_i32_0 = arith.constant 0 : i32
    %c0_i32_1 = arith.constant 0 : i32
    return %c0_i32, %c0_i32_0 : i32, i32
  }
  func.func @transform_2(%arg0: i32) -> (i32, i32) {
    %c0_i32 = arith.constant 0 : i32
    %c0_i32_0 = arith.constant 0 : i32
    %c0_i32_1 = arith.constant 0 : i32
    return %c0_i32, %c0_i32_0 : i32, i32
  }
  func.func @transform_3(%arg0: i32) -> (i32, i32) {
    %c0_i32 = arith.constant 0 : i32
    %c0_i32_0 = arith.constant 0 : i32
    %c0_i32_1 = arith.constant 0 : i32
    return %c0_i32, %c0_i32_0 : i32, i32
  }
  func.func @transform_4(%arg0: i32) -> (i32, i32) {
    %c0_i32 = arith.constant 0 : i32
    %c0_i32_0 = arith.constant 0 : i32
    %c0_i32_1 = arith.constant 0 : i32
    return %c0_i32, %c0_i32_0 : i32, i32
  }
  func.func @transform_5(%arg0: i32) -> (i32, i32) {
    %c0_i32 = arith.constant 0 : i32
    %c0_i32_0 = arith.constant 0 : i32
    return %arg0, %c0_i32 : i32, i32
  }
}

module attributes {stable_mosaic.version = 11 : i64} {
  func.func @_packed_linear_kernel(%arg0: i32, %arg1: memref<8x136xbf16, #tpu.memory_space<vmem>>, %arg2: memref<136x136xbf16, #tpu.memory_space<vmem>>, %arg3: memref<1x136xf32, #tpu.memory_space<vmem>>, %arg4: memref<8x136xbf16, #tpu.memory_space<vmem>>) attributes {dimension_semantics = [#tpu.dimension_semantics<parallel>], iteration_bounds = array<i64: 2>, scalar_prefetch = 0 : i64, scratch_operands = 0 : i64, tpu.core_type = #tpu.core_type<tc>, window_params = [{transform_indices = @transform_0, window_bounds = array<i64: 8, 136>}, {pipeline_mode = #tpu.pipeline_mode<synchronous>, transform_indices = @transform_1, window_bounds = array<i64: 136, 136>}, {pipeline_mode = #tpu.pipeline_mode<synchronous>, transform_indices = @transform_2, window_bounds = array<i64: 1, 136>}, {transform_indices = @transform_3, window_bounds = array<i64: 8, 136>}]} {
    %c0 = arith.constant 0 : index
    %c0_0 = arith.constant 0 : index
    %0 = vector.load %arg1[%c0, %c0_0] : memref<8x136xbf16, #tpu.memory_space<vmem>>, vector<8x136xbf16>
    %c0_1 = arith.constant 0 : index
    %c0_2 = arith.constant 0 : index
    %1 = vector.load %arg2[%c0_1, %c0_2] : memref<136x136xbf16, #tpu.memory_space<vmem>>, vector<136x136xbf16>
    %cst = arith.constant dense<0.000000e+00> : vector<8x136xf32>
    %2 = tpu.matmul %0, %1, %cst {dimension_numbers = #tpu.dot_dimension_numbers<[1], [0], [0], [1], [0, 0, 1, 1], [], []>} : vector<8x136xbf16>, vector<136x136xbf16>, vector<8x136xf32> -> vector<8x136xf32>
    %c0_3 = arith.constant 0 : index
    %c0_4 = arith.constant 0 : index
    %3 = vector.load %arg3[%c0_3, %c0_4] : memref<1x136xf32, #tpu.memory_space<vmem>>, vector<1x136xf32>
    %4 = vector.broadcast %3 : vector<1x136xf32> to vector<8x136xf32>
    %5 = arith.addf %2, %4 : vector<8x136xf32>
    %6 = arith.truncf %5 : vector<8x136xf32> to vector<8x136xbf16>
    %c0_5 = arith.constant 0 : index
    %c0_6 = arith.constant 0 : index
    %7 = vector.load %arg4[%c0_5, %c0_6] : memref<8x136xbf16, #tpu.memory_space<vmem>>, vector<8x136xbf16>
    tpu.vector_store %arg4[%c0_5, %c0_6], %6 {strides = array<i32>} : memref<8x136xbf16, #tpu.memory_space<vmem>>, vector<8x136xbf16>,
    return
  }
  func.func @transform_0(%arg0: i32) -> (i32, i32) {
    %c0_i32 = arith.constant 0 : i32
    %c0_i32_0 = arith.constant 0 : i32
    return %arg0, %c0_i32 : i32, i32
  }
  func.func @transform_1(%arg0: i32) -> (i32, i32) {
    %c0_i32 = arith.constant 0 : i32
    %c0_i32_0 = arith.constant 0 : i32
    %c0_i32_1 = arith.constant 0 : i32
    return %c0_i32, %c0_i32_0 : i32, i32
  }
  func.func @transform_2(%arg0: i32) -> (i32, i32) {
    %c0_i32 = arith.constant 0 : i32
    %c0_i32_0 = arith.constant 0 : i32
    %c0_i32_1 = arith.constant 0 : i32
    return %c0_i32, %c0_i32_0 : i32, i32
  }
  func.func @transform_3(%arg0: i32) -> (i32, i32) {
    %c0_i32 = arith.constant 0 : i32
    %c0_i32_0 = arith.constant 0 : i32
    return %arg0, %c0_i32 : i32, i32
  }
}

module attributes {stable_mosaic.version = 11 : i64} {
  func.func @_packed_linear_kernel(%arg0: i32, %arg1: memref<8x136xbf16, #tpu.memory_space<vmem>>, %arg2: memref<136x68xbf16, #tpu.memory_space<vmem>>, %arg3: memref<1x68xf32, #tpu.memory_space<vmem>>, %arg4: memref<8x68xf32, #tpu.memory_space<vmem>>) attributes {dimension_semantics = [#tpu.dimension_semantics<parallel>], iteration_bounds = array<i64: 2>, scalar_prefetch = 0 : i64, scratch_operands = 0 : i64, tpu.core_type = #tpu.core_type<tc>, window_params = [{transform_indices = @transform_0, window_bounds = array<i64: 8, 136>}, {pipeline_mode = #tpu.pipeline_mode<synchronous>, transform_indices = @transform_1, window_bounds = array<i64: 136, 68>}, {pipeline_mode = #tpu.pipeline_mode<synchronous>, transform_indices = @transform_2, window_bounds = array<i64: 1, 68>}, {transform_indices = @transform_3, window_bounds = array<i64: 8, 68>}]} {
    %c0 = arith.constant 0 : index
    %c0_0 = arith.constant 0 : index
    %0 = vector.load %arg1[%c0, %c0_0] : memref<8x136xbf16, #tpu.memory_space<vmem>>, vector<8x136xbf16>
    %c0_1 = arith.constant 0 : index
    %c0_2 = arith.constant 0 : index
    %1 = vector.load %arg2[%c0_1, %c0_2] : memref<136x68xbf16, #tpu.memory_space<vmem>>, vector<136x68xbf16>
    %cst = arith.constant dense<0.000000e+00> : vector<8x68xf32>
    %2 = tpu.matmul %0, %1, %cst {dimension_numbers = #tpu.dot_dimension_numbers<[1], [0], [0], [1], [0, 0, 1, 1], [], []>} : vector<8x136xbf16>, vector<136x68xbf16>, vector<8x68xf32> -> vector<8x68xf32>
    %c0_3 = arith.constant 0 : index
    %c0_4 = arith.constant 0 : index
    %3 = vector.load %arg3[%c0_3, %c0_4] : memref<1x68xf32, #tpu.memory_space<vmem>>, vector<1x68xf32>
    %4 = vector.broadcast %3 : vector<1x68xf32> to vector<8x68xf32>
    %5 = arith.addf %2, %4 : vector<8x68xf32>
    %c0_5 = arith.constant 0 : index
    %c0_6 = arith.constant 0 : index
    %6 = vector.load %arg4[%c0_5, %c0_6] : memref<8x68xf32, #tpu.memory_space<vmem>>, vector<8x68xf32>
    tpu.vector_store %arg4[%c0_5, %c0_6], %5 {strides = array<i32>} : memref<8x68xf32, #tpu.memory_space<vmem>>, vector<8x68xf32>,
    return
  }
  func.func @transform_0(%arg0: i32) -> (i32, i32) {
    %c0_i32 = arith.constant 0 : i32
    %c0_i32_0 = arith.constant 0 : i32
    return %arg0, %c0_i32 : i32, i32
  }
  func.func @transform_1(%arg0: i32) -> (i32, i32) {
    %c0_i32 = arith.constant 0 : i32
    %c0_i32_0 = arith.constant 0 : i32
    %c0_i32_1 = arith.constant 0 : i32
    return %c0_i32, %c0_i32_0 : i32, i32
  }
  func.func @transform_2(%arg0: i32) -> (i32, i32) {
    %c0_i32 = arith.constant 0 : i32
    %c0_i32_0 = arith.constant 0 : i32
    %c0_i32_1 = arith.constant 0 : i32
    return %c0_i32, %c0_i32_0 : i32, i32
  }
  func.func @transform_3(%arg0: i32) -> (i32, i32) {
    %c0_i32 = arith.constant 0 : i32
    %c0_i32_0 = arith.constant 0 : i32
    return %arg0, %c0_i32 : i32, i32
  }
}

</mosaic_0001>

<bundles_post_ra>
// kernel: gatr_forward.14
= control target key start
LH: loop header
LB: loop body
LE: loop exit
PB: predicated region body
PF: predicated region fallthrough
CT: control target
= control target key end

     0   :  { %s433_s12 = smov 0   ;;  %s483_s0 = inlined_call_operand.vmem [shape: f32[16,68], index: 0, kind: input, shape index: {}]   ;;  %s484_s1 = inlined_call_operand.vmem [shape: bf16[68,136], index: 1, kind: input, shape index: {}]   ;;  %s485_s2 = inlined_call_operand.vmem [shape: f32[1,136], index: 2, kind: input, shape index: {}]   ;;  %s486_s3 = inlined_call_operand.vmem [shape: bf16[16,136], index: 3, kind: output, shape index: {}]  }
   0x1 LB: > { %s356_s13 = sadd.s32 4294967295, %s410_s12   ;;  %p360_p0 = scmp.ge.s32.totalorder %s410_s12, 1  ;;  %s410_s12 = sphi %s433_s12, %s13_s12  }
   0x2   : > { %p136_p1 = scmp.lt.s32.totalorder %s410_s12, 3 }
   0x4   : > { %p137_p2 = pnand %p360_p0, %p136_p1 }
   0x5   : > { %p159_p3 = scmp.lt.s32.totalorder (!%p137_p2), %s356_s13, 1 }
   0x6   : > { %140 = sbr.rel (%p137_p2) target bundleno = 234 (0xea), region = 32 }
   0xb   : > { %v179_v0 = vld [vmem:[%s484_s1 + $0x40] sm:$0x33]  ;;  %vm241_vm0 = vcmask 1041408   ;;  %v392_v3 = vld [vmem:[%s484_s1 + $0x34] ss:$8 sps:$4 sm:$0xff]   ;;  %v412_v4 = vmov 0   ;;  %v182_v15 = vlaneseq }
   0xc   : > { %v373_v1 = vcombine.high %v179_v0, %v179_v0  ;;  %v372_v2 = vcombine.low %v179_v0, %v179_v0  ;;  %280 = vmatprep.mubr.bf16.mxu0 %v412_v4  ;;  %v394_v6 = vld [vmem:[%s484_s1 + $0x30] ss:$8 sps:$4 sm:$0xff]   ;;  %v395_v7 = vld [vmem:[%s484_s1 + $0x24] ss:$8 sps:$4 sm:$0xff]   ;;  %s488_s13 = smov (!%p159_p3, %s356_s13), 1  ;;  %vm237_vm1 = vcmask 556032  }
   0xd   : > { %v397_v8 = vld [vmem:[%s484_s1 + $0x20] ss:$8 sps:$4 sm:$0xff]   ;;  %v398_v9 = vld [vmem:[%s484_s1 + $0x14] ss:$8 sps:$4 sm:$0xff]   ;;  %s361_s26 = sshll.u32 %s488_s13, 3  ;;  %v183_v16 = vshrl.u32 %v182_v15, 7 }
   0xe   : > { %374 = vmatprep.subr.msk.bf16.mxu0 %vm241_vm0, %v373_v1  ;;  %v243_v5 = vsel %vm241_vm0, %v372_v2, 0  ;;  %v400_v10 = vld [vmem:[%s484_s1 + $0x10] ss:$8 sps:$4 sm:$0xff]   ;;  %v401_v11 = vld [vmem:[%s484_s1 + $0x4] ss:$8 sps:$4 sm:$0xff]   ;;  %s162_s6 = scalar_lea.vmem %s483_s0, %s361_s26  ;;  %vm297_vm2 = vcmask 1043456   ;;  %s167_s14 = scalar_lea.vmem %s486_s3, %s361_s26 }
   0xf   : > { %255 = vmatpush1.bf16.msra.mxu0 %v243_v5  ;;  %v403_v12 = vld [vmem:[%s484_s1] ss:$8 sps:$4 sm:$0xff]   ;;  %v184_v17 = vsub.s32 0, %v183_v16  ;;  %v188_v18 = vsub.s32 1, %v183_v16  ;;  %vm298_vm3 = vcmask 64516  }
  0x10   : > { %256 = vmatprep.subr.bf16.mxu0 %v392_v3  ;;  %v169_v13 = vld [vmem:[%s162_s6] sm:$0xff]  ;;  %vm299_vm4 = vmor %vm298_vm3, %vm297_vm2 }
  0x11   : > { %v170_v14 = vpack.c.bf16 %v169_v13, %v169_v13  ;;  %v180_v19 = vld [vmem:[%s485_s2] sm:$0x3] }
  0x12   : > { %v185_v20 = vrot.slane %v180_v19, %v184_v17  ;;  %v189_v21 = vrot.slane %v180_v19, %v188_v18 }
  0x13   : > { %257 = vmatpush1.bf16.msra.mxu0 %v394_v6 }
  0x14   : > { %258 = vmatprep.subr.bf16.mxu0 %v395_v7 }
  0x17   : > { %259 = vmatpush1.bf16.msra.mxu0 %v397_v8 }
  0x18   : > { %260 = vmatprep.subr.bf16.mxu0 %v398_v9 }
  0x1b   : > { %261 = vmatpush1.bf16.msra.mxu0 %v400_v10 }
  0x1c   : > { %262 = vmatprep.subr.bf16.mxu0 %v401_v11 }
  0x1f   : > { %263 = vmatpush1.bf16.msra.mxu0 %v403_v12 }
  0x22   : > { %375 = vmatmul.mubr.msk.bf16.vlgmr.msra.gmra.mxu0 %vm237_vm1, %v170_v14 }
  0xe2   : > { %v282_v22 = vpop.f32.mrf.mxu0 }
  0xe3   : > { %v283_v24 = vadd.f32 %v282_v22, %v185_v20 }
  0xe4   : > { %v284_v23 = vpop.f32.mrf.mxu0 }
  0xe5   : > { %v285_v25 = vadd.f32 %v284_v23, %v189_v21 }
  0xe6   : > { %v286_v26 = vpop.f32.mrf.mxu0 }
  0xe7   : > { %v380_v27 = vpack.c.bf16 %v285_v25, %v283_v24 }
  0xe8   : > { %v287_v28 = vpop.f32.mrf.mxu0 }
  0xe9   : > { %300 = vst.msk [vmem:[%s167_s14] sm:$0xff] %vm299_vm4, %v380_v27 }
  0xea PF: > { %s13_s12 = sadd.s32 1, %s410_s12  }
  0xeb   : > { %p10_p4 = scmp.ge.s32.totalorder %s13_s12, 4  }
  0xed   :  { %12 = sbr.rel (!%p10_p4) target bundleno = 1 (0x1), region = 62 }

// kernel: gatr_forward.16
= control target key start
LH: loop header
LB: loop body
LE: loop exit
PB: predicated region body
PF: predicated region fallthrough
CT: control target
= control target key end

     0   :  { %s801_s12 = smov 0   ;;  %s803_s13 = smov 0   ;;  %s882_s0 = inlined_call_operand.vmem [shape: bf16[2,8,768], index: 0, kind: input, shape index: {}, may-alias: {0,1,2}]   ;;  %s883_s1 = inlined_call_operand.vmem [shape: bf16[2,8,768], index: 1, kind: input, shape index: {}, may-alias: {0,1,2}]   ;;  %s884_s2 = inlined_call_operand.vmem [shape: bf16[2,8,768], index: 2, kind: input, shape index: {}, may-alias: {0,1,2}]   ;;  %s885_s3 = inlined_call_operand.vmem [shape: bf16[2,8,256], index: 3, kind: output, shape index: {}]  }
   0x1   :  { %s805_s14 = smov 0   ;;  %s807_s15 = smov 0  }
   0x2   :  { %s809_s16 = smov 0  }
   0x3 LB: > { %s35_s17 = sadd.s32 1, %s767_s14  ;;  %s39_s18 = sadd.s32 1, %s771_s15  ;;  %s775_s16 = sphi %s809_s16, %s13_s16   ;;  %s771_s15 = sphi %s807_s15, %s889_s15   ;;  %s767_s14 = sphi %s805_s14, %s888_s14   ;;  %s763_s13 = sphi %s803_s13, %s887_s13   ;;  %s759_s12 = sphi %s801_s12, %s886_s12  }
   0x4   : > { %p37_p0 = scmp.ge.s32.totalorder %s35_s17, 2  ;;  %p659_p1 = scmp.ge.s32.totalorder %s775_s16, 1 }
   0x5   : > { %p228_p2 = scmp.lt.s32.totalorder %s775_s16, 5 }
   0x6   : > { %s891_s17 = smov (%p37_p0, %s35_s17), 0  ;;  %s893_s18 = smov (!%p37_p0, %s39_s18), %s771_s15 }
   0x7   : > { %p229_p3 = pnand %p659_p1, %p228_p2  ;;  %p41_p4 = scmp.ge.s32.totalorder %s893_s18, 2 }
   0x8   : > { %p292_p5 = scmp.lt.s32.totalorder (!%p229_p3), %s763_s13, 1  ;;  %s304_s19 = sadd.s32 (!%p229_p3), 2, %s759_s12 }
   0x9   : > { %s895_s18 = smov (%p41_p4, %s893_s18), 0  ;;  %232 = sbr.rel (%p229_p3) target bundleno = 796 (0x31c), region = 32 }
   0xa   : > { %p309_p6 = scmp.lt.s32.totalorder (!%p229_p3), %s304_s19, 5  ;;  %p296_p7 = scmp.lt.s32.totalorder (!%p229_p3), %s759_s12, 5 }
   0xb   : > { %s318_s5 = sadd.s32 (!%p229_p3), 4, %s759_s12  ;;  %p336_p9 = scmp.lt.s32.totalorder (!%p229_p3), %s759_s12, 1 }
   0xc   : > { %p323_p8 = scmp.lt.s32.totalorder (!%p229_p3), %s318_s5, 5 }
   0xe   : > { %v777_v0 = vmov 0.0   ;;  %vm778_vm0 = vmmov 0   ;;  %s897_s13 = smov (!%p292_p5, %s763_s13), 1  ;;  %s899_s19 = smov (!%p309_p6, %s304_s19), 5  ;;  %vm349_vm1 = vcmask 7168   ;;  %v779_v3 = vmov -inf  }
   0xf   : > { %672 = vmatprep.subr.bf16.mxu0 %v777_v0  ;;  %674 = vmatprep.mubr.msk.bf16.mxu0 %vm778_vm0, %v777_v0  ;;  %s838_s20 = smul.u32 6, %s897_s13  ;;  %350 = vst.msk [vmem:[#allocation2] sm:$0xff] %vm349_vm1, %v779_v3  ;;  %351 = vst.msk [vmem:[#allocation3] sm:$0xff] %vm349_vm1, %v777_v0  ;;  %vm397_vm2 = vcmask 64512   ;;  %v780_v9 = vmov 0   ;;  %s901_s5 = smov (!%p323_p8, %s318_s5), 5 }
  0x10   : > { %678 = vmatprep.subr.bf16.mxu1 %v777_v0  ;;  %680 = vmatprep.mubr.msk.bf16.mxu1 %vm778_vm0, %v777_v0  ;;  %s297_s21 = scalar_select %p296_p7, %s759_s12, 5  ;;  %vm432_vm3 = vcmask 1043456  }
  0x11   : > { %s314_s22 = sadd.s32 %s838_s20, %s899_s19  ;;  %729 = vset.pattern.permute.xlu0 %v780_v9  ;;  %730 = vset.pattern.permute.xlu1 %v780_v9  ;;  %s328_s6 = sadd.s32 %s838_s20, %s901_s5 }
  0x12   : > { %s661_s23 = sshll.u32 %s314_s22, 2  ;;  %s301_s24 = sadd.s32 %s838_s20, %s297_s21 }
  0x13   : > { %s316_s27 = scalar_lea.vmem %s883_s1, %s661_s23  ;;  %s660_s28 = sshll.u32 %s301_s24, 2 }
  0x14   : > { %v354_v1 = vld [vmem:[%s316_s27] sm:$0xf]  ;;  %s303_s4 = scalar_lea.vmem %s882_s0, %s660_s28  ;;  %s662_s7 = sshll.u32 %s328_s6, 2 }
  0x15   : > { %673 = vmatpush3.bf16.xpose.msra.mxu0 %v354_v1  ;;  %v353_v2 = vld [vmem:[%s303_s4] sm:$0xf]  ;;  %s330_s10 = scalar_lea.vmem %s884_s2, %s662_s7  ;;  %s903_s12 = smov (!%p336_p9, %s759_s12), 1 }
  0x16   : > { %v396_v10 = vld [vmem:[#allocation2] sm:$0xff]  ;;  %v413_v24 = vld [vmem:[#allocation3] sm:$0xff]  ;;  %s663_s11 = sshll.u32 %s897_s13, 1 }
  0x17   : > { %v355_v14 = vld [vmem:[%s330_s10] sm:$0xf]  ;;  %s341_s19 = sadd.s32 %s663_s11, %s903_s12 }
  0x18   : > { %v434_v15 = vsel %vm432_vm3, %v355_v14, 0  ;;  %s664_s20 = sshll.u32 %s341_s19, 2 }
  0x19   : > { %679 = vmatpush3.bf16.msra.mxu1 %v434_v15  ;;  %s343_s23 = scalar_lea.vmem %s885_s3, %s664_s20 }
  0x1c   : > { %675 = vmatmul.mubr.bf16.vlgmr.msra.gmra.mxu0 %v353_v2 }
  0xdc   : > { %v390_v4 = vpop.f32.mrf.mxu0 }
  0xdd   : > { %v398_v5 = vsel %vm397_vm2, %v390_v4, -inf }
  0xde   : > { %399 = vmax.xlane.f32.xlu0 %v398_v5  ;;  %v676_v6 = vpop.f32.mrf.mxu0 }
  0xe0   : > { %v393_v7 = vpop.f32.mrf.mxu0 }
  0xe2   : > { %v677_v8 = vpop.f32.mrf.mxu0 }
 0x167   : > { %v400_v11 = vpop.xlane.xlu0 %399 }
 0x168   : > { %v401_v12 = vmax.f32 %v396_v10, %v400_v11 }
 0x16a   : > { %v402_v13 = vsub.f32 %v396_v10, %v401_v12  ;;  %478 = vst.msk [vmem:[#allocation2] sm:$0xff] %vm349_vm1, %v401_v12  ;;  %407 = vperm.xlu0 %729, %v401_v12  }
 0x16c   : > { %v403_v20 = vmul.f32 1.442695, %v402_v13 }
 0x1e5   : > { %v408_v16 = vpop.permute.xlu0 %407 }
 0x1e6   : > { %v410_v17 = vsub.f32 %v390_v4, %v408_v16 }
 0x1e8   : > { %v411_v18 = vmul.f32 1.442695, %v410_v17 }
 0x1ea   : > { %731 = vpow2.f32 %v411_v18 }
 0x1eb   : > { %733 = vpow2.f32 %v403_v20 }
 0x1f7   : > { %v732_v19 = vpop.eup %731 }
 0x1f8   : > { %v415_v21 = vsel %vm397_vm2, %v732_v19, 0.0  ;;  %v428_v22 = vpack.c.bf16 %v732_v19, %v732_v19  ;;  %v734_v23 = vpop.eup %733 }
 0x1f9   : > { %416 = vadd.xlane.f32.xlu1 %v415_v21  ;;  %v414_v25 = vmul.f32 %v734_v23, %v413_v24 }
 0x1fa   : > { %681 = vmatmul.mubr.msk.bf16.vlgmr.msra.gmra.mxu1 %vm397_vm2, %v428_v22 }
 0x20a   : > { %424 = vperm.xlu1 %730, %v734_v23  }
 0x282   : > { %v417_v26 = vpop.xlane.xlu1 %416 }
 0x283   : > { %v418_v27 = vadd.f32 %v417_v26, %v414_v25 }
 0x285   : > { %420 = vst.msk [vmem:[#allocation3] sm:$0xff] %vm349_vm1, %v418_v27 }
 0x286   : > { %v425_v34 = vpop.permute.xlu1 %424 }
 0x287   : > { %v427_v35 = vmul.f32 0.0, %v425_v34 }
 0x28c   : > { %v483_v28 = vld [vmem:[#allocation3] sm:$0xff] }
 0x28d   : > { %735 = vrcp.f32 %v483_v28 }
 0x29a   : > { %v736_v29 = vpop.eup %735 }
 0x29b   : > { %487 = vperm.xlu1 %730, %v736_v29  }
 0x2ba   : > { %v470_v30 = vpop.f32.mrf.mxu1 }
 0x2bb   : > { %v476_v36 = vadd.f32 %v470_v30, %v427_v35 }
 0x2bc   : > { %v682_v31 = vpop.f32.mrf.mxu1 }
 0x2be   : > { %v473_v32 = vpop.f32.mrf.mxu1 }
 0x2c0   : > { %v683_v33 = vpop.f32.mrf.mxu1 }
 0x316   : > { %v488_v37 = vpop.permute.xlu1 %487 }
 0x317   : > { %v490_v38 = vmul.f32 %v488_v37, %v476_v36 }
 0x319   : > { %v491_v39 = vpack.c.bf16 %v490_v38, %v490_v38 }
 0x31b   : > { %492 = vst [vmem:[%s343_s23] sm:$0xf] %v491_v39 }
 0x31c PF: > { %s13_s16 = sadd.s32 1, %s775_s16   ;;  %s886_s12 = smov %s767_s14 }
 0x31d   : > { %p10_p10 = scmp.ge.s32.totalorder %s13_s16, 6   ;;  %s887_s13 = smov %s771_s15 }
 0x31e   : > { %s888_s14 = smov %s891_s17  ;;  %s889_s15 = smov %s895_s18 }
 0x31f   :  { %12 = sbr.rel (!%p10_p10) target bundleno = 3 (0x3), region = 76 }

// kernel: gatr_forward.15
= control target key start
LH: loop header
LB: loop body
LE: loop exit
PB: predicated region body
PF: predicated region fallthrough
CT: control target
= control target key end

     0   :  { %s941_s12 = smov 0   ;;  %s1132_s0 = inlined_call_operand.vmem [shape: bf16[16,136], index: 0, kind: input, shape index: {}]   ;;  %s1133_s1 = inlined_call_operand.vmem [shape: bf16[136,768], index: 1, kind: input, shape index: {}]   ;;  %s1134_s2 = inlined_call_operand.vmem [shape: f32[1,768], index: 2, kind: input, shape index: {}]   ;;  %s1135_s3 = inlined_call_operand.vmem [shape: bf16[16,768], index: 3, kind: output, shape index: {}]  }
   0x1 LB: > { %s745_s13 = sadd.s32 4294967295, %s919_s12   ;;  %p749_p0 = scmp.ge.s32.totalorder %s919_s12, 1  ;;  %s919_s12 = sphi %s941_s12, %s13_s12  }
   0x2   : > { %p137_p1 = scmp.lt.s32.totalorder %s919_s12, 3 }
   0x4   : > { %p138_p2 = pnand %p749_p0, %p137_p1 }
   0x5   : > { %p161_p3 = scmp.lt.s32.totalorder (!%p138_p2), %s745_s13, 1 }
   0x6   : > { %141 = sbr.rel (%p138_p2) target bundleno = 284 (0x11c), region = 32 }
   0xb   : > { %v833_v0 = vld [vmem:[%s1133_s1 + $0x154] ss:$24 sps:$4 sm:$0xff]   ;;  %v835_v1 = vld [vmem:[%s1133_s1 + $0x150] ss:$24 sps:$4 sm:$0xff]   ;;  %v836_v2 = vld [vmem:[%s1133_s1 + $0x124] ss:$24 sps:$4 sm:$0xff]   ;;  %v226_v63 = vlaneseq }
   0xc   : > { %540 = vmatprep.subr.bf16.mxu0 %v833_v0  ;;  %v838_v3 = vld [vmem:[%s1133_s1 + $0x120] ss:$24 sps:$4 sm:$0xff]   ;;  %s1137_s13 = smov (!%p161_p3, %s745_s13), 1  ;;  %v839_v4 = vld [vmem:[%s1133_s1 + $0xf4] ss:$24 sps:$4 sm:$0xff]   ;;  %vm517_vm0 = vcmask 64512  }
   0xd   : > { %541 = vmatpush1.bf16.msra.mxu0 %v835_v1  ;;  %v841_v5 = vld [vmem:[%s1133_s1 + $0xf0] ss:$24 sps:$4 sm:$0xff]   ;;  %s820_s26 = sshll.u32 %s1137_s13, 3  ;;  %v842_v6 = vld [vmem:[%s1133_s1 + $0xc4] ss:$24 sps:$4 sm:$0xff]   ;;  %vm521_vm1 = vcmask 1043456  }
   0xe   : > { %542 = vmatprep.subr.bf16.mxu0 %v836_v2  ;;  %v844_v7 = vld [vmem:[%s1133_s1 + $0xc0] ss:$24 sps:$4 sm:$0xff]   ;;  %s165_s6 = scalar_lea.vmem %s1132_s0, %s820_s26  ;;  %v857_v8 = vld [vmem:[%s1133_s1 + $0x15c] ss:$24 sps:$4 sm:$0xff]   ;;  %v862_v11 = vld [vmem:[%s1133_s1 + $0x12c] ss:$24 sps:$4 sm:$0xff]  }
   0xf   : > { %v859_v9 = vld [vmem:[%s1133_s1 + $0x158] ss:$24 sps:$4 sm:$0xff]   ;;  %v845_v10 = vld [vmem:[%s1133_s1 + $0x94] ss:$24 sps:$4 sm:$0xff]   ;;  %581 = vmatprep.subr.bf16.mxu1 %v857_v8  ;;  %v172_v12 = vld [vmem:[%s165_s6] sm:$0xff]  ;;  %v227_v0 = vshrl.u32 %v226_v63, 7 }
  0x10   : > { %582 = vmatpush1.bf16.msra.mxu1 %v859_v9  ;;  %v991_v13 = vcombine.high %v172_v12, %v172_v12  ;;  %v865_v14 = vld [vmem:[%s1133_s1 + $0x128] ss:$24 sps:$4 sm:$0xff]   ;;  %v848_v16 = vld [vmem:[%s1133_s1 + $0x64] ss:$24 sps:$4 sm:$0xff]   ;;  %v872_v19 = vld [vmem:[%s1133_s1 + $0xf8] ss:$24 sps:$4 sm:$0xff]   ;;  %v753_v36 = vcombine.low %v172_v12, %v172_v12 }
  0x11   : > { %543 = vmatpush1.bf16.msra.mxu0 %v838_v3  ;;  %v847_v15 = vld [vmem:[%s1133_s1 + $0x90] ss:$24 sps:$4 sm:$0xff]   ;;  %583 = vmatprep.subr.bf16.mxu1 %v862_v11  ;;  %v870_v17 = vld [vmem:[%s1133_s1 + $0xfc] ss:$24 sps:$4 sm:$0xff]   ;;  %v850_v18 = vld [vmem:[%s1133_s1 + $0x60] ss:$24 sps:$4 sm:$0xff]  }
  0x12   : > { %544 = vmatprep.subr.bf16.mxu0 %v839_v4  ;;  %810 = vmatprep.mubr.msk.bf16.mxu0 %vm517_vm0, %v991_v13  ;;  %v876_v20 = vld [vmem:[%s1133_s1 + $0xcc] ss:$24 sps:$4 sm:$0xff]   ;;  %v853_v22 = vld [vmem:[%s1133_s1 + $0x30] ss:$24 sps:$4 sm:$0xff]   ;;  %v882_v24 = vld [vmem:[%s1133_s1 + $0x9c] ss:$24 sps:$4 sm:$0xff]  }
  0x13   : > { %812 = vmatprep.mubr.msk.bf16.mxu1 %vm517_vm0, %v991_v13  ;;  %v851_v21 = vld [vmem:[%s1133_s1 + $0x34] ss:$24 sps:$4 sm:$0xff]   ;;  %v878_v23 = vld [vmem:[%s1133_s1 + $0xc8] ss:$24 sps:$4 sm:$0xff]   ;;  %v854_v25 = vld [vmem:[%s1133_s1 + $0x4] ss:$24 sps:$4 sm:$0xff]  }
  0x14   : > { %584 = vmatpush1.bf16.msra.mxu1 %v865_v14  ;;  %v856_v26 = vld [vmem:[%s1133_s1] ss:$24 sps:$4 sm:$0xff]   ;;  %v888_v29 = vld [vmem:[%s1133_s1 + $0x6c] ss:$24 sps:$4 sm:$0xff]   ;;  %v894_v33 = vld [vmem:[%s1133_s1 + $0x3c] ss:$24 sps:$4 sm:$0xff]  }
  0x15   : > { %545 = vmatpush1.bf16.msra.mxu0 %v841_v5  ;;  %585 = vmatprep.subr.bf16.mxu1 %v870_v17  ;;  %v221_v27 = vld [vmem:[%s1133_s1 + $0x180] sm:$0xff]  ;;  %v884_v28 = vld [vmem:[%s1133_s1 + $0x98] ss:$24 sps:$4 sm:$0xff]   ;;  %v875_v40 = vld [vmem:[%s1133_s1 + $0x134] ss:$24 sps:$4 sm:$0xff]   ;;  %v228_v1 = vsub.s32 0, %v227_v0 }
  0x16   : > { %546 = vmatprep.subr.bf16.mxu0 %v842_v6  ;;  %v804_v30 = vcombine.high %v221_v27, %v221_v27  ;;  %v803_v31 = vcombine.low %v221_v27, %v221_v27  ;;  %v890_v32 = vld [vmem:[%s1133_s1 + $0x68] ss:$24 sps:$4 sm:$0xff]   ;;  %v869_v35 = vld [vmem:[%s1133_s1 + $0x164] ss:$24 sps:$4 sm:$0xff]   ;;  %v896_v37 = vld [vmem:[%s1133_s1 + $0x38] ss:$24 sps:$4 sm:$0xff]  }
  0x17   : > { %v867_v38 = vld [vmem:[%s1133_s1 + $0x160] ss:$24 sps:$4 sm:$0xff]   ;;  %v900_v39 = vld [vmem:[%s1133_s1 + $0xc] ss:$24 sps:$4 sm:$0xff]   ;;  %v873_v43 = vld [vmem:[%s1133_s1 + $0x130] ss:$24 sps:$4 sm:$0xff]  }
  0x18   : > { %586 = vmatpush1.bf16.msra.mxu1 %v872_v19  ;;  %v523_v34 = vsel %vm521_vm1, %v803_v31, 0  ;;  %v222_v41 = vld [vmem:[%s1133_s1 + $0x188] sm:$0xff]  ;;  %v881_v46 = vld [vmem:[%s1133_s1 + $0x104] ss:$24 sps:$4 sm:$0xff]   ;;  %v879_v47 = vld [vmem:[%s1133_s1 + $0x100] ss:$24 sps:$4 sm:$0xff]  }
  0x19   : > { %547 = vmatpush1.bf16.msra.mxu0 %v844_v7  ;;  %587 = vmatprep.subr.bf16.mxu1 %v876_v20  ;;  %v902_v42 = vld [vmem:[%s1133_s1 + $0x8] ss:$24 sps:$4 sm:$0xff]   ;;  %v806_v44 = vcombine.high %v222_v41, %v222_v41  ;;  %v805_v45 = vcombine.low %v222_v41, %v222_v41  ;;  %v887_v49 = vld [vmem:[%s1133_s1 + $0xd4] ss:$24 sps:$4 sm:$0xff]   ;;  %v893_v51 = vld [vmem:[%s1133_s1 + $0xa4] ss:$24 sps:$4 sm:$0xff]  }
  0x1a   : > { %548 = vmatprep.subr.bf16.mxu0 %v845_v10  ;;  %v885_v50 = vld [vmem:[%s1133_s1 + $0xd0] ss:$24 sps:$4 sm:$0xff]   ;;  %v891_v52 = vld [vmem:[%s1133_s1 + $0xa0] ss:$24 sps:$4 sm:$0xff]   ;;  %v899_v53 = vld [vmem:[%s1133_s1 + $0x74] ss:$24 sps:$4 sm:$0xff]  }
  0x1b   : > { %v529_v48 = vsel %vm521_vm1, %v805_v45, 0  ;;  %v897_v54 = vld [vmem:[%s1133_s1 + $0x70] ss:$24 sps:$4 sm:$0xff]   ;;  %v905_v55 = vld [vmem:[%s1133_s1 + $0x44] ss:$24 sps:$4 sm:$0xff]   ;;  %v232_v3 = vsub.s32 1, %v227_v0 }
  0x1c   : > { %588 = vmatpush1.bf16.msra.mxu1 %v878_v23  ;;  %v903_v56 = vld [vmem:[%s1133_s1 + $0x40] ss:$24 sps:$4 sm:$0xff]   ;;  %v910_v57 = vld [vmem:[%s1133_s1 + $0x14] ss:$24 sps:$4 sm:$0xff]   ;;  %v908_v59 = vld [vmem:[%s1133_s1 + $0x10] ss:$24 sps:$4 sm:$0xff]  }
  0x1d   : > { %549 = vmatpush1.bf16.msra.mxu0 %v847_v15  ;;  %589 = vmatprep.subr.bf16.mxu1 %v882_v24  ;;  %v223_v58 = vld [vmem:[%s1133_s1 + $0x190] sm:$0xff]  ;;  %v224_v2 = vld [vmem:[%s1134_s2] sm:$0x3f]  ;;  %s824_s22 = smul.u32 24, %s1137_s13  ;;  %v236_v11 = vsub.s32 2, %v227_v0  ;;  %v240_v14 = vsub.s32 3, %v227_v0 }
  0x1e   : > { %550 = vmatprep.subr.bf16.mxu0 %v848_v16  ;;  %v808_v60 = vcombine.high %v223_v58, %v223_v58  ;;  %v807_v61 = vcombine.low %v223_v58, %v223_v58  ;;  %v229_v4 = vrot.slane %v224_v2, %v228_v1  ;;  %v233_v5 = vrot.slane %v224_v2, %v232_v3 }
  0x1f   : > { %s170_s25 = scalar_lea.vmem %s1135_s3, %s824_s22  ;;  %v237_v15 = vrot.slane %v224_v2, %v236_v11  ;;  %v241_v16 = vrot.slane %v224_v2, %v240_v14  ;;  %v244_v24 = vsub.s32 4, %v227_v0 }
  0x20   : > { %590 = vmatpush1.bf16.msra.mxu1 %v884_v28  ;;  %v535_v62 = vsel %vm521_vm1, %v807_v61, 0 }
  0x21   : > { %551 = vmatpush1.bf16.msra.mxu0 %v850_v18  ;;  %591 = vmatprep.subr.bf16.mxu1 %v888_v29 }
  0x22   : > { %552 = vmatprep.subr.bf16.mxu0 %v851_v21 }
  0x24   : > { %592 = vmatpush1.bf16.msra.mxu1 %v890_v32 }
  0x25   : > { %553 = vmatpush1.bf16.msra.mxu0 %v853_v22  ;;  %593 = vmatprep.subr.bf16.mxu1 %v894_v33 }
  0x26   : > { %554 = vmatprep.subr.bf16.mxu0 %v854_v25  ;;  %v248_v25 = vsub.s32 5, %v227_v0 }
  0x28   : > { %594 = vmatpush1.bf16.msra.mxu1 %v896_v37  ;;  %v249_v27 = vrot.slane %v224_v2, %v248_v25 }
  0x29   : > { %555 = vmatpush1.bf16.msra.mxu0 %v856_v26  ;;  %595 = vmatprep.subr.bf16.mxu1 %v900_v39  ;;  %v245_v26 = vrot.slane %v224_v2, %v244_v24 }
  0x2a   : > { %809 = vmatprep.subr.msk.bf16.mxu0 %vm521_vm1, %v804_v30 }
  0x2c   : > { %596 = vmatpush1.bf16.msra.mxu1 %v902_v42 }
  0x2d   : > { %571 = vmatpush2.bf16.msra.mxu0 %v523_v34  ;;  %811 = vmatprep.subr.msk.bf16.mxu1 %vm521_vm1, %v806_v44 }
  0x2e   : > { %622 = vmatprep.subr.bf16.mxu0 %v869_v35 }
  0x30   : > { %573 = vmatmul.mubr.bf16.vlgmr.msra.gmra.mxu0 %v753_v36  ;;  %612 = vmatpush2.bf16.msra.mxu1 %v529_v48 }
  0x31   : > { %623 = vmatpush1.bf16.msra.mxu0 %v867_v38  ;;  %814 = vmatprep.mubr.msk.bf16.mxu0 %vm517_vm0, %v991_v13 }
  0x32   : > { %624 = vmatprep.subr.bf16.mxu0 %v875_v40 }
  0x33   : > { %614 = vmatmul.mubr.bf16.vlgmr.msra.gmra.mxu1 %v753_v36 }
  0x35   : > { %625 = vmatpush1.bf16.msra.mxu0 %v873_v43 }
  0x36   : > { %626 = vmatprep.subr.bf16.mxu0 %v881_v46 }
  0x39   : > { %627 = vmatpush1.bf16.msra.mxu0 %v879_v47 }
  0x3a   : > { %628 = vmatprep.subr.bf16.mxu0 %v887_v49 }
  0x3d   : > { %629 = vmatpush1.bf16.msra.mxu0 %v885_v50 }
  0x3e   : > { %630 = vmatprep.subr.bf16.mxu0 %v893_v51 }
  0x41   : > { %631 = vmatpush1.bf16.msra.mxu0 %v891_v52 }
  0x42   : > { %632 = vmatprep.subr.bf16.mxu0 %v899_v53 }
  0x45   : > { %633 = vmatpush1.bf16.msra.mxu0 %v897_v54 }
  0x46   : > { %634 = vmatprep.subr.bf16.mxu0 %v905_v55 }
  0x49   : > { %635 = vmatpush1.bf16.msra.mxu0 %v903_v56 }
  0x4a   : > { %636 = vmatprep.subr.bf16.mxu0 %v910_v57 }
  0x4d   : > { %637 = vmatpush1.bf16.msra.mxu0 %v908_v59 }
  0x4e   : > { %813 = vmatprep.subr.msk.bf16.mxu0 %vm521_vm1, %v808_v60 }
  0x51   : > { %653 = vmatpush2.bf16.msra.mxu0 %v535_v62 }
  0x54   : > { %655 = vmatmul.mubr.bf16.vlgmr.msra.gmra.mxu0 %v753_v36 }
  0xf0   : > { %v574_v6 = vpop.f32.mrf.mxu0 }
  0xf1   : > { %v575_v7 = vadd.f32 %v574_v6, %v229_v4 }
  0xf2   : > { %v576_v8 = vpop.f32.mrf.mxu0 }
  0xf3   : > { %v577_v9 = vadd.f32 %v576_v8, %v233_v5  ;;  %v615_v17 = vpop.f32.mrf.mxu1 }
  0xf4   : > { %v578_v10 = vpop.f32.mrf.mxu0  ;;  %v616_v18 = vadd.f32 %v615_v17, %v237_v15 }
  0xf5   : > { %v821_v12 = vpack.c.bf16 %v577_v9, %v575_v7  ;;  %v617_v19 = vpop.f32.mrf.mxu1 }
  0xf6   : > { %v579_v13 = vpop.f32.mrf.mxu0  ;;  %v618_v20 = vadd.f32 %v617_v19, %v241_v16 }
  0xf7   : > { %687 = vst [vmem:[%s170_s25] sm:$0xff] %v821_v12  ;;  %v619_v21 = vpop.f32.mrf.mxu1 }
  0xf8   : > { %v822_v22 = vpack.c.bf16 %v618_v20, %v616_v18 }
  0xf9   : > { %v620_v23 = vpop.f32.mrf.mxu1 }
  0xfa   : > { %688 = vst [vmem:[%s170_s25 + $0x8] sm:$0xff] %v822_v22 }
 0x114   : > { %v656_v28 = vpop.f32.mrf.mxu0 }
 0x115   : > { %v657_v30 = vadd.f32 %v656_v28, %v245_v26 }
 0x116   : > { %v658_v29 = vpop.f32.mrf.mxu0 }
 0x117   : > { %v659_v31 = vadd.f32 %v658_v29, %v249_v27 }
 0x118   : > { %v660_v32 = vpop.f32.mrf.mxu0 }
 0x119   : > { %v823_v33 = vpack.c.bf16 %v659_v31, %v657_v30 }
 0x11a   : > { %v661_v34 = vpop.f32.mrf.mxu0 }
 0x11b   : > { %689 = vst [vmem:[%s170_s25 + $0x10] sm:$0xff] %v823_v33 }
 0x11c PF: > { %s13_s12 = sadd.s32 1, %s919_s12  }
 0x11d   : > { %p10_p4 = scmp.ge.s32.totalorder %s13_s12, 4  }
 0x11f   :  { %12 = sbr.rel (!%p10_p4) target bundleno = 1 (0x1), region = 62 }

// kernel: gatr_forward.17
= control target key start
LH: loop header
LB: loop body
LE: loop exit
PB: predicated region body
PF: predicated region fallthrough
CT: control target
= control target key end

     0   :  { %s626_s12 = smov 0   ;;  %s749_s0 = inlined_call_operand.vmem [shape: bf16[16,256], index: 0, kind: input, shape index: {}]   ;;  %s750_s1 = inlined_call_operand.vmem [shape: bf16[256,136], index: 1, kind: input, shape index: {}]   ;;  %s751_s2 = inlined_call_operand.vmem [shape: f32[1,136], index: 2, kind: input, shape index: {}]   ;;  %s752_s3 = inlined_call_operand.vmem [shape: bf16[16,136], index: 3, kind: output, shape index: {}]  }
   0x1 LB: > { %s491_s13 = sadd.s32 4294967295, %s604_s12   ;;  %p495_p0 = scmp.ge.s32.totalorder %s604_s12, 1  ;;  %s604_s12 = sphi %s626_s12, %s13_s12  }
   0x2   : > { %p137_p1 = scmp.lt.s32.totalorder %s604_s12, 3 }
   0x4   : > { %p138_p2 = pnand %p495_p0, %p137_p1 }
   0x5   : > { %p161_p3 = scmp.lt.s32.totalorder (!%p138_p2), %s491_s13, 1 }
   0x6   : > { %141 = sbr.rel (%p138_p2) target bundleno = 276 (0x114), region = 32 }
   0xb   : > { %v548_v0 = vld [vmem:[%s750_s1 + $0x74] ss:$8 sps:$4 sm:$0xff]   ;;  %v550_v1 = vld [vmem:[%s750_s1 + $0x70] ss:$8 sps:$4 sm:$0xff]   ;;  %v551_v2 = vld [vmem:[%s750_s1 + $0x64] ss:$8 sps:$4 sm:$0xff]   ;;  %v206_v35 = vlaneseq }
   0xc   : > { %383 = vmatprep.subr.bf16.mxu0 %v548_v0  ;;  %v553_v3 = vld [vmem:[%s750_s1 + $0x60] ss:$8 sps:$4 sm:$0xff]   ;;  %v554_v4 = vld [vmem:[%s750_s1 + $0x54] ss:$8 sps:$4 sm:$0xff]   ;;  %v556_v5 = vld [vmem:[%s750_s1 + $0x50] ss:$8 sps:$4 sm:$0xff]  }
   0xd   : > { %384 = vmatpush1.bf16.msra.mxu0 %v550_v1  ;;  %v557_v6 = vld [vmem:[%s750_s1 + $0x44] ss:$8 sps:$4 sm:$0xff]   ;;  %v559_v7 = vld [vmem:[%s750_s1 + $0x40] ss:$8 sps:$4 sm:$0xff]   ;;  %s754_s13 = smov (!%p161_p3, %s491_s13), 1  ;;  %v207_v36 = vshrl.u32 %v206_v35, 7 }
   0xe   : > { %385 = vmatprep.subr.bf16.mxu0 %v551_v2  ;;  %v560_v8 = vld [vmem:[%s750_s1 + $0x34] ss:$8 sps:$4 sm:$0xff]   ;;  %v562_v9 = vld [vmem:[%s750_s1 + $0x30] ss:$8 sps:$4 sm:$0xff]   ;;  %s537_s7 = sshll.u32 %s754_s13, 3  ;;  %vm432_vm0 = vcmask 1043456  }
   0xf   : > { %v563_v10 = vld [vmem:[%s750_s1 + $0x24] ss:$8 sps:$4 sm:$0xff]   ;;  %s165_s14 = scalar_lea.vmem %s749_s0, %s537_s7  ;;  %v565_v11 = vld [vmem:[%s750_s1 + $0x20] ss:$8 sps:$4 sm:$0xff]   ;;  %v566_v12 = vld [vmem:[%s750_s1 + $0x14] ss:$8 sps:$4 sm:$0xff]   ;;  %s170_s11 = scalar_lea.vmem %s752_s3, %s537_s7 }
  0x10   : > { %v171_v13 = vld [vmem:[%s165_s14] sm:$0xff]  ;;  %v568_v15 = vld [vmem:[%s750_s1 + $0x10] ss:$8 sps:$4 sm:$0xff]   ;;  %v572_v18 = vld [vmem:[%s750_s1 + $0xf4] ss:$8 sps:$4 sm:$0xff]   ;;  %v208_v37 = vsub.s32 0, %v207_v36 }
  0x11   : > { %386 = vmatpush1.bf16.msra.mxu0 %v553_v3  ;;  %v501_v14 = vcombine.high %v171_v13, %v171_v13  ;;  %v569_v16 = vld [vmem:[%s750_s1 + $0x4] ss:$8 sps:$4 sm:$0xff]   ;;  %v571_v17 = vld [vmem:[%s750_s1] ss:$8 sps:$4 sm:$0xff]   ;;  %v574_v19 = vld [vmem:[%s750_s1 + $0xf0] ss:$8 sps:$4 sm:$0xff]   ;;  %v500_v34 = vcombine.low %v171_v13, %v171_v13 }
  0x12   : > { %387 = vmatprep.subr.bf16.mxu0 %v554_v4  ;;  %v575_v20 = vld [vmem:[%s750_s1 + $0xe4] ss:$8 sps:$4 sm:$0xff]   ;;  %v577_v21 = vld [vmem:[%s750_s1 + $0xe0] ss:$8 sps:$4 sm:$0xff]   ;;  %v578_v22 = vld [vmem:[%s750_s1 + $0xd4] ss:$8 sps:$4 sm:$0xff]  }
  0x13   : > { %415 = vmatprep.mubr.bf16.mxu0 %v501_v14  ;;  %v580_v23 = vld [vmem:[%s750_s1 + $0xd0] ss:$8 sps:$4 sm:$0xff]   ;;  %v581_v24 = vld [vmem:[%s750_s1 + $0xc4] ss:$8 sps:$4 sm:$0xff]   ;;  %v583_v25 = vld [vmem:[%s750_s1 + $0xc0] ss:$8 sps:$4 sm:$0xff]  }
  0x14   : > { %v584_v26 = vld [vmem:[%s750_s1 + $0xb4] ss:$8 sps:$4 sm:$0xff]   ;;  %v586_v27 = vld [vmem:[%s750_s1 + $0xb0] ss:$8 sps:$4 sm:$0xff]   ;;  %v587_v28 = vld [vmem:[%s750_s1 + $0xa4] ss:$8 sps:$4 sm:$0xff]  }
  0x15   : > { %388 = vmatpush1.bf16.msra.mxu0 %v556_v5  ;;  %v589_v29 = vld [vmem:[%s750_s1 + $0xa0] ss:$8 sps:$4 sm:$0xff]   ;;  %v590_v30 = vld [vmem:[%s750_s1 + $0x94] ss:$8 sps:$4 sm:$0xff]   ;;  %v592_v31 = vld [vmem:[%s750_s1 + $0x90] ss:$8 sps:$4 sm:$0xff]  }
  0x16   : > { %389 = vmatprep.subr.bf16.mxu0 %v557_v6  ;;  %v593_v32 = vld [vmem:[%s750_s1 + $0x84] ss:$8 sps:$4 sm:$0xff]   ;;  %v595_v33 = vld [vmem:[%s750_s1 + $0x80] ss:$8 sps:$4 sm:$0xff]   ;;  %v212_v38 = vsub.s32 1, %v207_v36  ;;  %vm433_vm1 = vcmask 64516  }
  0x17   : > { %v204_v39 = vld [vmem:[%s751_s2] sm:$0x3]  ;;  %vm434_vm2 = vmor %vm433_vm1, %vm432_vm0 }
  0x18   : > { %v209_v40 = vrot.slane %v204_v39, %v208_v37  ;;  %v213_v41 = vrot.slane %v204_v39, %v212_v38 }
  0x19   : > { %390 = vmatpush1.bf16.msra.mxu0 %v559_v7 }
  0x1a   : > { %391 = vmatprep.subr.bf16.mxu0 %v560_v8 }
  0x1d   : > { %392 = vmatpush1.bf16.msra.mxu0 %v562_v9 }
  0x1e   : > { %393 = vmatprep.subr.bf16.mxu0 %v563_v10 }
  0x21   : > { %394 = vmatpush1.bf16.msra.mxu0 %v565_v11 }
  0x22   : > { %395 = vmatprep.subr.bf16.mxu0 %v566_v12 }
  0x25   : > { %396 = vmatpush1.bf16.msra.mxu0 %v568_v15 }
  0x26   : > { %397 = vmatprep.subr.bf16.mxu0 %v569_v16 }
  0x29   : > { %398 = vmatpush1.bf16.msra.mxu0 %v571_v17 }
  0x2a   : > { %399 = vmatprep.subr.bf16.mxu0 %v572_v18 }
  0x2d   : > { %400 = vmatpush2.bf16.msra.mxu0 %v574_v19 }
  0x2e   : > { %401 = vmatprep.subr.bf16.mxu0 %v575_v20 }
  0x31   : > { %402 = vmatpush2.bf16.msra.mxu0 %v577_v21 }
  0x32   : > { %403 = vmatprep.subr.bf16.mxu0 %v578_v22 }
  0x35   : > { %404 = vmatpush2.bf16.msra.mxu0 %v580_v23 }
  0x36   : > { %405 = vmatprep.subr.bf16.mxu0 %v581_v24 }
  0x39   : > { %406 = vmatpush2.bf16.msra.mxu0 %v583_v25 }
  0x3a   : > { %407 = vmatprep.subr.bf16.mxu0 %v584_v26 }
  0x3d   : > { %408 = vmatpush2.bf16.msra.mxu0 %v586_v27 }
  0x3e   : > { %409 = vmatprep.subr.bf16.mxu0 %v587_v28 }
  0x41   : > { %410 = vmatpush2.bf16.msra.mxu0 %v589_v29 }
  0x42   : > { %411 = vmatprep.subr.bf16.mxu0 %v590_v30 }
  0x45   : > { %412 = vmatpush2.bf16.msra.mxu0 %v592_v31 }
  0x46   : > { %413 = vmatprep.subr.bf16.mxu0 %v593_v32 }
  0x49   : > { %414 = vmatpush2.bf16.msra.mxu0 %v595_v33 }
  0x4c   : > { %416 = vmatmul.mubr.bf16.vlgmr.msra.gmra.mxu0 %v500_v34 }
 0x10c   : > { %v417_v42 = vpop.f32.mrf.mxu0 }
 0x10d   : > { %v418_v44 = vadd.f32 %v417_v42, %v209_v40 }
 0x10e   : > { %v419_v43 = vpop.f32.mrf.mxu0 }
 0x10f   : > { %v420_v45 = vadd.f32 %v419_v43, %v213_v41 }
 0x110   : > { %v421_v46 = vpop.f32.mrf.mxu0 }
 0x111   : > { %v539_v47 = vpack.c.bf16 %v420_v45, %v418_v44 }
 0x112   : > { %v422_v48 = vpop.f32.mrf.mxu0 }
 0x113   : > { %435 = vst.msk [vmem:[%s170_s11] sm:$0xff] %vm434_vm2, %v539_v47 }
 0x114 PF: > { %s13_s12 = sadd.s32 1, %s604_s12  }
 0x115   : > { %p10_p4 = scmp.ge.s32.totalorder %s13_s12, 4  }
 0x117   :  { %12 = sbr.rel (!%p10_p4) target bundleno = 1 (0x1), region = 62 }

// kernel: gatr_forward.18
= control target key start
LH: loop header
LB: loop body
LE: loop exit
PB: predicated region body
PF: predicated region fallthrough
CT: control target
= control target key end

     0   :  { %s655_s12 = smov 0   ;;  %s766_s0 = inlined_call_operand.vmem [shape: bf16[16,136], index: 0, kind: input, shape index: {}]   ;;  %s767_s1 = inlined_call_operand.vmem [shape: bf16[136,264], index: 1, kind: input, shape index: {}]   ;;  %s768_s2 = inlined_call_operand.vmem [shape: f32[1,264], index: 2, kind: input, shape index: {}]   ;;  %s769_s3 = inlined_call_operand.vmem [shape: bf16[16,264], index: 3, kind: output, shape index: {}]  }
   0x1 LB: > { %s532_s13 = sadd.s32 4294967295, %s632_s12   ;;  %p536_p0 = scmp.ge.s32.totalorder %s632_s12, 1  ;;  %s632_s12 = sphi %s655_s12, %s13_s12  }
   0x2   : > { %p137_p1 = scmp.lt.s32.totalorder %s632_s12, 3 }
   0x4   : > { %p138_p2 = pnand %p536_p0, %p137_p1 }
   0x5   : > { %p161_p3 = scmp.lt.s32.totalorder (!%p138_p2), %s532_s13, 1 }
   0x6   : > { %141 = sbr.rel (%p138_p2) target bundleno = 248 (0xf8), region = 32 }
   0xb   : > { %v589_v0 = vld [vmem:[%s767_s1 + $0xac] ss:$12 sps:$4 sm:$0xff]   ;;  %v634_v1 = vmov 0   ;;  %v591_v2 = vld [vmem:[%s767_s1 + $0xb0] ss:$12 sps:$4 sm:$0xff]   ;;  %s771_s13 = smov (!%p161_p3, %s532_s13), 1  ;;  %v209_v34 = vlaneseq }
   0xc   : > { %421 = vmatprep.subr.bf16.mxu1 %v634_v1  ;;  %380 = vmatprep.subr.bf16.mxu0 %v589_v0  ;;  %v592_v3 = vld [vmem:[%s767_s1 + $0xa8] ss:$12 sps:$4 sm:$0xff]   ;;  %v595_v5 = vld [vmem:[%s767_s1 + $0x98] ss:$12 sps:$4 sm:$0xff]   ;;  %v596_v6 = vld [vmem:[%s767_s1 + $0x90] ss:$12 sps:$4 sm:$0xff]  }
   0xd   : > { %422 = vmatpush1.bf16.msra.mxu1 %v591_v2  ;;  %v593_v4 = vld [vmem:[%s767_s1 + $0x94] ss:$12 sps:$4 sm:$0xff]   ;;  %381 = vmatpush1.bf16.msra.mxu0 %v592_v3  ;;  %v597_v7 = vld [vmem:[%s767_s1 + $0x7c] ss:$12 sps:$4 sm:$0xff]   ;;  %v600_v9 = vld [vmem:[%s767_s1 + $0x78] ss:$12 sps:$4 sm:$0xff]  }
   0xe   : > { %423 = vmatprep.subr.bf16.mxu1 %v634_v1  ;;  %382 = vmatprep.subr.bf16.mxu0 %v593_v4  ;;  %v599_v8 = vld [vmem:[%s767_s1 + $0x80] ss:$12 sps:$4 sm:$0xff]   ;;  %v601_v10 = vld [vmem:[%s767_s1 + $0x64] ss:$12 sps:$4 sm:$0xff]   ;;  %v603_v11 = vld [vmem:[%s767_s1 + $0x68] ss:$12 sps:$4 sm:$0xff]  }
   0xf   : > { %v604_v12 = vld [vmem:[%s767_s1 + $0x60] ss:$12 sps:$4 sm:$0xff]   ;;  %s576_s15 = sshll.u32 %s771_s13, 3  ;;  %v607_v14 = vld [vmem:[%s767_s1 + $0x50] ss:$12 sps:$4 sm:$0xff]   ;;  %vm366_vm0 = vcmask 64512  }
  0x10   : > { %v605_v13 = vld [vmem:[%s767_s1 + $0x4c] ss:$12 sps:$4 sm:$0xff]   ;;  %v608_v15 = vld [vmem:[%s767_s1 + $0x48] ss:$12 sps:$4 sm:$0xff]   ;;  %s165_s22 = scalar_lea.vmem %s766_s0, %s576_s15  ;;  %v612_v19 = vld [vmem:[%s767_s1 + $0x30] ss:$12 sps:$4 sm:$0xff]  }
  0x11   : > { %424 = vmatpush1.bf16.msra.mxu1 %v595_v5  ;;  %383 = vmatpush1.bf16.msra.mxu0 %v596_v6  ;;  %v609_v16 = vld [vmem:[%s767_s1 + $0x34] ss:$12 sps:$4 sm:$0xff]   ;;  %v611_v17 = vld [vmem:[%s767_s1 + $0x38] ss:$12 sps:$4 sm:$0xff]   ;;  %v613_v21 = vld [vmem:[%s767_s1 + $0x1c] ss:$12 sps:$4 sm:$0xff]  }
  0x12   : > { %425 = vmatprep.subr.bf16.mxu1 %v634_v1  ;;  %384 = vmatprep.subr.bf16.mxu0 %v597_v7  ;;  %v172_v18 = vld [vmem:[%s165_s22] sm:$0xff]  ;;  %v619_v26 = vld [vmem:[%s767_s1 + $0x8] ss:$12 sps:$4 sm:$0xff]   ;;  %vm370_vm1 = vcmask 1043456   ;;  %v210_v35 = vshrl.u32 %v209_v34, 7  ;;  %s579_s22 = smul.u32 12, %s771_s13 }
  0x13   : > { %v541_v20 = vcombine.high %v172_v18, %v172_v18  ;;  %v615_v22 = vld [vmem:[%s767_s1 + $0x20] ss:$12 sps:$4 sm:$0xff]   ;;  %v616_v23 = vld [vmem:[%s767_s1 + $0x18] ss:$12 sps:$4 sm:$0xff]   ;;  %v622_v28 = vld [vmem:[%s767_s1 + $0xc8] ss:$0 sps:$4 sm:$0xff]   ;;  %v540_v33 = vcombine.low %v172_v18, %v172_v18 }
  0x14   : > { %v617_v24 = vld [vmem:[%s767_s1 + $0x4] ss:$12 sps:$4 sm:$0xff]   ;;  %v620_v27 = vld [vmem:[%s767_s1] ss:$12 sps:$4 sm:$0xff]   ;;  %v378_v31 = vsel %vm370_vm1, %v622_v28, 0  ;;  %v219_v36 = vsub.s32 2, %v210_v35  ;;  %s170_s25 = scalar_lea.vmem %s769_s3, %s579_s22 }
  0x15   : > { %426 = vmatpush1.bf16.msra.mxu1 %v599_v8  ;;  %385 = vmatpush1.bf16.msra.mxu0 %v600_v9  ;;  %v205_v25 = vld [vmem:[%s767_s1 + $0xc0] sm:$0xff]  ;;  %v211_v38 = vsub.s32 0, %v210_v35  ;;  %v215_v39 = vsub.s32 1, %v210_v35  ;;  %vm475_vm2 = vcmask 60416  }
  0x16   : > { %427 = vmatprep.subr.bf16.mxu1 %v634_v1  ;;  %386 = vmatprep.subr.bf16.mxu0 %v601_v10  ;;  %v567_v29 = vcombine.high %v205_v25, %v205_v25  ;;  %v566_v30 = vcombine.low %v205_v25, %v205_v25  ;;  %v207_v37 = vld [vmem:[%s768_s2] sm:$0x7] }
  0x17   : > { %571 = vmatprep.mubr.msk.bf16.mxu1 %vm366_vm0, %v541_v20  ;;  %570 = vmatprep.mubr.msk.bf16.mxu0 %vm366_vm0, %v541_v20  ;;  %v220_v40 = vrot.slane %v207_v37, %v219_v36  ;;  %v212_v42 = vrot.slane %v207_v37, %v211_v38  ;;  %v216_v43 = vrot.slane %v207_v37, %v215_v39 }
  0x18   : > { %v372_v32 = vsel %vm370_vm1, %v566_v30, 0 }
  0x19   : > { %428 = vmatpush1.bf16.msra.mxu1 %v603_v11  ;;  %387 = vmatpush1.bf16.msra.mxu0 %v604_v12 }
  0x1a   : > { %429 = vmatprep.subr.bf16.mxu1 %v634_v1  ;;  %388 = vmatprep.subr.bf16.mxu0 %v605_v13 }
  0x1d   : > { %430 = vmatpush1.bf16.msra.mxu1 %v607_v14  ;;  %389 = vmatpush1.bf16.msra.mxu0 %v608_v15 }
  0x1e   : > { %431 = vmatprep.subr.bf16.mxu1 %v634_v1  ;;  %390 = vmatprep.subr.bf16.mxu0 %v609_v16 }
  0x21   : > { %432 = vmatpush1.bf16.msra.mxu1 %v611_v17  ;;  %391 = vmatpush1.bf16.msra.mxu0 %v612_v19 }
  0x22   : > { %433 = vmatprep.subr.bf16.mxu1 %v634_v1  ;;  %392 = vmatprep.subr.bf16.mxu0 %v613_v21 }
  0x25   : > { %434 = vmatpush1.bf16.msra.mxu1 %v615_v22  ;;  %393 = vmatpush1.bf16.msra.mxu0 %v616_v23 }
  0x26   : > { %435 = vmatprep.subr.bf16.mxu1 %v634_v1  ;;  %394 = vmatprep.subr.bf16.mxu0 %v617_v24 }
  0x29   : > { %436 = vmatpush1.bf16.msra.mxu1 %v619_v26  ;;  %395 = vmatpush1.bf16.msra.mxu0 %v620_v27 }
  0x2a   : > { %451 = vmatprep.subr.bf16.mxu1 %v634_v1  ;;  %569 = vmatprep.subr.msk.bf16.mxu0 %vm370_vm1, %v567_v29 }
  0x2d   : > { %452 = vmatpush2.bf16.msra.mxu1 %v378_v31  ;;  %411 = vmatpush2.bf16.msra.mxu0 %v372_v32 }
  0x30   : > { %454 = vmatmul.mubr.bf16.vlgmr.msra.gmra.mxu1 %v540_v33  ;;  %413 = vmatmul.mubr.bf16.vlgmr.msra.gmra.mxu0 %v540_v33 }
  0xf0   : > { %v455_v41 = vpop.f32.mrf.mxu1  ;;  %v414_v45 = vpop.f32.mrf.mxu0 }
  0xf1   : > { %v456_v44 = vadd.f32 %v455_v41, %v220_v40  ;;  %v415_v49 = vadd.f32 %v414_v45, %v212_v42 }
  0xf2   : > { %v457_v46 = vpop.f32.mrf.mxu1  ;;  %v416_v48 = vpop.f32.mrf.mxu0 }
  0xf3   : > { %v578_v47 = vpack.c.bf16 %v456_v44, %v456_v44  ;;  %v417_v50 = vadd.f32 %v416_v48, %v216_v43 }
  0xf4   : > { %v458_v51 = vpop.f32.mrf.mxu1  ;;  %v418_v52 = vpop.f32.mrf.mxu0 }
  0xf5   : > { %476 = vst.msk [vmem:[%s170_s25 + $0x8] sm:$0xf] %vm475_vm2, %v578_v47  ;;  %v577_v53 = vpack.c.bf16 %v417_v50, %v415_v49 }
  0xf6   : > { %v459_v54 = vpop.f32.mrf.mxu1  ;;  %v419_v55 = vpop.f32.mrf.mxu0 }
  0xf7   : > { %474 = vst [vmem:[%s170_s25] sm:$0xff] %v577_v53 }
  0xf8 PF: > { %s13_s12 = sadd.s32 1, %s632_s12  }
  0xf9   : > { %p10_p4 = scmp.ge.s32.totalorder %s13_s12, 4  }
  0xfb   :  { %12 = sbr.rel (!%p10_p4) target bundleno = 1 (0x1), region = 62 }

// kernel: gatr_forward.20
= control target key start
LH: loop header
LB: loop body
LE: loop exit
PB: predicated region body
PF: predicated region fallthrough
CT: control target
= control target key end

     0   :  { %s512_s12 = smov 0   ;;  %s593_s0 = inlined_call_operand.vmem [shape: bf16[16,136], index: 0, kind: input, shape index: {}]   ;;  %s594_s1 = inlined_call_operand.vmem [shape: bf16[136,136], index: 1, kind: input, shape index: {}]   ;;  %s595_s2 = inlined_call_operand.vmem [shape: f32[1,136], index: 2, kind: input, shape index: {}]   ;;  %s596_s3 = inlined_call_operand.vmem [shape: bf16[16,136], index: 3, kind: output, shape index: {}]  }
   0x1 LB: > { %s411_s13 = sadd.s32 4294967295, %s490_s12   ;;  %p415_p0 = scmp.ge.s32.totalorder %s490_s12, 1  ;;  %s490_s12 = sphi %s512_s12, %s13_s12  }
   0x2   : > { %p137_p1 = scmp.lt.s32.totalorder %s490_s12, 3 }
   0x4   : > { %p138_p2 = pnand %p415_p0, %p137_p1 }
   0x5   : > { %p161_p3 = scmp.lt.s32.totalorder (!%p138_p2), %s411_s13, 1 }
   0x6   : > { %141 = sbr.rel (%p138_p2) target bundleno = 248 (0xf8), region = 32 }
   0xb   : > { %v456_v0 = vld [vmem:[%s594_s1 + $0x74] ss:$8 sps:$4 sm:$0xff]   ;;  %v458_v1 = vld [vmem:[%s594_s1 + $0x70] ss:$8 sps:$4 sm:$0xff]   ;;  %v459_v2 = vld [vmem:[%s594_s1 + $0x64] ss:$8 sps:$4 sm:$0xff]   ;;  %v192_v23 = vlaneseq }
   0xc   : > { %304 = vmatprep.subr.bf16.mxu0 %v456_v0  ;;  %v461_v3 = vld [vmem:[%s594_s1 + $0x60] ss:$8 sps:$4 sm:$0xff]   ;;  %s598_s13 = smov (!%p161_p3, %s411_s13), 1  ;;  %v462_v4 = vld [vmem:[%s594_s1 + $0x54] ss:$8 sps:$4 sm:$0xff]   ;;  %vm293_vm0 = vcmask 64512  }
   0xd   : > { %305 = vmatpush1.bf16.msra.mxu0 %v458_v1  ;;  %s445_s24 = sshll.u32 %s598_s13, 3  ;;  %v464_v5 = vld [vmem:[%s594_s1 + $0x50] ss:$8 sps:$4 sm:$0xff]   ;;  %v465_v6 = vld [vmem:[%s594_s1 + $0x44] ss:$8 sps:$4 sm:$0xff]   ;;  %vm297_vm1 = vcmask 1043456  }
   0xe   : > { %306 = vmatprep.subr.bf16.mxu0 %v459_v2  ;;  %s165_s4 = scalar_lea.vmem %s593_s0, %s445_s24  ;;  %v467_v7 = vld [vmem:[%s594_s1 + $0x40] ss:$8 sps:$4 sm:$0xff]   ;;  %v468_v9 = vld [vmem:[%s594_s1 + $0x34] ss:$8 sps:$4 sm:$0xff]   ;;  %v470_v11 = vld [vmem:[%s594_s1 + $0x30] ss:$8 sps:$4 sm:$0xff]   ;;  %s170_s5 = scalar_lea.vmem %s596_s3, %s445_s24 }
   0xf   : > { %v172_v8 = vld [vmem:[%s165_s4] sm:$0xff]  ;;  %v474_v14 = vld [vmem:[%s594_s1 + $0x14] ss:$8 sps:$4 sm:$0xff]   ;;  %v476_v15 = vld [vmem:[%s594_s1 + $0x10] ss:$8 sps:$4 sm:$0xff]   ;;  %v193_v24 = vshrl.u32 %v192_v23, 7 }
  0x10   : > { %v421_v10 = vcombine.high %v172_v8, %v172_v8  ;;  %v471_v12 = vld [vmem:[%s594_s1 + $0x24] ss:$8 sps:$4 sm:$0xff]   ;;  %v473_v13 = vld [vmem:[%s594_s1 + $0x20] ss:$8 sps:$4 sm:$0xff]   ;;  %v420_v22 = vcombine.low %v172_v8, %v172_v8  ;;  %vm353_vm2 = vcmask 64516  }
  0x11   : > { %307 = vmatpush1.bf16.msra.mxu0 %v461_v3  ;;  %v477_v16 = vld [vmem:[%s594_s1 + $0x4] ss:$8 sps:$4 sm:$0xff]   ;;  %v479_v18 = vld [vmem:[%s594_s1] ss:$8 sps:$4 sm:$0xff]   ;;  %v194_v25 = vsub.s32 0, %v193_v24  ;;  %v198_v26 = vsub.s32 1, %v193_v24  ;;  %vm354_vm3 = vmor %vm353_vm2, %vm297_vm1 }
  0x12   : > { %308 = vmatprep.subr.bf16.mxu0 %v462_v4  ;;  %441 = vmatprep.mubr.msk.bf16.mxu0 %vm293_vm0, %v421_v10  ;;  %v189_v17 = vld [vmem:[%s594_s1 + $0x80] sm:$0xff] }
  0x13   : > { %v439_v19 = vcombine.high %v189_v17, %v189_v17  ;;  %v438_v20 = vcombine.low %v189_v17, %v189_v17  ;;  %v190_v27 = vld [vmem:[%s595_s2] sm:$0x3] }
  0x14   : > { %v195_v28 = vrot.slane %v190_v27, %v194_v25  ;;  %v199_v29 = vrot.slane %v190_v27, %v198_v26 }
  0x15   : > { %309 = vmatpush1.bf16.msra.mxu0 %v464_v5  ;;  %v299_v21 = vsel %vm297_vm1, %v438_v20, 0 }
  0x16   : > { %310 = vmatprep.subr.bf16.mxu0 %v465_v6 }
  0x19   : > { %311 = vmatpush1.bf16.msra.mxu0 %v467_v7 }
  0x1a   : > { %312 = vmatprep.subr.bf16.mxu0 %v468_v9 }
  0x1d   : > { %313 = vmatpush1.bf16.msra.mxu0 %v470_v11 }
  0x1e   : > { %314 = vmatprep.subr.bf16.mxu0 %v471_v12 }
  0x21   : > { %315 = vmatpush1.bf16.msra.mxu0 %v473_v13 }
  0x22   : > { %316 = vmatprep.subr.bf16.mxu0 %v474_v14 }
  0x25   : > { %317 = vmatpush1.bf16.msra.mxu0 %v476_v15 }
  0x26   : > { %318 = vmatprep.subr.bf16.mxu0 %v477_v16 }
  0x29   : > { %319 = vmatpush1.bf16.msra.mxu0 %v479_v18 }
  0x2a   : > { %440 = vmatprep.subr.msk.bf16.mxu0 %vm297_vm1, %v439_v19 }
  0x2d   : > { %335 = vmatpush2.bf16.msra.mxu0 %v299_v21 }
  0x30   : > { %337 = vmatmul.mubr.bf16.vlgmr.msra.gmra.mxu0 %v420_v22 }
  0xf0   : > { %v338_v30 = vpop.f32.mrf.mxu0 }
  0xf1   : > { %v339_v32 = vadd.f32 %v338_v30, %v195_v28 }
  0xf2   : > { %v340_v31 = vpop.f32.mrf.mxu0 }
  0xf3   : > { %v341_v33 = vadd.f32 %v340_v31, %v199_v29 }
  0xf4   : > { %v342_v34 = vpop.f32.mrf.mxu0 }
  0xf5   : > { %v447_v35 = vpack.c.bf16 %v341_v33, %v339_v32 }
  0xf6   : > { %v343_v36 = vpop.f32.mrf.mxu0 }
  0xf7   : > { %355 = vst.msk [vmem:[%s170_s5] sm:$0xff] %vm354_vm3, %v447_v35 }
  0xf8 PF: > { %s13_s12 = sadd.s32 1, %s490_s12  }
  0xf9   : > { %p10_p4 = scmp.ge.s32.totalorder %s13_s12, 4  }
  0xfb   :  { %12 = sbr.rel (!%p10_p4) target bundleno = 1 (0x1), region = 62 }

// kernel: gatr_forward.27
= control target key start
LH: loop header
LB: loop body
LE: loop exit
PB: predicated region body
PF: predicated region fallthrough
CT: control target
= control target key end

     0   :  { %s428_s12 = smov 0   ;;  %s482_s0 = inlined_call_operand.vmem [shape: bf16[16,136], index: 0, kind: input, shape index: {}]   ;;  %s483_s1 = inlined_call_operand.vmem [shape: bf16[136,68], index: 1, kind: input, shape index: {}]   ;;  %s484_s2 = inlined_call_operand.vmem [shape: f32[1,68], index: 2, kind: input, shape index: {}]   ;;  %s485_s3 = inlined_call_operand.vmem [shape: f32[16,68], index: 3, kind: output, shape index: {}]  }
   0x1 LB: > { %s355_s13 = sadd.s32 4294967295, %s405_s12   ;;  %p359_p0 = scmp.ge.s32.totalorder %s405_s12, 1  ;;  %s405_s12 = sphi %s428_s12, %s13_s12  }
   0x2   : > { %p137_p1 = scmp.lt.s32.totalorder %s405_s12, 3 }
   0x4   : > { %p138_p2 = pnand %p359_p0, %p137_p1 }
   0x5   : > { %p160_p3 = scmp.lt.s32.totalorder (!%p138_p2), %s355_s13, 1 }
   0x6   : > { %141 = sbr.rel (%p138_p2) target bundleno = 247 (0xf7), region = 32 }
   0xb   : > { %v388_v0 = vld [vmem:[%s483_s1 + $0x38] sm:$0xff]   ;;  %v407_v1 = vmov 0   ;;  %v389_v2 = vld [vmem:[%s483_s1 + $0x30] sm:$0xff]   ;;  %s487_s13 = smov (!%p160_p3, %s355_s13), 1  ;;  %v390_v3 = vld [vmem:[%s483_s1 + $0x28] sm:$0xff]   ;;  %vm252_vm0 = vcmask 64512  }
   0xc   : > { %260 = vmatprep.subr.bf16.mxu0 %v407_v1  ;;  %s378_s20 = sshll.u32 %s487_s13, 3  ;;  %v391_v6 = vld [vmem:[%s483_s1 + $0x20] sm:$0xff]   ;;  %v392_v7 = vld [vmem:[%s483_s1 + $0x18] sm:$0xff]   ;;  %v393_v8 = vld [vmem:[%s483_s1 + $0x10] sm:$0xff]   ;;  %vm256_vm1 = vcmask 1043456   ;;  %vm300_vm2 = vcmask 556032  }
   0xd   : > { %261 = vmatpush1.bf16.msra.mxu0 %v388_v0  ;;  %s164_s23 = scalar_lea.vmem %s482_s0, %s378_s20  ;;  %v394_v9 = vld [vmem:[%s483_s1 + $0x8] sm:$0xff]   ;;  %v395_v10 = vld [vmem:[%s483_s1] sm:$0xff]   ;;  %s168_s15 = scalar_lea.vmem %s485_s3, %s378_s20 }
   0xe   : > { %262 = vmatprep.subr.bf16.mxu0 %v407_v1  ;;  %v170_v4 = vld [vmem:[%s164_s23] sm:$0xff] }
   0xf   : > { %v365_v5 = vcombine.high %v170_v4, %v170_v4  ;;  %v396_v11 = vld [vmem:[%s483_s1 + $0x40] ss:$0 sps:$4 sm:$0xff]   ;;  %v364_v13 = vcombine.low %v170_v4, %v170_v4 }
  0x10   : > { %v258_v12 = vsel %vm256_vm1, %v396_v11, 0  ;;  %v363_v14 = vld [vmem:[%s484_s2] ss:$0 sm:$0xff] }
  0x11   : > { %263 = vmatpush1.bf16.msra.mxu0 %v389_v2  ;;  %375 = vmatprep.mubr.msk.bf16.mxu0 %vm252_vm0, %v365_v5 }
  0x12   : > { %264 = vmatprep.subr.bf16.mxu0 %v407_v1 }
  0x15   : > { %265 = vmatpush1.bf16.msra.mxu0 %v390_v3 }
  0x16   : > { %266 = vmatprep.subr.bf16.mxu0 %v407_v1 }
  0x19   : > { %267 = vmatpush1.bf16.msra.mxu0 %v391_v6 }
  0x1a   : > { %268 = vmatprep.subr.bf16.mxu0 %v407_v1 }
  0x1d   : > { %269 = vmatpush1.bf16.msra.mxu0 %v392_v7 }
  0x1e   : > { %270 = vmatprep.subr.bf16.mxu0 %v407_v1 }
  0x21   : > { %271 = vmatpush1.bf16.msra.mxu0 %v393_v8 }
  0x22   : > { %272 = vmatprep.subr.bf16.mxu0 %v407_v1 }
  0x25   : > { %273 = vmatpush1.bf16.msra.mxu0 %v394_v9 }
  0x26   : > { %274 = vmatprep.subr.bf16.mxu0 %v407_v1 }
  0x29   : > { %275 = vmatpush1.bf16.msra.mxu0 %v395_v10 }
  0x2a   : > { %290 = vmatprep.subr.bf16.mxu0 %v407_v1 }
  0x2d   : > { %291 = vmatpush2.bf16.msra.mxu0 %v258_v12 }
  0x30   : > { %293 = vmatmul.mubr.bf16.vlgmr.msra.gmra.mxu0 %v364_v13 }
  0xf0   : > { %v294_v15 = vpop.f32.mrf.mxu0 }
  0xf1   : > { %v295_v16 = vadd.f32 %v363_v14, %v294_v15 }
  0xf2   : > { %v296_v17 = vpop.f32.mrf.mxu0 }
  0xf3   : > { %301 = vst.msk [vmem:[%s168_s15] sm:$0xff] %vm300_vm2, %v295_v16 }
  0xf4   : > { %v297_v18 = vpop.f32.mrf.mxu0 }
  0xf6   : > { %v298_v19 = vpop.f32.mrf.mxu0 }
  0xf7 PF: > { %s13_s12 = sadd.s32 1, %s405_s12  }
  0xf8   : > { %p10_p4 = scmp.ge.s32.totalorder %s13_s12, 4  }
  0xfa   :  { %12 = sbr.rel (!%p10_p4) target bundleno = 1 (0x1), region = 62 }

// kernel: gatr_forward.19
= control target key start
LH: loop header
LB: loop body
LE: loop exit
PB: predicated region body
PF: predicated region fallthrough
CT: control target
= control target key end

     0   :  { %s4783_s18 = smov 0   ;;  %s6073_s0 = inlined_call_operand.vmem [shape: bf16[16,264], index: 0, kind: input, shape index: {}]   ;;  %s6074_s1 = inlined_call_operand.vmem [shape: bf16[128,2048], index: 1, kind: input, shape index: {}]   ;;  %s6075_s2 = inlined_call_operand.vmem [shape: bf16[128,2048], index: 2, kind: input, shape index: {}]   ;;  %s6076_s3 = inlined_call_operand.vmem [shape: bf16[2048,128], index: 3, kind: input, shape index: {}]   ;;  %s6077_s4 = inlined_call_operand.vmem [shape: bf16[128,128], index: 4, kind: input, shape index: {}]   ;;  %s6078_s5 = inlined_call_operand.vmem [shape: bf16[16,136], index: 5, kind: output, shape index: {}]  }
   0x1 LB: > { %s3982_s19 = sadd.s32 4294967295, %s4748_s18   ;;  %p3986_p0 = scmp.ge.s32.totalorder %s4748_s18, 1  ;;  %s4748_s18 = sphi %s4783_s18, %s15_s18  }
   0x2   : > { %p187_p1 = scmp.lt.s32.totalorder %s4748_s18, 3 }
   0x4   : > { %p188_p2 = pnand %p3986_p0, %p187_p1 }
   0x5   : > { %p215_p3 = scmp.lt.s32.totalorder (!%p188_p2), %s3982_s19, 1 }
   0x6   : > { %191 = sbr.rel (%p188_p2) target bundleno = 902 (0x386), region = 40 }
   0xb   : > { %v340_v0 = vld [vmem:[%s6074_s1 + $0x380] sm:$0xff]  ;;  %v341_v2 = vld [vmem:[%s6074_s1 + $0x388] sm:$0xff]  ;;  %v4750_v8 = vmov 0   ;;  %s6080_s19 = smov (!%p215_p3, %s3982_s19), 1  ;;  %v342_v63 = vld [vmem:[%s6074_s1 + $0x390] sm:$0xff]  ;;  %vm4752_vm0 = vmmov 0  }
   0xc   : > { %v348_v1 = vld [vmem:[%s6074_s1 + $0x3c0] sm:$0xff]  ;;  %v349_v4 = vld [vmem:[%s6074_s1 + $0x3c8] sm:$0xff]  ;;  %1028 = vmatprep.mubr.bf16.mxu0 %v4750_v8  ;;  %1069 = vmatprep.mubr.bf16.mxu1 %v4750_v8  ;;  %s4590_s13 = smul.u32 12, %s6080_s19  ;;  %s4384_s10 = sshll.u32 %s6080_s19, 3  ;;  %vm3925_vm1 = vcmask 60416  }
   0xd   : > { %v4103_v3 = vcombine.high %v340_v0, %v348_v1  ;;  %v4102_v5 = vcombine.low %v340_v0, %v348_v1  ;;  %v324_v6 = vld [vmem:[%s6074_s1 + $0x300] sm:$0xff]  ;;  %v4105_v9 = vcombine.high %v341_v2, %v349_v4  ;;  %v4104_v10 = vcombine.low %v341_v2, %v349_v4  ;;  %v325_v12 = vld [vmem:[%s6074_s1 + $0x308] sm:$0xff]  ;;  %v350_v0 = vld [vmem:[%s6074_s1 + $0x3d0] sm:$0xff] }
   0xe   : > { %v332_v7 = vld [vmem:[%s6074_s1 + $0x340] sm:$0xff]  ;;  %v333_v13 = vld [vmem:[%s6074_s1 + $0x348] sm:$0xff]  ;;  %v343_v1 = vld [vmem:[%s6074_s1 + $0x398] sm:$0xff]  ;;  %s4911_s26 = scalar_lea.vmem %s6073_s0, %s4590_s13  ;;  %s224_s13 = scalar_lea.vmem %s6078_s5, %s4384_s10 }
   0xf   : > { %v4087_v11 = vcombine.high %v324_v6, %v332_v7  ;;  %v308_v14 = vld [vmem:[%s6074_s1 + $0x280] sm:$0xff]  ;;  %996 = vmatprep.subr.bf16.mxu0 %v4103_v3  ;;  %v4089_v15 = vcombine.high %v325_v12, %v333_v13  ;;  %v309_v17 = vld [vmem:[%s6074_s1 + $0x288] sm:$0xff]  ;;  %1037 = vmatprep.subr.bf16.mxu1 %v4105_v9  ;;  %v4086_v19 = vcombine.low %v324_v6, %v332_v7  ;;  %v351_v2 = vld [vmem:[%s6074_s1 + $0x3d8] sm:$0xff] }
  0x10   : > { %v316_v16 = vld [vmem:[%s6074_s1 + $0x2c0] sm:$0xff]  ;;  %v317_v18 = vld [vmem:[%s6074_s1 + $0x2c8] sm:$0xff]  ;;  %997 = vmatpush1.bf16.msra.mxu0 %v4102_v5  ;;  %1038 = vmatpush1.bf16.msra.mxu1 %v4104_v10  ;;  %v4088_v20 = vcombine.low %v325_v12, %v333_v13  ;;  %v4107_v5 = vcombine.high %v342_v63, %v350_v0  ;;  %v4109_v6 = vcombine.high %v343_v1, %v351_v2  ;;  %v326_v7 = vld [vmem:[%s6074_s1 + $0x310] sm:$0xff] }
  0x11   : > { %998 = vmatprep.subr.bf16.mxu0 %v4087_v11  ;;  %v4071_v21 = vcombine.high %v308_v14, %v316_v16  ;;  %1039 = vmatprep.subr.bf16.mxu1 %v4089_v15  ;;  %v4073_v22 = vcombine.high %v309_v17, %v317_v18  ;;  %v292_v23 = vld [vmem:[%s6074_s1 + $0x200] sm:$0xff]  ;;  %v293_v25 = vld [vmem:[%s6074_s1 + $0x208] sm:$0xff]  ;;  %v4070_v27 = vcombine.low %v308_v14, %v316_v16  ;;  %v334_v9 = vld [vmem:[%s6074_s1 + $0x350] sm:$0xff] }
  0x12   : > { %v300_v24 = vld [vmem:[%s6074_s1 + $0x240] sm:$0xff]  ;;  %v301_v26 = vld [vmem:[%s6074_s1 + $0x248] sm:$0xff]  ;;  %v4072_v28 = vcombine.low %v309_v17, %v317_v18  ;;  %v327_v10 = vld [vmem:[%s6074_s1 + $0x318] sm:$0xff]  ;;  %v4106_v13 = vcombine.low %v342_v63, %v350_v0  ;;  %v4108_v14 = vcombine.low %v343_v1, %v351_v2  ;;  %v4091_v15 = vcombine.high %v326_v7, %v334_v9 }
  0x13   : > { %v4055_v29 = vcombine.high %v292_v23, %v300_v24  ;;  %v4057_v30 = vcombine.high %v293_v25, %v301_v26  ;;  %v276_v31 = vld [vmem:[%s6074_s1 + $0x180] sm:$0xff]  ;;  %v277_v33 = vld [vmem:[%s6074_s1 + $0x188] sm:$0xff]  ;;  %v4054_v35 = vcombine.low %v292_v23, %v300_v24  ;;  %v4056_v36 = vcombine.low %v293_v25, %v301_v26  ;;  %v335_v11 = vld [vmem:[%s6074_s1 + $0x358] sm:$0xff] }
  0x14   : > { %999 = vmatpush1.bf16.msra.mxu0 %v4086_v19  ;;  %1040 = vmatpush1.bf16.msra.mxu1 %v4088_v20  ;;  %v284_v32 = vld [vmem:[%s6074_s1 + $0x1c0] sm:$0xff]  ;;  %v285_v34 = vld [vmem:[%s6074_s1 + $0x1c8] sm:$0xff]  ;;  %v4093_v16 = vcombine.high %v327_v10, %v335_v11  ;;  %v310_v17 = vld [vmem:[%s6074_s1 + $0x290] sm:$0xff] }
  0x15   : > { %1000 = vmatprep.subr.bf16.mxu0 %v4071_v21  ;;  %1041 = vmatprep.subr.bf16.mxu1 %v4073_v22  ;;  %v4039_v37 = vcombine.high %v276_v31, %v284_v32  ;;  %v4041_v38 = vcombine.high %v277_v33, %v285_v34  ;;  %v260_v39 = vld [vmem:[%s6074_s1 + $0x100] sm:$0xff]  ;;  %v261_v41 = vld [vmem:[%s6074_s1 + $0x108] sm:$0xff]  ;;  %v4038_v43 = vcombine.low %v276_v31, %v284_v32  ;;  %v318_v18 = vld [vmem:[%s6074_s1 + $0x2d0] sm:$0xff] }
  0x16   : > { %v268_v40 = vld [vmem:[%s6074_s1 + $0x140] sm:$0xff]  ;;  %v269_v42 = vld [vmem:[%s6074_s1 + $0x148] sm:$0xff]  ;;  %v4040_v44 = vcombine.low %v277_v33, %v285_v34  ;;  %v311_v19 = vld [vmem:[%s6074_s1 + $0x298] sm:$0xff]  ;;  %v4090_v21 = vcombine.low %v326_v7, %v334_v9  ;;  %v4092_v22 = vcombine.low %v327_v10, %v335_v11  ;;  %v4075_v23 = vcombine.high %v310_v17, %v318_v18 }
  0x17   : > { %v4023_v45 = vcombine.high %v260_v39, %v268_v40  ;;  %v4025_v46 = vcombine.high %v261_v41, %v269_v42  ;;  %v244_v47 = vld [vmem:[%s6074_s1 + $0x80] sm:$0xff]  ;;  %v245_v49 = vld [vmem:[%s6074_s1 + $0x88] sm:$0xff]  ;;  %v4022_v51 = vcombine.low %v260_v39, %v268_v40  ;;  %v4024_v52 = vcombine.low %v261_v41, %v269_v42  ;;  %v319_v20 = vld [vmem:[%s6074_s1 + $0x2d8] sm:$0xff] }
  0x18   : > { %1001 = vmatpush1.bf16.msra.mxu0 %v4070_v27  ;;  %1042 = vmatpush1.bf16.msra.mxu1 %v4072_v28  ;;  %v252_v48 = vld [vmem:[%s6074_s1 + $0xc0] sm:$0xff]  ;;  %v253_v50 = vld [vmem:[%s6074_s1 + $0xc8] sm:$0xff]  ;;  %v4077_v24 = vcombine.high %v311_v19, %v319_v20  ;;  %v294_v25 = vld [vmem:[%s6074_s1 + $0x210] sm:$0xff] }
  0x19   : > { %1002 = vmatprep.subr.bf16.mxu0 %v4055_v29  ;;  %1043 = vmatprep.subr.bf16.mxu1 %v4057_v30  ;;  %v4007_v53 = vcombine.high %v244_v47, %v252_v48  ;;  %v4009_v54 = vcombine.high %v245_v49, %v253_v50  ;;  %v228_v55 = vld [vmem:[%s6074_s1] sm:$0xff]  ;;  %v229_v57 = vld [vmem:[%s6074_s1 + $0x8] sm:$0xff]  ;;  %v4006_v59 = vcombine.low %v244_v47, %v252_v48  ;;  %v302_v26 = vld [vmem:[%s6074_s1 + $0x250] sm:$0xff] }
  0x1a   : > { %v236_v56 = vld [vmem:[%s6074_s1 + $0x40] sm:$0xff]  ;;  %v237_v58 = vld [vmem:[%s6074_s1 + $0x48] sm:$0xff]  ;;  %v4008_v60 = vcombine.low %v245_v49, %v253_v50  ;;  %v295_v27 = vld [vmem:[%s6074_s1 + $0x218] sm:$0xff]  ;;  %v4074_v29 = vcombine.low %v310_v17, %v318_v18  ;;  %v4076_v30 = vcombine.low %v311_v19, %v319_v20  ;;  %v4059_v31 = vcombine.high %v294_v25, %v302_v26 }
  0x1b   : > { %v3991_v61 = vcombine.high %v228_v55, %v236_v56  ;;  %v3993_v62 = vcombine.high %v229_v57, %v237_v58  ;;  %v3990_v3 = vcombine.low %v228_v55, %v236_v56  ;;  %v3992_v4 = vcombine.low %v229_v57, %v237_v58  ;;  %v4926_v12 = vld [vmem:[%s4911_s26] sm:$0xf]  ;;  %v303_v28 = vld [vmem:[%s6074_s1 + $0x258] sm:$0xff]  ;;  %v278_v33 = vld [vmem:[%s6074_s1 + $0x190] sm:$0xff] }
  0x1c   : > { %1003 = vmatpush1.bf16.msra.mxu0 %v4054_v35  ;;  %1044 = vmatpush1.bf16.msra.mxu1 %v4056_v36  ;;  %v4061_v32 = vcombine.high %v295_v27, %v303_v28  ;;  %v286_v34 = vld [vmem:[%s6074_s1 + $0x1d0] sm:$0xff]  ;;  %v279_v35 = vld [vmem:[%s6074_s1 + $0x198] sm:$0xff]  ;;  %v344_v1 = vld [vmem:[%s6074_s1 + $0x3a0] sm:$0xff] }
  0x1d   : > { %1004 = vmatprep.subr.bf16.mxu0 %v4039_v37  ;;  %1045 = vmatprep.subr.bf16.mxu1 %v4041_v38  ;;  %v287_v36 = vld [vmem:[%s6074_s1 + $0x1d8] sm:$0xff]  ;;  %v4058_v37 = vcombine.low %v294_v25, %v302_v26  ;;  %v4060_v38 = vcombine.low %v295_v27, %v303_v28  ;;  %v4043_v39 = vcombine.high %v278_v33, %v286_v34  ;;  %v262_v41 = vld [vmem:[%s6074_s1 + $0x110] sm:$0xff]  ;;  %v352_v2 = vld [vmem:[%s6074_s1 + $0x3e0] sm:$0xff] }
  0x1e   : > { %v4045_v40 = vcombine.high %v279_v35, %v287_v36  ;;  %v270_v42 = vld [vmem:[%s6074_s1 + $0x150] sm:$0xff]  ;;  %v4111_v7 = vcombine.high %v344_v1, %v352_v2  ;;  %v328_v10 = vld [vmem:[%s6074_s1 + $0x320] sm:$0xff]  ;;  %v313_v20 = vld [vmem:[%s6074_s1 + $0x2a8] sm:$0xff] }
  0x1f   : > { %v4027_v47 = vcombine.high %v262_v41, %v270_v42  ;;  %v246_v49 = vld [vmem:[%s6074_s1 + $0x90] sm:$0xff]  ;;  %v336_v11 = vld [vmem:[%s6074_s1 + $0x360] sm:$0xff]  ;;  %v297_v28 = vld [vmem:[%s6074_s1 + $0x228] sm:$0xff] }
  0x20   : > { %1005 = vmatpush1.bf16.msra.mxu0 %v4038_v43  ;;  %1046 = vmatpush1.bf16.msra.mxu1 %v4040_v44  ;;  %v263_v43 = vld [vmem:[%s6074_s1 + $0x118] sm:$0xff]  ;;  %v254_v50 = vld [vmem:[%s6074_s1 + $0xd0] sm:$0xff]  ;;  %v4095_v17 = vcombine.high %v328_v10, %v336_v11  ;;  %v312_v18 = vld [vmem:[%s6074_s1 + $0x2a0] sm:$0xff] }
  0x21   : > { %1006 = vmatprep.subr.bf16.mxu0 %v4023_v45  ;;  %1047 = vmatprep.subr.bf16.mxu1 %v4025_v46  ;;  %v271_v44 = vld [vmem:[%s6074_s1 + $0x158] sm:$0xff]  ;;  %v4042_v45 = vcombine.low %v278_v33, %v286_v34  ;;  %v4044_v46 = vcombine.low %v279_v35, %v287_v36  ;;  %v4011_v55 = vcombine.high %v246_v49, %v254_v50  ;;  %v230_v57 = vld [vmem:[%s6074_s1 + $0x10] sm:$0xff]  ;;  %v320_v19 = vld [vmem:[%s6074_s1 + $0x2e0] sm:$0xff] }
  0x22   : > { %v4029_v48 = vcombine.high %v263_v43, %v271_v44  ;;  %v238_v58 = vld [vmem:[%s6074_s1 + $0x50] sm:$0xff]  ;;  %v4079_v25 = vcombine.high %v312_v18, %v320_v19  ;;  %v296_v26 = vld [vmem:[%s6074_s1 + $0x220] sm:$0xff]  ;;  %v281_v36 = vld [vmem:[%s6074_s1 + $0x1a8] sm:$0xff] }
  0x23   : > { %v3995_v63 = vcombine.high %v230_v57, %v238_v58  ;;  %v304_v27 = vld [vmem:[%s6074_s1 + $0x260] sm:$0xff] }
  0x24   : > { %1007 = vmatpush1.bf16.msra.mxu0 %v4022_v51  ;;  %1048 = vmatpush1.bf16.msra.mxu1 %v4024_v52  ;;  %v247_v51 = vld [vmem:[%s6074_s1 + $0x98] sm:$0xff]  ;;  %v4063_v33 = vcombine.high %v296_v26, %v304_v27  ;;  %v280_v34 = vld [vmem:[%s6074_s1 + $0x1a0] sm:$0xff] }
  0x25   : > { %1008 = vmatprep.subr.bf16.mxu0 %v4007_v53  ;;  %1049 = vmatprep.subr.bf16.mxu1 %v4009_v54  ;;  %v255_v52 = vld [vmem:[%s6074_s1 + $0xd8] sm:$0xff]  ;;  %v4026_v53 = vcombine.low %v262_v41, %v270_v42  ;;  %v4028_v54 = vcombine.low %v263_v43, %v271_v44  ;;  %v288_v35 = vld [vmem:[%s6074_s1 + $0x1e0] sm:$0xff]  ;;  %v265_v44 = vld [vmem:[%s6074_s1 + $0x128] sm:$0xff] }
  0x26   : > { %v4013_v56 = vcombine.high %v247_v51, %v255_v52  ;;  %v4047_v41 = vcombine.high %v280_v34, %v288_v35  ;;  %v264_v42 = vld [vmem:[%s6074_s1 + $0x120] sm:$0xff] }
  0x27   : > { %v272_v43 = vld [vmem:[%s6074_s1 + $0x160] sm:$0xff] }
  0x28   : > { %1009 = vmatpush1.bf16.msra.mxu0 %v4006_v59  ;;  %1050 = vmatpush1.bf16.msra.mxu1 %v4008_v60  ;;  %v231_v59 = vld [vmem:[%s6074_s1 + $0x18] sm:$0xff] }
  0x29   : > { %1010 = vmatprep.subr.bf16.mxu0 %v3991_v61  ;;  %1051 = vmatprep.subr.bf16.mxu1 %v3993_v62  ;;  %v239_v60 = vld [vmem:[%s6074_s1 + $0x58] sm:$0xff]  ;;  %v4010_v61 = vcombine.low %v246_v49, %v254_v50  ;;  %v4012_v62 = vcombine.low %v247_v51, %v255_v52  ;;  %v4031_v49 = vcombine.high %v264_v42, %v272_v43  ;;  %v248_v50 = vld [vmem:[%s6074_s1 + $0xa0] sm:$0xff]  ;;  %v249_v52 = vld [vmem:[%s6074_s1 + $0xa8] sm:$0xff] }
  0x2a   : > { %v3997_v0 = vcombine.high %v231_v59, %v239_v60  ;;  %v256_v51 = vld [vmem:[%s6074_s1 + $0xe0] sm:$0xff] }
  0x2c   : > { %1011 = vmatpush1.bf16.msra.mxu0 %v3990_v3  ;;  %1052 = vmatpush1.bf16.msra.mxu1 %v3992_v4  ;;  %v345_v3 = vld [vmem:[%s6074_s1 + $0x3a8] sm:$0xff] }
  0x2d   : > { %1078 = vmatprep.subr.bf16.mxu0 %v4107_v5  ;;  %1119 = vmatprep.subr.bf16.mxu1 %v4109_v6  ;;  %v353_v4 = vld [vmem:[%s6074_s1 + $0x3e8] sm:$0xff]  ;;  %v3994_v5 = vcombine.low %v230_v57, %v238_v58  ;;  %v3996_v6 = vcombine.low %v231_v59, %v239_v60  ;;  %v4015_v57 = vcombine.high %v248_v50, %v256_v51  ;;  %v232_v58 = vld [vmem:[%s6074_s1 + $0x20] sm:$0xff] }
  0x2e   : > { %v4113_v9 = vcombine.high %v345_v3, %v353_v4  ;;  %v240_v59 = vld [vmem:[%s6074_s1 + $0x60] sm:$0xff]  ;;  %v233_v60 = vld [vmem:[%s6074_s1 + $0x28] sm:$0xff] }
  0x2f   : > { %1029 = vmatmul.mubr.bf16.vlgmr.msra.gmra.mxu0 %v4926_v12  ;;  %1070 = vmatmul.mubr.bf16.vlgmr.msra.gmra.mxu1 %v4926_v12 }
  0x30   : > { %1079 = vmatpush1.bf16.msra.mxu0 %v4106_v13  ;;  %1120 = vmatpush1.bf16.msra.mxu1 %v4108_v14  ;;  %v329_v13 = vld [vmem:[%s6074_s1 + $0x328] sm:$0xff] }
  0x31   : > { %1080 = vmatprep.subr.bf16.mxu0 %v4091_v15  ;;  %1121 = vmatprep.subr.bf16.mxu1 %v4093_v16  ;;  %v337_v14 = vld [vmem:[%s6074_s1 + $0x368] sm:$0xff]  ;;  %v4110_v15 = vcombine.low %v344_v1, %v352_v2  ;;  %v4112_v16 = vcombine.low %v345_v3, %v353_v4  ;;  %v3999_v1 = vcombine.high %v232_v58, %v240_v59  ;;  %v346_v2 = vld [vmem:[%s6074_s1 + $0x3b0] sm:$0xff]  ;;  %v347_v4 = vld [vmem:[%s6074_s1 + $0x3b8] sm:$0xff] }
  0x32   : > { %1110 = vmatprep.mubr.bf16.mxu0 %v4750_v8  ;;  %1151 = vmatprep.mubr.bf16.mxu1 %v4750_v8  ;;  %v354_v3 = vld [vmem:[%s6074_s1 + $0x3f0] sm:$0xff] }
  0x34   : > { %1081 = vmatpush1.bf16.msra.mxu0 %v4090_v21  ;;  %1122 = vmatpush1.bf16.msra.mxu1 %v4092_v22  ;;  %v4097_v21 = vcombine.high %v329_v13, %v337_v14  ;;  %v321_v22 = vld [vmem:[%s6074_s1 + $0x2e8] sm:$0xff] }
  0x35   : > { %1082 = vmatprep.subr.bf16.mxu0 %v4075_v23  ;;  %1123 = vmatprep.subr.bf16.mxu1 %v4077_v24  ;;  %v4094_v23 = vcombine.low %v328_v10, %v336_v11  ;;  %v4096_v24 = vcombine.low %v329_v13, %v337_v14  ;;  %v4115_v10 = vcombine.high %v346_v2, %v354_v3  ;;  %v330_v11 = vld [vmem:[%s6074_s1 + $0x330] sm:$0xff]  ;;  %v331_v14 = vld [vmem:[%s6074_s1 + $0x338] sm:$0xff] }
  0x36   : > { %v338_v13 = vld [vmem:[%s6074_s1 + $0x370] sm:$0xff] }
  0x38   : > { %1083 = vmatpush1.bf16.msra.mxu0 %v4074_v29  ;;  %1124 = vmatpush1.bf16.msra.mxu1 %v4076_v30  ;;  %v4081_v29 = vcombine.high %v313_v20, %v321_v22  ;;  %v305_v30 = vld [vmem:[%s6074_s1 + $0x268] sm:$0xff] }
  0x39   : > { %1084 = vmatprep.subr.bf16.mxu0 %v4059_v31  ;;  %1125 = vmatprep.subr.bf16.mxu1 %v4061_v32  ;;  %v4078_v31 = vcombine.low %v312_v18, %v320_v19  ;;  %v4080_v32 = vcombine.low %v313_v20, %v321_v22  ;;  %v4099_v19 = vcombine.high %v330_v11, %v338_v13  ;;  %v314_v20 = vld [vmem:[%s6074_s1 + $0x2b0] sm:$0xff]  ;;  %v315_v22 = vld [vmem:[%s6074_s1 + $0x2b8] sm:$0xff] }
  0x3c   : > { %1085 = vmatpush1.bf16.msra.mxu0 %v4058_v37  ;;  %1126 = vmatpush1.bf16.msra.mxu1 %v4060_v38  ;;  %v4065_v37 = vcombine.high %v297_v28, %v305_v30  ;;  %v289_v38 = vld [vmem:[%s6074_s1 + $0x1e8] sm:$0xff] }
  0x3d   : > { %1086 = vmatprep.subr.bf16.mxu0 %v4043_v39  ;;  %1127 = vmatprep.subr.bf16.mxu1 %v4045_v40  ;;  %v4062_v39 = vcombine.low %v296_v26, %v304_v27  ;;  %v4064_v40 = vcombine.low %v297_v28, %v305_v30  ;;  %v298_v28 = vld [vmem:[%s6074_s1 + $0x230] sm:$0xff]  ;;  %v299_v30 = vld [vmem:[%s6074_s1 + $0x238] sm:$0xff] }
  0x40   : > { %1087 = vmatpush1.bf16.msra.mxu0 %v4042_v45  ;;  %1128 = vmatpush1.bf16.msra.mxu1 %v4044_v46  ;;  %v4049_v45 = vcombine.high %v281_v36, %v289_v38  ;;  %v273_v46 = vld [vmem:[%s6074_s1 + $0x168] sm:$0xff] }
  0x41   : > { %1088 = vmatprep.subr.bf16.mxu0 %v4027_v47  ;;  %1129 = vmatprep.subr.bf16.mxu1 %v4029_v48  ;;  %v4046_v47 = vcombine.low %v280_v34, %v288_v35  ;;  %v4048_v48 = vcombine.low %v281_v36, %v289_v38  ;;  %v282_v36 = vld [vmem:[%s6074_s1 + $0x1b0] sm:$0xff]  ;;  %v283_v38 = vld [vmem:[%s6074_s1 + $0x1b8] sm:$0xff] }
  0x44   : > { %1089 = vmatpush1.bf16.msra.mxu0 %v4026_v53  ;;  %1130 = vmatpush1.bf16.msra.mxu1 %v4028_v54  ;;  %v4033_v53 = vcombine.high %v265_v44, %v273_v46  ;;  %v257_v54 = vld [vmem:[%s6074_s1 + $0xe8] sm:$0xff] }
  0x45   : > { %1090 = vmatprep.subr.bf16.mxu0 %v4011_v55  ;;  %1131 = vmatprep.subr.bf16.mxu1 %v4013_v56  ;;  %v4030_v55 = vcombine.low %v264_v42, %v272_v43  ;;  %v4032_v56 = vcombine.low %v265_v44, %v273_v46  ;;  %v266_v44 = vld [vmem:[%s6074_s1 + $0x130] sm:$0xff]  ;;  %v267_v46 = vld [vmem:[%s6074_s1 + $0x138] sm:$0xff] }
  0x48   : > { %1091 = vmatpush1.bf16.msra.mxu0 %v4010_v61  ;;  %1132 = vmatpush1.bf16.msra.mxu1 %v4012_v62  ;;  %v4017_v61 = vcombine.high %v249_v52, %v257_v54  ;;  %v241_v62 = vld [vmem:[%s6074_s1 + $0x68] sm:$0xff] }
  0x49   : > { %1092 = vmatprep.subr.bf16.mxu0 %v3995_v63  ;;  %1133 = vmatprep.subr.bf16.mxu1 %v3997_v0  ;;  %v4014_v63 = vcombine.low %v248_v50, %v256_v51  ;;  %v4016_v0 = vcombine.low %v249_v52, %v257_v54  ;;  %v250_v52 = vld [vmem:[%s6074_s1 + $0xb0] sm:$0xff]  ;;  %v251_v54 = vld [vmem:[%s6074_s1 + $0xb8] sm:$0xff] }
  0x4c   : > { %1093 = vmatpush1.bf16.msra.mxu0 %v3994_v5  ;;  %1134 = vmatpush1.bf16.msra.mxu1 %v3996_v6  ;;  %v4001_v5 = vcombine.high %v233_v60, %v241_v62  ;;  %v355_v6 = vld [vmem:[%s6074_s1 + $0x3f8] sm:$0xff] }
  0x4d   : > { %1160 = vmatprep.subr.bf16.mxu0 %v4111_v7  ;;  %1201 = vmatprep.subr.bf16.mxu1 %v4113_v9  ;;  %v3998_v7 = vcombine.low %v232_v58, %v240_v59  ;;  %v4000_v9 = vcombine.low %v233_v60, %v241_v62  ;;  %v4116_v18 = vcombine.low %v347_v4, %v355_v6  ;;  %v234_v60 = vld [vmem:[%s6074_s1 + $0x30] sm:$0xff]  ;;  %v235_v62 = vld [vmem:[%s6074_s1 + $0x38] sm:$0xff] }
  0x4f   : > { %1111 = vmatmul.mubr.bf16.vlgmr.msra.gmra.mxu0 %v4926_v12  ;;  %1152 = vmatmul.mubr.bf16.vlgmr.msra.gmra.mxu1 %v4926_v12 }
  0x50   : > { %1161 = vmatpush1.bf16.msra.mxu0 %v4110_v15  ;;  %1202 = vmatpush1.bf16.msra.mxu1 %v4112_v16  ;;  %v4117_v15 = vcombine.high %v347_v4, %v355_v6  ;;  %v339_v16 = vld [vmem:[%s6074_s1 + $0x378] sm:$0xff]  ;;  %v1436_v4 = vld [vmem:[%s6075_s2 + $0x380] sm:$0xff]  ;;  %v1437_v6 = vld [vmem:[%s6075_s2 + $0x388] sm:$0xff] }
  0x51   : > { %1162 = vmatprep.subr.bf16.mxu0 %v4095_v17  ;;  %1203 = vmatprep.subr.bf16.mxu1 %v4097_v21  ;;  %v4114_v17 = vcombine.low %v346_v2, %v354_v3  ;;  %v322_v21 = vld [vmem:[%s6074_s1 + $0x2f0] sm:$0xff]  ;;  %v4100_v26 = vcombine.low %v331_v14, %v339_v16 }
  0x52   : > { %1192 = vmatprep.mubr.bf16.mxu0 %v4750_v8  ;;  %1233 = vmatprep.mubr.bf16.mxu1 %v4750_v8  ;;  %v4083_v27 = vcombine.high %v314_v20, %v322_v21 }
  0x54   : > { %1163 = vmatpush1.bf16.msra.mxu0 %v4094_v23  ;;  %1204 = vmatpush1.bf16.msra.mxu1 %v4096_v24  ;;  %v4101_v23 = vcombine.high %v331_v14, %v339_v16  ;;  %v323_v24 = vld [vmem:[%s6074_s1 + $0x2f8] sm:$0xff]  ;;  %v1420_v14 = vld [vmem:[%s6075_s2 + $0x300] sm:$0xff]  ;;  %v1421_v16 = vld [vmem:[%s6075_s2 + $0x308] sm:$0xff] }
  0x55   : > { %1164 = vmatprep.subr.bf16.mxu0 %v4079_v25  ;;  %1205 = vmatprep.subr.bf16.mxu1 %v4081_v29  ;;  %v4098_v25 = vcombine.low %v330_v11, %v338_v13  ;;  %v306_v29 = vld [vmem:[%s6074_s1 + $0x270] sm:$0xff]  ;;  %v4084_v34 = vcombine.low %v315_v22, %v323_v24 }
  0x56   : > { %v4067_v35 = vcombine.high %v298_v28, %v306_v29 }
  0x58   : > { %1165 = vmatpush1.bf16.msra.mxu0 %v4078_v31  ;;  %1206 = vmatpush1.bf16.msra.mxu1 %v4080_v32  ;;  %v4085_v31 = vcombine.high %v315_v22, %v323_v24  ;;  %v307_v32 = vld [vmem:[%s6074_s1 + $0x278] sm:$0xff]  ;;  %v1405_v24 = vld [vmem:[%s6075_s2 + $0x288] sm:$0xff] }
  0x59   : > { %1166 = vmatprep.subr.bf16.mxu0 %v4063_v33  ;;  %1207 = vmatprep.subr.bf16.mxu1 %v4065_v37  ;;  %v4082_v33 = vcombine.low %v314_v20, %v322_v21  ;;  %v290_v37 = vld [vmem:[%s6074_s1 + $0x1f0] sm:$0xff]  ;;  %v4068_v42 = vcombine.low %v299_v30, %v307_v32  ;;  %v1404_v20 = vld [vmem:[%s6075_s2 + $0x280] sm:$0xff] }
  0x5a   : > { %v4051_v43 = vcombine.high %v282_v36, %v290_v37  ;;  %v1412_v21 = vld [vmem:[%s6075_s2 + $0x2c0] sm:$0xff] }
  0x5c   : > { %1167 = vmatpush1.bf16.msra.mxu0 %v4062_v39  ;;  %1208 = vmatpush1.bf16.msra.mxu1 %v4064_v40  ;;  %v4069_v39 = vcombine.high %v299_v30, %v307_v32  ;;  %v291_v40 = vld [vmem:[%s6074_s1 + $0x1f8] sm:$0xff]  ;;  %v1389_v32 = vld [vmem:[%s6075_s2 + $0x208] sm:$0xff] }
  0x5d   : > { %1168 = vmatprep.subr.bf16.mxu0 %v4047_v41  ;;  %1209 = vmatprep.subr.bf16.mxu1 %v4049_v45  ;;  %v4066_v41 = vcombine.low %v298_v28, %v306_v29  ;;  %v274_v45 = vld [vmem:[%s6074_s1 + $0x170] sm:$0xff]  ;;  %v4052_v50 = vcombine.low %v283_v38, %v291_v40  ;;  %v1388_v28 = vld [vmem:[%s6075_s2 + $0x200] sm:$0xff] }
  0x5e   : > { %v4035_v51 = vcombine.high %v266_v44, %v274_v45  ;;  %v1396_v29 = vld [vmem:[%s6075_s2 + $0x240] sm:$0xff] }
  0x60   : > { %1169 = vmatpush1.bf16.msra.mxu0 %v4046_v47  ;;  %1210 = vmatpush1.bf16.msra.mxu1 %v4048_v48  ;;  %v4053_v47 = vcombine.high %v283_v38, %v291_v40  ;;  %v275_v48 = vld [vmem:[%s6074_s1 + $0x178] sm:$0xff]  ;;  %v4183_v38 = vcombine.high %v1388_v28, %v1396_v29  ;;  %v1381_v40 = vld [vmem:[%s6075_s2 + $0x1c8] sm:$0xff] }
  0x61   : > { %1170 = vmatprep.subr.bf16.mxu0 %v4031_v49  ;;  %1211 = vmatprep.subr.bf16.mxu1 %v4033_v53  ;;  %v4050_v49 = vcombine.low %v282_v36, %v290_v37  ;;  %v258_v53 = vld [vmem:[%s6074_s1 + $0xf0] sm:$0xff]  ;;  %v4036_v58 = vcombine.low %v267_v46, %v275_v48  ;;  %v1380_v36 = vld [vmem:[%s6075_s2 + $0x1c0] sm:$0xff] }
  0x62   : > { %v4019_v59 = vcombine.high %v250_v52, %v258_v53 }
  0x64   : > { %1171 = vmatpush1.bf16.msra.mxu0 %v4030_v55  ;;  %1212 = vmatpush1.bf16.msra.mxu1 %v4032_v56  ;;  %v4037_v55 = vcombine.high %v267_v46, %v275_v48  ;;  %v259_v56 = vld [vmem:[%s6074_s1 + $0xf8] sm:$0xff]  ;;  %v1365_v48 = vld [vmem:[%s6075_s2 + $0x148] sm:$0xff] }
  0x65   : > { %1172 = vmatprep.subr.bf16.mxu0 %v4015_v57  ;;  %1213 = vmatprep.subr.bf16.mxu1 %v4017_v61  ;;  %v4034_v57 = vcombine.low %v266_v44, %v274_v45  ;;  %v242_v61 = vld [vmem:[%s6074_s1 + $0x70] sm:$0xff]  ;;  %v4020_v2 = vcombine.low %v251_v54, %v259_v56  ;;  %v1364_v44 = vld [vmem:[%s6075_s2 + $0x140] sm:$0xff] }
  0x66   : > { %v4003_v3 = vcombine.high %v234_v60, %v242_v61 }
  0x68   : > { %1173 = vmatpush1.bf16.msra.mxu0 %v4014_v63  ;;  %1214 = vmatpush1.bf16.msra.mxu1 %v4016_v0  ;;  %v4021_v63 = vcombine.high %v251_v54, %v259_v56  ;;  %v243_v0 = vld [vmem:[%s6074_s1 + $0x78] sm:$0xff]  ;;  %v1349_v56 = vld [vmem:[%s6075_s2 + $0xc8] sm:$0xff] }
  0x69   : > { %1174 = vmatprep.subr.bf16.mxu0 %v3999_v1  ;;  %1215 = vmatprep.subr.bf16.mxu1 %v4001_v5  ;;  %v4018_v1 = vcombine.low %v250_v52, %v258_v53  ;;  %v1444_v5 = vld [vmem:[%s6075_s2 + $0x3c0] sm:$0xff]  ;;  %v4004_v11 = vcombine.low %v235_v62, %v243_v0 }
  0x6a   : > { %v4231_v13 = vcombine.high %v1436_v4, %v1444_v5  ;;  %v1348_v52 = vld [vmem:[%s6075_s2 + $0xc0] sm:$0xff] }
  0x6c   : > { %1175 = vmatpush1.bf16.msra.mxu0 %v3998_v7  ;;  %1216 = vmatpush1.bf16.msra.mxu1 %v4000_v9  ;;  %v4005_v7 = vcombine.high %v235_v62, %v243_v0  ;;  %v1445_v9 = vld [vmem:[%s6075_s2 + $0x3c8] sm:$0xff] }
  0x6d   : > { %1242 = vmatprep.subr.bf16.mxu0 %v4115_v10  ;;  %1283 = vmatprep.subr.bf16.mxu1 %v4117_v15  ;;  %v4002_v10 = vcombine.low %v234_v60, %v242_v61  ;;  %v1428_v15 = vld [vmem:[%s6075_s2 + $0x340] sm:$0xff]  ;;  %v4232_v22 = vcombine.low %v1437_v6, %v1445_v9  ;;  %v1333_v0 = vld [vmem:[%s6075_s2 + $0x48] sm:$0xff] }
  0x6e   : > { %v1332_v60 = vld [vmem:[%s6075_s2 + $0x40] sm:$0xff] }
  0x6f   : > { %1193 = vmatmul.mubr.bf16.vlgmr.msra.gmra.mxu0 %v4926_v12  ;;  %1234 = vmatmul.mubr.bf16.vlgmr.msra.gmra.mxu1 %v4926_v12 }
  0x70   : > { %1243 = vmatpush1.bf16.msra.mxu0 %v4114_v17  ;;  %1284 = vmatpush1.bf16.msra.mxu1 %v4116_v18  ;;  %v4233_v17 = vcombine.high %v1437_v6, %v1445_v9  ;;  %v1429_v18 = vld [vmem:[%s6075_s2 + $0x348] sm:$0xff]  ;;  %v1447_v9 = vld [vmem:[%s6075_s2 + $0x3d8] sm:$0xff] }
  0x71   : > { %1244 = vmatprep.subr.bf16.mxu0 %v4099_v19  ;;  %1285 = vmatprep.subr.bf16.mxu1 %v4101_v23  ;;  %v4230_v19 = vcombine.low %v1436_v4, %v1444_v5  ;;  %v4215_v23 = vcombine.high %v1420_v14, %v1428_v15  ;;  %v4216_v30 = vcombine.low %v1421_v16, %v1429_v18  ;;  %v1446_v4 = vld [vmem:[%s6075_s2 + $0x3d0] sm:$0xff] }
  0x72   : > { %1274 = vmatprep.mubr.bf16.mxu0 %v4750_v8  ;;  %1315 = vmatprep.mubr.bf16.mxu1 %v4750_v8 }
  0x74   : > { %1245 = vmatpush1.bf16.msra.mxu0 %v4098_v25  ;;  %1286 = vmatpush1.bf16.msra.mxu1 %v4100_v26  ;;  %v1413_v25 = vld [vmem:[%s6075_s2 + $0x2c8] sm:$0xff]  ;;  %v4217_v26 = vcombine.high %v1421_v16, %v1429_v18  ;;  %v1431_v18 = vld [vmem:[%s6075_s2 + $0x358] sm:$0xff] }
  0x75   : > { %1246 = vmatprep.subr.bf16.mxu0 %v4083_v27  ;;  %1287 = vmatprep.subr.bf16.mxu1 %v4085_v31  ;;  %v4214_v27 = vcombine.low %v1420_v14, %v1428_v15  ;;  %v4199_v31 = vcombine.high %v1404_v20, %v1412_v21  ;;  %v4200_v37 = vcombine.low %v1405_v24, %v1413_v25  ;;  %v1430_v14 = vld [vmem:[%s6075_s2 + $0x350] sm:$0xff] }
  0x78   : > { %1247 = vmatpush1.bf16.msra.mxu0 %v4082_v33  ;;  %1288 = vmatpush1.bf16.msra.mxu1 %v4084_v34  ;;  %v4201_v33 = vcombine.high %v1405_v24, %v1413_v25  ;;  %v4198_v34 = vcombine.low %v1404_v20, %v1412_v21 }
  0x79   : > { %1248 = vmatprep.subr.bf16.mxu0 %v4067_v35  ;;  %1289 = vmatprep.subr.bf16.mxu1 %v4069_v39  ;;  %v1372_v35 = vld [vmem:[%s6075_s2 + $0x180] sm:$0xff]  ;;  %v1373_v39 = vld [vmem:[%s6075_s2 + $0x188] sm:$0xff] }
  0x7a   : > { %v4167_v46 = vcombine.high %v1372_v35, %v1380_v36  ;;  %v4168_v53 = vcombine.low %v1373_v39, %v1381_v40 }
  0x7c   : > { %1249 = vmatpush1.bf16.msra.mxu0 %v4066_v41  ;;  %1290 = vmatpush1.bf16.msra.mxu1 %v4068_v42  ;;  %v4182_v42 = vcombine.low %v1388_v28, %v1396_v29 }
  0x7d   : > { %1250 = vmatprep.subr.bf16.mxu0 %v4051_v43  ;;  %1291 = vmatprep.subr.bf16.mxu1 %v4053_v47  ;;  %v1356_v43 = vld [vmem:[%s6075_s2 + $0x100] sm:$0xff]  ;;  %v1357_v47 = vld [vmem:[%s6075_s2 + $0x108] sm:$0xff] }
  0x7e   : > { %v4151_v54 = vcombine.high %v1356_v43, %v1364_v44  ;;  %v4152_v61 = vcombine.low %v1357_v47, %v1365_v48 }
  0x80   : > { %1251 = vmatpush1.bf16.msra.mxu0 %v4050_v49  ;;  %1292 = vmatpush1.bf16.msra.mxu1 %v4052_v50  ;;  %v4169_v49 = vcombine.high %v1373_v39, %v1381_v40  ;;  %v4166_v50 = vcombine.low %v1372_v35, %v1380_v36 }
  0x81   : > { %1252 = vmatprep.subr.bf16.mxu0 %v4035_v51  ;;  %1293 = vmatprep.subr.bf16.mxu1 %v4037_v55  ;;  %v1340_v51 = vld [vmem:[%s6075_s2 + $0x80] sm:$0xff]  ;;  %v1341_v55 = vld [vmem:[%s6075_s2 + $0x88] sm:$0xff] }
  0x82   : > { %v4135_v62 = vcombine.high %v1340_v51, %v1348_v52  ;;  %v4136_v5 = vcombine.low %v1341_v55, %v1349_v56 }
  0x84   : > { %1253 = vmatpush1.bf16.msra.mxu0 %v4034_v57  ;;  %1294 = vmatpush1.bf16.msra.mxu1 %v4036_v58  ;;  %v4153_v57 = vcombine.high %v1357_v47, %v1365_v48  ;;  %v4150_v58 = vcombine.low %v1356_v43, %v1364_v44 }
  0x85   : > { %1254 = vmatprep.subr.bf16.mxu0 %v4019_v59  ;;  %1295 = vmatprep.subr.bf16.mxu1 %v4021_v63  ;;  %v1324_v59 = vld [vmem:[%s6075_s2] sm:$0xff]  ;;  %v1325_v63 = vld [vmem:[%s6075_s2 + $0x8] sm:$0xff] }
  0x86   : > { %v4119_v6 = vcombine.high %v1324_v59, %v1332_v60  ;;  %v4120_v15 = vcombine.low %v1325_v63, %v1333_v0 }
  0x88   : > { %1255 = vmatpush1.bf16.msra.mxu0 %v4018_v1  ;;  %1296 = vmatpush1.bf16.msra.mxu1 %v4020_v2  ;;  %v4137_v1 = vcombine.high %v1341_v55, %v1349_v56  ;;  %v4134_v2 = vcombine.low %v1340_v51, %v1348_v52  ;;  %v1342_v56 = vld [vmem:[%s6075_s2 + $0x90] sm:$0xff] }
  0x89   : > { %1256 = vmatprep.subr.bf16.mxu0 %v4003_v3  ;;  %1297 = vmatprep.subr.bf16.mxu1 %v4005_v7  ;;  %v1438_v3 = vld [vmem:[%s6075_s2 + $0x390] sm:$0xff]  ;;  %v1439_v7 = vld [vmem:[%s6075_s2 + $0x398] sm:$0xff] }
  0x8a   : > { %v4235_v16 = vcombine.high %v1438_v3, %v1446_v4  ;;  %v4237_v20 = vcombine.high %v1439_v7, %v1447_v9  ;;  %v4234_v21 = vcombine.low %v1438_v3, %v1446_v4  ;;  %v4236_v24 = vcombine.low %v1439_v7, %v1447_v9  ;;  %v1335_v3 = vld [vmem:[%s6075_s2 + $0x58] sm:$0xff]  ;;  %v1440_v9 = vld [vmem:[%s6075_s2 + $0x3a0] sm:$0xff] }
  0x8c   : > { %1257 = vmatpush1.bf16.msra.mxu0 %v4002_v10  ;;  %1298 = vmatpush1.bf16.msra.mxu1 %v4004_v11  ;;  %v4121_v10 = vcombine.high %v1325_v63, %v1333_v0  ;;  %v4118_v11 = vcombine.low %v1324_v59, %v1332_v60  ;;  %v1351_v59 = vld [vmem:[%s6075_s2 + $0xd8] sm:$0xff]  ;;  %v1326_v0 = vld [vmem:[%s6075_s2 + $0x10] sm:$0xff] }
  0x8d   : > { %2092 = vmatprep.subr.bf16.mxu0 %v4231_v13  ;;  %2133 = vmatprep.subr.bf16.mxu1 %v4233_v17  ;;  %v1422_v13 = vld [vmem:[%s6075_s2 + $0x310] sm:$0xff]  ;;  %v1423_v17 = vld [vmem:[%s6075_s2 + $0x318] sm:$0xff] }
  0x8e   : > { %v4219_v25 = vcombine.high %v1422_v13, %v1430_v14  ;;  %v4221_v28 = vcombine.high %v1423_v17, %v1431_v18  ;;  %v4218_v29 = vcombine.low %v1422_v13, %v1430_v14  ;;  %v1449_v13 = vld [vmem:[%s6075_s2 + $0x3e8] sm:$0xff] }
  0x8f   : > { %1275 = vmatmul.mubr.bf16.vlgmr.msra.gmra.mxu0 %v4926_v12  ;;  %1316 = vmatmul.mubr.bf16.vlgmr.msra.gmra.mxu1 %v4926_v12  ;;  %v1397_v12 = vld [vmem:[%s6075_s2 + $0x248] sm:$0xff] }
  0x90   : > { %2093 = vmatpush1.bf16.msra.mxu0 %v4230_v19  ;;  %2134 = vmatpush1.bf16.msra.mxu1 %v4232_v22  ;;  %v4185_v41 = vcombine.high %v1389_v32, %v1397_v12  ;;  %v4184_v45 = vcombine.low %v1389_v32, %v1397_v12  ;;  %v5329_v19 = vld [vmem:[%s4911_s26 + $0x4] sm:$0xf]  ;;  %v1406_v22 = vld [vmem:[%s6075_s2 + $0x290] sm:$0xff]  ;;  %v4220_v32 = vcombine.low %v1423_v17, %v1431_v18 }
  0x91   : > { %2094 = vmatprep.subr.bf16.mxu0 %v4215_v23  ;;  %2135 = vmatprep.subr.bf16.mxu1 %v4217_v26  ;;  %v1414_v23 = vld [vmem:[%s6075_s2 + $0x2d0] sm:$0xff]  ;;  %v1407_v26 = vld [vmem:[%s6075_s2 + $0x298] sm:$0xff]  ;;  %v1424_v18 = vld [vmem:[%s6075_s2 + $0x320] sm:$0xff] }
  0x92   : > { %2124 = vmatprep.mubr.bf16.mxu0 %v4750_v8  ;;  %2165 = vmatprep.mubr.bf16.mxu1 %v4750_v8  ;;  %v4203_v12 = vcombine.high %v1406_v22, %v1414_v23  ;;  %v4202_v36 = vcombine.low %v1406_v22, %v1414_v23  ;;  %v1433_v22 = vld [vmem:[%s6075_s2 + $0x368] sm:$0xff] }
  0x94   : > { %2095 = vmatpush1.bf16.msra.mxu0 %v4214_v27  ;;  %2136 = vmatpush1.bf16.msra.mxu1 %v4216_v30  ;;  %v1415_v27 = vld [vmem:[%s6075_s2 + $0x2d8] sm:$0xff]  ;;  %v1390_v30 = vld [vmem:[%s6075_s2 + $0x210] sm:$0xff] }
  0x95   : > { %2096 = vmatprep.subr.bf16.mxu0 %v4199_v31  ;;  %2137 = vmatprep.subr.bf16.mxu1 %v4201_v33  ;;  %v1398_v31 = vld [vmem:[%s6075_s2 + $0x250] sm:$0xff]  ;;  %v1391_v33 = vld [vmem:[%s6075_s2 + $0x218] sm:$0xff]  ;;  %v4205_v35 = vcombine.high %v1407_v26, %v1415_v27  ;;  %v4204_v39 = vcombine.low %v1407_v26, %v1415_v27  ;;  %v1408_v27 = vld [vmem:[%s6075_s2 + $0x2a0] sm:$0xff] }
  0x96   : > { %v4187_v40 = vcombine.high %v1390_v30, %v1398_v31  ;;  %v4186_v44 = vcombine.low %v1390_v30, %v1398_v31  ;;  %v1417_v30 = vld [vmem:[%s6075_s2 + $0x2e8] sm:$0xff] }
  0x98   : > { %2097 = vmatpush1.bf16.msra.mxu0 %v4198_v34  ;;  %2138 = vmatpush1.bf16.msra.mxu1 %v4200_v37  ;;  %v1399_v34 = vld [vmem:[%s6075_s2 + $0x258] sm:$0xff]  ;;  %v1374_v37 = vld [vmem:[%s6075_s2 + $0x190] sm:$0xff] }
  0x99   : > { %2098 = vmatprep.subr.bf16.mxu0 %v4183_v38  ;;  %2139 = vmatprep.subr.bf16.mxu1 %v4185_v41  ;;  %v1382_v38 = vld [vmem:[%s6075_s2 + $0x1d0] sm:$0xff]  ;;  %v1375_v41 = vld [vmem:[%s6075_s2 + $0x198] sm:$0xff]  ;;  %v4189_v43 = vcombine.high %v1391_v33, %v1399_v34  ;;  %v4188_v47 = vcombine.low %v1391_v33, %v1399_v34  ;;  %v1392_v34 = vld [vmem:[%s6075_s2 + $0x220] sm:$0xff] }
  0x9a   : > { %v4171_v48 = vcombine.high %v1374_v37, %v1382_v38  ;;  %v4170_v52 = vcombine.low %v1374_v37, %v1382_v38  ;;  %v1401_v37 = vld [vmem:[%s6075_s2 + $0x268] sm:$0xff] }
  0x9c   : > { %2099 = vmatpush1.bf16.msra.mxu0 %v4182_v42  ;;  %2140 = vmatpush1.bf16.msra.mxu1 %v4184_v45  ;;  %v1383_v42 = vld [vmem:[%s6075_s2 + $0x1d8] sm:$0xff]  ;;  %v1358_v45 = vld [vmem:[%s6075_s2 + $0x110] sm:$0xff] }
  0x9d   : > { %2100 = vmatprep.subr.bf16.mxu0 %v4167_v46  ;;  %2141 = vmatprep.subr.bf16.mxu1 %v4169_v49  ;;  %v1366_v46 = vld [vmem:[%s6075_s2 + $0x150] sm:$0xff]  ;;  %v1359_v49 = vld [vmem:[%s6075_s2 + $0x118] sm:$0xff]  ;;  %v4173_v51 = vcombine.high %v1375_v41, %v1383_v42 }
  0x9e   : > { %v4154_v60 = vcombine.low %v1358_v45, %v1366_v46 }
  0xa0   : > { %2101 = vmatpush1.bf16.msra.mxu0 %v4166_v50  ;;  %2142 = vmatpush1.bf16.msra.mxu1 %v4168_v53  ;;  %v1367_v50 = vld [vmem:[%s6075_s2 + $0x158] sm:$0xff]  ;;  %v4172_v53 = vcombine.low %v1375_v41, %v1383_v42  ;;  %v1376_v42 = vld [vmem:[%s6075_s2 + $0x1a0] sm:$0xff] }
  0xa1   : > { %2102 = vmatprep.subr.bf16.mxu0 %v4151_v54  ;;  %2143 = vmatprep.subr.bf16.mxu1 %v4153_v57  ;;  %v4155_v54 = vcombine.high %v1358_v45, %v1366_v46  ;;  %v4157_v55 = vcombine.high %v1359_v49, %v1367_v50  ;;  %v1350_v57 = vld [vmem:[%s6075_s2 + $0xd0] sm:$0xff]  ;;  %v1385_v45 = vld [vmem:[%s6075_s2 + $0x1e8] sm:$0xff] }
  0xa2   : > { %v4138_v4 = vcombine.low %v1342_v56, %v1350_v57 }
  0xa4   : > { %2103 = vmatpush1.bf16.msra.mxu0 %v4150_v58  ;;  %2144 = vmatpush1.bf16.msra.mxu1 %v4152_v61  ;;  %v1343_v58 = vld [vmem:[%s6075_s2 + $0x98] sm:$0xff]  ;;  %v4156_v61 = vcombine.low %v1359_v49, %v1367_v50  ;;  %v1360_v50 = vld [vmem:[%s6075_s2 + $0x120] sm:$0xff] }
  0xa5   : > { %2104 = vmatprep.subr.bf16.mxu0 %v4135_v62  ;;  %2145 = vmatprep.subr.bf16.mxu1 %v4137_v1  ;;  %v4139_v62 = vcombine.high %v1342_v56, %v1350_v57  ;;  %v4141_v63 = vcombine.high %v1343_v58, %v1351_v59  ;;  %v1334_v1 = vld [vmem:[%s6075_s2 + $0x50] sm:$0xff] }
  0xa6   : > { %v4122_v14 = vcombine.low %v1326_v0, %v1334_v1 }
  0xa8   : > { %2105 = vmatpush1.bf16.msra.mxu0 %v4134_v2  ;;  %2146 = vmatpush1.bf16.msra.mxu1 %v4136_v5  ;;  %v1327_v2 = vld [vmem:[%s6075_s2 + $0x18] sm:$0xff]  ;;  %v4140_v5 = vcombine.low %v1343_v58, %v1351_v59  ;;  %v1344_v58 = vld [vmem:[%s6075_s2 + $0xa0] sm:$0xff] }
  0xa9   : > { %2106 = vmatprep.subr.bf16.mxu0 %v4119_v6  ;;  %2147 = vmatprep.subr.bf16.mxu1 %v4121_v10  ;;  %v4123_v6 = vcombine.high %v1326_v0, %v1334_v1  ;;  %v4125_v7 = vcombine.high %v1327_v2, %v1335_v3  ;;  %v1448_v10 = vld [vmem:[%s6075_s2 + $0x3e0] sm:$0xff] }
  0xaa   : > { %v4238_v23 = vcombine.low %v1440_v9, %v1448_v10  ;;  %v1352_v59 = vld [vmem:[%s6075_s2 + $0xe0] sm:$0xff] }
  0xab   : > { %v4143_v0 = vcombine.high %v1344_v58, %v1352_v59 }
  0xac   : > { %2107 = vmatpush1.bf16.msra.mxu0 %v4118_v11  ;;  %2148 = vmatpush1.bf16.msra.mxu1 %v4120_v15  ;;  %v1441_v11 = vld [vmem:[%s6075_s2 + $0x3a8] sm:$0xff]  ;;  %v4124_v15 = vcombine.low %v1327_v2, %v1335_v3  ;;  %v1328_v2 = vld [vmem:[%s6075_s2 + $0x20] sm:$0xff] }
  0xad   : > { %2174 = vmatprep.subr.bf16.mxu0 %v4235_v16  ;;  %2215 = vmatprep.subr.bf16.mxu1 %v4237_v20  ;;  %v4239_v16 = vcombine.high %v1440_v9, %v1448_v10  ;;  %v4241_v17 = vcombine.high %v1441_v11, %v1449_v13  ;;  %v1432_v20 = vld [vmem:[%s6075_s2 + $0x360] sm:$0xff] }
  0xae   : > { %v4222_v31 = vcombine.low %v1424_v18, %v1432_v20  ;;  %v1336_v3 = vld [vmem:[%s6075_s2 + $0x60] sm:$0xff] }
  0xaf   : > { %2125 = vmatmul.mubr.bf16.vlgmr.msra.gmra.mxu0 %v5329_v19  ;;  %2166 = vmatmul.mubr.bf16.vlgmr.msra.gmra.mxu1 %v5329_v19  ;;  %v4127_v9 = vcombine.high %v1328_v2, %v1336_v3 }
  0xb0   : > { %2175 = vmatpush1.bf16.msra.mxu0 %v4234_v21  ;;  %2216 = vmatpush1.bf16.msra.mxu1 %v4236_v24  ;;  %v1425_v21 = vld [vmem:[%s6075_s2 + $0x328] sm:$0xff]  ;;  %v4240_v24 = vcombine.low %v1441_v11, %v1449_v13  ;;  %v1442_v11 = vld [vmem:[%s6075_s2 + $0x3b0] sm:$0xff] }
  0xb1   : > { %2176 = vmatprep.subr.bf16.mxu0 %v4219_v25  ;;  %2217 = vmatprep.subr.bf16.mxu1 %v4221_v28  ;;  %v4223_v25 = vcombine.high %v1424_v18, %v1432_v20  ;;  %v4225_v26 = vcombine.high %v1425_v21, %v1433_v22  ;;  %v1416_v28 = vld [vmem:[%s6075_s2 + $0x2e0] sm:$0xff]  ;;  %v1450_v13 = vld [vmem:[%s6075_s2 + $0x3f0] sm:$0xff] }
  0xb2   : > { %2206 = vmatprep.mubr.bf16.mxu0 %v4750_v8  ;;  %2247 = vmatprep.mubr.bf16.mxu1 %v4750_v8  ;;  %v4206_v38 = vcombine.low %v1408_v27, %v1416_v28  ;;  %v4243_v18 = vcombine.high %v1442_v11, %v1450_v13 }
  0xb4   : > { %2177 = vmatpush1.bf16.msra.mxu0 %v4218_v29  ;;  %2218 = vmatpush1.bf16.msra.mxu1 %v4220_v32  ;;  %v1409_v29 = vld [vmem:[%s6075_s2 + $0x2a8] sm:$0xff]  ;;  %v4224_v32 = vcombine.low %v1425_v21, %v1433_v22  ;;  %v1426_v21 = vld [vmem:[%s6075_s2 + $0x330] sm:$0xff] }
  0xb5   : > { %2178 = vmatprep.subr.bf16.mxu0 %v4203_v12  ;;  %2219 = vmatprep.subr.bf16.mxu1 %v4205_v35  ;;  %v4207_v12 = vcombine.high %v1408_v27, %v1416_v28  ;;  %v4209_v33 = vcombine.high %v1409_v29, %v1417_v30  ;;  %v1400_v35 = vld [vmem:[%s6075_s2 + $0x260] sm:$0xff]  ;;  %v1434_v22 = vld [vmem:[%s6075_s2 + $0x370] sm:$0xff] }
  0xb6   : > { %v4190_v46 = vcombine.low %v1392_v34, %v1400_v35  ;;  %v4227_v27 = vcombine.high %v1426_v21, %v1434_v22 }
  0xb8   : > { %2179 = vmatpush1.bf16.msra.mxu0 %v4202_v36  ;;  %2220 = vmatpush1.bf16.msra.mxu1 %v4204_v39  ;;  %v1393_v36 = vld [vmem:[%s6075_s2 + $0x228] sm:$0xff]  ;;  %v4208_v39 = vcombine.low %v1409_v29, %v1417_v30  ;;  %v1410_v29 = vld [vmem:[%s6075_s2 + $0x2b0] sm:$0xff] }
  0xb9   : > { %2180 = vmatprep.subr.bf16.mxu0 %v4187_v40  ;;  %2221 = vmatprep.subr.bf16.mxu1 %v4189_v43  ;;  %v4191_v40 = vcombine.high %v1392_v34, %v1400_v35  ;;  %v4193_v41 = vcombine.high %v1393_v36, %v1401_v37  ;;  %v1384_v43 = vld [vmem:[%s6075_s2 + $0x1e0] sm:$0xff]  ;;  %v1418_v30 = vld [vmem:[%s6075_s2 + $0x2f0] sm:$0xff]  ;;  %v4226_v34 = vcombine.low %v1426_v21, %v1434_v22 }
  0xbc   : > { %2181 = vmatpush1.bf16.msra.mxu0 %v4186_v44  ;;  %2222 = vmatpush1.bf16.msra.mxu1 %v4188_v47  ;;  %v1377_v44 = vld [vmem:[%s6075_s2 + $0x1a8] sm:$0xff]  ;;  %v4192_v47 = vcombine.low %v1393_v36, %v1401_v37  ;;  %v4211_v37 = vcombine.high %v1410_v29, %v1418_v30 }
  0xbd   : > { %2182 = vmatprep.subr.bf16.mxu0 %v4171_v48  ;;  %2223 = vmatprep.subr.bf16.mxu1 %v4173_v51  ;;  %v4175_v48 = vcombine.high %v1376_v42, %v1384_v43  ;;  %v4177_v49 = vcombine.high %v1377_v44, %v1385_v45  ;;  %v1368_v51 = vld [vmem:[%s6075_s2 + $0x160] sm:$0xff] }
  0xbe   : > { %v4159_v56 = vcombine.high %v1360_v50, %v1368_v51 }
  0xc0   : > { %2183 = vmatpush1.bf16.msra.mxu0 %v4170_v52  ;;  %2224 = vmatpush1.bf16.msra.mxu1 %v4172_v53  ;;  %v1361_v52 = vld [vmem:[%s6075_s2 + $0x128] sm:$0xff] }
  0xc1   : > { %2184 = vmatprep.subr.bf16.mxu0 %v4155_v54  ;;  %2225 = vmatprep.subr.bf16.mxu1 %v4157_v55  ;;  %v1369_v53 = vld [vmem:[%s6075_s2 + $0x168] sm:$0xff]  ;;  %v4174_v54 = vcombine.low %v1376_v42, %v1384_v43  ;;  %v4176_v55 = vcombine.low %v1377_v44, %v1385_v45  ;;  %v1395_v43 = vld [vmem:[%s6075_s2 + $0x238] sm:$0xff] }
  0xc2   : > { %v4161_v57 = vcombine.high %v1361_v52, %v1369_v53  ;;  %v1403_v44 = vld [vmem:[%s6075_s2 + $0x278] sm:$0xff] }
  0xc4   : > { %2185 = vmatpush1.bf16.msra.mxu0 %v4154_v60  ;;  %2226 = vmatpush1.bf16.msra.mxu1 %v4156_v61  ;;  %v1345_v60 = vld [vmem:[%s6075_s2 + $0xa8] sm:$0xff] }
  0xc5   : > { %2186 = vmatprep.subr.bf16.mxu0 %v4139_v62  ;;  %2227 = vmatprep.subr.bf16.mxu1 %v4141_v63  ;;  %v1353_v61 = vld [vmem:[%s6075_s2 + $0xe8] sm:$0xff]  ;;  %v4158_v62 = vcombine.low %v1360_v50, %v1368_v51  ;;  %v4160_v63 = vcombine.low %v1361_v52, %v1369_v53  ;;  %v4197_v51 = vcombine.high %v1395_v43, %v1403_v44  ;;  %v1378_v52 = vld [vmem:[%s6075_s2 + $0x1b0] sm:$0xff] }
  0xc6   : > { %v4145_v1 = vcombine.high %v1345_v60, %v1353_v61  ;;  %v1386_v53 = vld [vmem:[%s6075_s2 + $0x1f0] sm:$0xff] }
  0xc8   : > { %2187 = vmatpush1.bf16.msra.mxu0 %v4138_v4  ;;  %2228 = vmatpush1.bf16.msra.mxu1 %v4140_v5  ;;  %v1329_v4 = vld [vmem:[%s6075_s2 + $0x28] sm:$0xff] }
  0xc9   : > { %2188 = vmatprep.subr.bf16.mxu0 %v4123_v6  ;;  %2229 = vmatprep.subr.bf16.mxu1 %v4125_v7  ;;  %v1337_v5 = vld [vmem:[%s6075_s2 + $0x68] sm:$0xff]  ;;  %v4142_v6 = vcombine.low %v1344_v58, %v1352_v59  ;;  %v4144_v7 = vcombine.low %v1345_v60, %v1353_v61  ;;  %v1362_v59 = vld [vmem:[%s6075_s2 + $0x130] sm:$0xff]  ;;  %v1363_v61 = vld [vmem:[%s6075_s2 + $0x138] sm:$0xff] }
  0xca   : > { %v4129_v10 = vcombine.high %v1329_v4, %v1337_v5  ;;  %v1370_v60 = vld [vmem:[%s6075_s2 + $0x170] sm:$0xff] }
  0xcc   : > { %2189 = vmatpush1.bf16.msra.mxu0 %v4122_v14  ;;  %2230 = vmatpush1.bf16.msra.mxu1 %v4124_v15  ;;  %v1443_v14 = vld [vmem:[%s6075_s2 + $0x3b8] sm:$0xff] }
  0xcd   : > { %2256 = vmatprep.subr.bf16.mxu0 %v4239_v16  ;;  %2297 = vmatprep.subr.bf16.mxu1 %v4241_v17  ;;  %v1451_v15 = vld [vmem:[%s6075_s2 + $0x3f8] sm:$0xff]  ;;  %v4126_v16 = vcombine.low %v1328_v2, %v1336_v3  ;;  %v4128_v17 = vcombine.low %v1329_v4, %v1337_v5  ;;  %v1346_v3 = vld [vmem:[%s6075_s2 + $0xb0] sm:$0xff] }
  0xce   : > { %v4245_v20 = vcombine.high %v1443_v14, %v1451_v15  ;;  %v1354_v4 = vld [vmem:[%s6075_s2 + $0xf0] sm:$0xff]  ;;  %v1347_v5 = vld [vmem:[%s6075_s2 + $0xb8] sm:$0xff] }
  0xcf   : > { %2207 = vmatmul.mubr.bf16.vlgmr.msra.gmra.mxu0 %v5329_v19  ;;  %2248 = vmatmul.mubr.bf16.vlgmr.msra.gmra.mxu1 %v5329_v19 }
  0xd0   : > { %2257 = vmatpush1.bf16.msra.mxu0 %v4238_v23  ;;  %2298 = vmatpush1.bf16.msra.mxu1 %v4240_v24  ;;  %v1427_v23 = vld [vmem:[%s6075_s2 + $0x338] sm:$0xff] }
  0xd1   : > { %2258 = vmatprep.subr.bf16.mxu0 %v4223_v25  ;;  %2299 = vmatprep.subr.bf16.mxu1 %v4225_v26  ;;  %v1435_v24 = vld [vmem:[%s6075_s2 + $0x378] sm:$0xff]  ;;  %v4242_v25 = vcombine.low %v1442_v11, %v1450_v13  ;;  %v4244_v26 = vcombine.low %v1443_v14, %v1451_v15  ;;  %v1330_v13 = vld [vmem:[%s6075_s2 + $0x30] sm:$0xff] }
  0xd2   : > { %2288 = vmatprep.mubr.bf16.mxu0 %v4750_v8  ;;  %2329 = vmatprep.mubr.bf16.mxu1 %v4750_v8  ;;  %v4229_v28 = vcombine.high %v1427_v23, %v1435_v24  ;;  %v4228_v36 = vcombine.low %v1427_v23, %v1435_v24  ;;  %v1338_v14 = vld [vmem:[%s6075_s2 + $0x70] sm:$0xff]  ;;  %v1331_v15 = vld [vmem:[%s6075_s2 + $0x38] sm:$0xff] }
  0xd3   : > { %v4130_v22 = vcombine.low %v1330_v13, %v1338_v14  ;;  %v4602_v24 = vld [vmem:[%s6076_s3 + $0x78] sm:$0xff]  }
  0xd4   : > { %2259 = vmatpush1.bf16.msra.mxu0 %v4222_v31  ;;  %2300 = vmatpush1.bf16.msra.mxu1 %v4224_v32  ;;  %v1411_v32 = vld [vmem:[%s6075_s2 + $0x2b8] sm:$0xff] }
  0xd5   : > { %2260 = vmatprep.subr.bf16.mxu0 %v4207_v12  ;;  %2301 = vmatprep.subr.bf16.mxu1 %v4209_v33  ;;  %v1419_v12 = vld [vmem:[%s6075_s2 + $0x2f8] sm:$0xff] }
  0xd8   : > { %2261 = vmatpush1.bf16.msra.mxu0 %v4206_v38  ;;  %2302 = vmatpush1.bf16.msra.mxu1 %v4208_v39  ;;  %v4213_v39 = vcombine.high %v1411_v32, %v1419_v12 }
  0xd9   : > { %2262 = vmatprep.subr.bf16.mxu0 %v4191_v40  ;;  %2303 = vmatprep.subr.bf16.mxu1 %v4193_v41  ;;  %v1394_v40 = vld [vmem:[%s6075_s2 + $0x230] sm:$0xff] }
  0xda   : > { %v1402_v41 = vld [vmem:[%s6075_s2 + $0x270] sm:$0xff] }
  0xdc   : > { %2263 = vmatpush1.bf16.msra.mxu0 %v4190_v46  ;;  %2304 = vmatpush1.bf16.msra.mxu1 %v4192_v47  ;;  %v4210_v46 = vcombine.low %v1410_v29, %v1418_v30  ;;  %v4607_v29 = vld [vmem:[%s6076_s3 + $0xf0] sm:$0xff]  }
  0xdd   : > { %2264 = vmatprep.subr.bf16.mxu0 %v4175_v48  ;;  %2305 = vmatprep.subr.bf16.mxu1 %v4177_v49  ;;  %v4212_v48 = vcombine.low %v1411_v32, %v1419_v12  ;;  %v4195_v49 = vcombine.high %v1394_v40, %v1402_v41  ;;  %v4608_v12 = vld [vmem:[%s6076_s3 + $0x30] sm:$0xff]  }
  0xe0   : > { %2265 = vmatpush1.bf16.msra.mxu0 %v4174_v54  ;;  %2306 = vmatpush1.bf16.msra.mxu1 %v4176_v55  ;;  %v1387_v54 = vld [vmem:[%s6075_s2 + $0x1f8] sm:$0xff]  ;;  %v4194_v55 = vcombine.low %v1394_v40, %v1402_v41 }
  0xe1   : > { %2266 = vmatprep.subr.bf16.mxu0 %v4159_v56  ;;  %2307 = vmatprep.subr.bf16.mxu1 %v4161_v57  ;;  %v4196_v56 = vcombine.low %v1395_v43, %v1403_v44  ;;  %v4179_v57 = vcombine.high %v1378_v52, %v1386_v53  ;;  %v4613_v44 = vld [vmem:[%s6076_s3 + $0xa8] sm:$0xff]  }
  0xe4   : > { %2267 = vmatpush1.bf16.msra.mxu0 %v4158_v62  ;;  %2308 = vmatpush1.bf16.msra.mxu1 %v4160_v63  ;;  %v1371_v62 = vld [vmem:[%s6075_s2 + $0x178] sm:$0xff]  ;;  %v4178_v63 = vcombine.low %v1378_v52, %v1386_v53 }
  0xe5   : > { %2268 = vmatprep.subr.bf16.mxu0 %v4143_v0  ;;  %2309 = vmatprep.subr.bf16.mxu1 %v4145_v1  ;;  %v4163_v1 = vcombine.high %v1362_v59, %v1370_v60  ;;  %v4165_v2 = vcombine.high %v1363_v61, %v1371_v62  ;;  %v4620_v52 = vld [vmem:[%s6076_s3 + $0x18] sm:$0xff]  }
  0xe6   : > { %v4621_v53 = vld [vmem:[%s6076_s3 + $0x98] sm:$0xff]  }
  0xe8   : > { %2269 = vmatpush1.bf16.msra.mxu0 %v4142_v6  ;;  %2310 = vmatpush1.bf16.msra.mxu1 %v4144_v7  ;;  %v1355_v6 = vld [vmem:[%s6075_s2 + $0xf8] sm:$0xff]  ;;  %v4162_v7 = vcombine.low %v1362_v59, %v1370_v60  ;;  %v4628_v59 = vld [vmem:[%s6076_s3 + $0x8] sm:$0xff]  }
  0xe9   : > { %2270 = vmatprep.subr.bf16.mxu0 %v4127_v9  ;;  %2311 = vmatprep.subr.bf16.mxu1 %v4129_v10  ;;  %v4164_v9 = vcombine.low %v1363_v61, %v1371_v62  ;;  %v4147_v10 = vcombine.high %v1346_v3, %v1354_v4  ;;  %v4149_v11 = vcombine.high %v1347_v5, %v1355_v6  ;;  %v4629_v60 = vld [vmem:[%s6076_s3 + $0x88] sm:$0xff]   ;;  %v4630_v61 = vld [vmem:[%s6076_s3 + $0x40] sm:$0xff]  }
  0xea   : > { %v4631_v62 = vld [vmem:[%s6076_s3 + $0xc0] sm:$0xff]  }
  0xec   : > { %2271 = vmatpush1.bf16.msra.mxu0 %v4126_v16  ;;  %2312 = vmatpush1.bf16.msra.mxu1 %v4128_v17  ;;  %v1339_v16 = vld [vmem:[%s6075_s2 + $0x78] sm:$0xff]  ;;  %v4146_v17 = vcombine.low %v1346_v3, %v1354_v4 }
  0xed   : > { %2338 = vmatprep.subr.bf16.mxu0 %v4243_v18  ;;  %2379 = vmatprep.subr.bf16.mxu1 %v4245_v20  ;;  %v4148_v18 = vcombine.low %v1347_v5, %v1355_v6  ;;  %v4131_v20 = vcombine.high %v1330_v13, %v1338_v14  ;;  %v4133_v21 = vcombine.high %v1331_v15, %v1339_v16 }
  0xee   : > { %v4132_v23 = vcombine.low %v1331_v15, %v1339_v16 }
  0xef   : > { %v5537_v31 = vpop.f32.mrf.mxu0  ;;  %2289 = vmatmul.mubr.bf16.vlgmr.msra.gmra.mxu0 %v5329_v19  ;;  %v5546_v33 = vpop.f32.mrf.mxu1  ;;  %2330 = vmatmul.mubr.bf16.vlgmr.msra.gmra.mxu1 %v5329_v19 }
  0xf0   : > { %2339 = vmatpush1.bf16.msra.mxu0 %v4242_v25  ;;  %2380 = vmatpush1.bf16.msra.mxu1 %v4244_v26  ;;  %v4603_v25 = vld [vmem:[%s6076_s3 + $0xf8] sm:$0xff]  }
  0xf1   : > { %v5549_v35 = vpop.f32.mrf.mxu0  ;;  %2340 = vmatprep.subr.bf16.mxu0 %v4227_v27  ;;  %v5551_v38 = vpop.f32.mrf.mxu1  ;;  %2381 = vmatprep.subr.bf16.mxu1 %v4229_v28  ;;  %v4604_v26 = vld [vmem:[%s6076_s3 + $0x38] sm:$0xff]   ;;  %v4606_v28 = vld [vmem:[%s6076_s3 + $0x70] sm:$0xff]  }
  0xf2   : > { %2370 = vmatprep.mubr.bf16.mxu0 %v4750_v8  ;;  %2411 = vmatprep.mubr.bf16.mxu1 %v4750_v8  ;;  %v1379_v8 = vld [vmem:[%s6075_s2 + $0x1b8] sm:$0xff] }
  0xf3   : > { %v1034_v42 = vpop.f32.mrf.mxu0  ;;  %v1075_v45 = vpop.f32.mrf.mxu1  ;;  %v4181_v58 = vcombine.high %v1379_v8, %v1387_v54  ;;  %v4180_v0 = vcombine.low %v1379_v8, %v1387_v54  ;;  %v4605_v27 = vld [vmem:[%s6076_s3 + $0xb8] sm:$0xff]   ;;  %v4622_v8 = vld [vmem:[%s6076_s3 + $0x50] sm:$0xff]  }
  0xf4   : > { %2341 = vmatpush1.bf16.msra.mxu0 %v4226_v34  ;;  %2382 = vmatpush1.bf16.msra.mxu1 %v4228_v36  ;;  %v4609_v36 = vld [vmem:[%s6076_s3 + $0xb0] sm:$0xff]   ;;  %v4612_v42 = vld [vmem:[%s6076_s3 + $0x28] sm:$0xff]   ;;  %v4614_v45 = vld [vmem:[%s6076_s3 + $0x60] sm:$0xff]  }
  0xf5   : > { %v1035_v47 = vpop.f32.mrf.mxu0  ;;  %2342 = vmatprep.subr.bf16.mxu0 %v4211_v37  ;;  %v1076_v50 = vpop.f32.mrf.mxu1  ;;  %2383 = vmatprep.subr.bf16.mxu1 %v4213_v39  ;;  %v4610_v37 = vld [vmem:[%s6076_s3 + $0x68] sm:$0xff]   ;;  %v4623_v54 = vld [vmem:[%s6076_s3 + $0xd0] sm:$0xff]  }
  0xf6   : > { %v4615_v47 = vld [vmem:[%s6076_s3 + $0xe0] sm:$0xff]   ;;  %v4618_v50 = vld [vmem:[%s6076_s3 + $0x58] sm:$0xff]  }
  0xf8   : > { %2343 = vmatpush1.bf16.msra.mxu0 %v4210_v46  ;;  %2384 = vmatpush1.bf16.msra.mxu1 %v4212_v48  ;;  %v4616_v48 = vld [vmem:[%s6076_s3 + $0x20] sm:$0xff]  }
  0xf9   : > { %2344 = vmatprep.subr.bf16.mxu0 %v4195_v49  ;;  %2385 = vmatprep.subr.bf16.mxu1 %v4197_v51  ;;  %v4617_v49 = vld [vmem:[%s6076_s3 + $0xa0] sm:$0xff]   ;;  %v4619_v51 = vld [vmem:[%s6076_s3 + $0xd8] sm:$0xff]  }
  0xfc   : > { %2345 = vmatpush1.bf16.msra.mxu0 %v4194_v55  ;;  %2386 = vmatpush1.bf16.msra.mxu1 %v4196_v56  ;;  %v4624_v55 = vld [vmem:[%s6076_s3 + $0x10] sm:$0xff]  }
  0xfd   : > { %2346 = vmatprep.subr.bf16.mxu0 %v4179_v57  ;;  %2387 = vmatprep.subr.bf16.mxu1 %v4181_v58  ;;  %v4625_v56 = vld [vmem:[%s6076_s3 + $0x90] sm:$0xff]   ;;  %v4626_v57 = vld [vmem:[%s6076_s3 + $0x48] sm:$0xff]  }
  0xfe   : > { %v4627_v58 = vld [vmem:[%s6076_s3 + $0xc8] sm:$0xff]  }
 0x100   : > { %2347 = vmatpush1.bf16.msra.mxu0 %v4178_v63  ;;  %2388 = vmatpush1.bf16.msra.mxu1 %v4180_v0  ;;  %v4632_v63 = vld [vmem:[%s6076_s3] sm:$0xff]  }
 0x101   : > { %2348 = vmatprep.subr.bf16.mxu0 %v4163_v1  ;;  %2389 = vmatprep.subr.bf16.mxu1 %v4165_v2  ;;  %v4633_v0 = vld [vmem:[%s6076_s3 + $0x80] sm:$0xff]   ;;  %v4634_v1 = vld [vmem:[%s6076_s3 + $0x178] sm:$0xff]  }
 0x102   : > { %v4635_v2 = vld [vmem:[%s6076_s3 + $0x1f8] sm:$0xff]  }
 0x104   : > { %2349 = vmatpush1.bf16.msra.mxu0 %v4162_v7  ;;  %2390 = vmatpush1.bf16.msra.mxu1 %v4164_v9 }
 0x105   : > { %2350 = vmatprep.subr.bf16.mxu0 %v4147_v10  ;;  %2391 = vmatprep.subr.bf16.mxu1 %v4149_v11 }
 0x108   : > { %2351 = vmatpush1.bf16.msra.mxu0 %v4146_v17  ;;  %2392 = vmatpush1.bf16.msra.mxu1 %v4148_v18 }
 0x109   : > { %2352 = vmatprep.subr.bf16.mxu0 %v4131_v20  ;;  %2393 = vmatprep.subr.bf16.mxu1 %v4133_v21 }
 0x10c   : > { %2353 = vmatpush1.bf16.msra.mxu0 %v4130_v22  ;;  %2394 = vmatpush1.bf16.msra.mxu1 %v4132_v23 }
 0x10d   : > { %4385 = vmatprep.subr.bf16.mxu0 %v4602_v24  ;;  %4407 = vmatprep.subr.bf16.mxu1 %v4603_v25 }
 0x10f   : > { %v5633_v30 = vpop.f32.mrf.mxu0  ;;  %2371 = vmatmul.mubr.bf16.vlgmr.msra.gmra.mxu0 %v5329_v19  ;;  %v5636_v32 = vpop.f32.mrf.mxu1  ;;  %2412 = vmatmul.mubr.bf16.vlgmr.msra.gmra.mxu1 %v5329_v19  ;;  %v4611_v19 = vld [vmem:[%s6076_s3 + $0xe8] sm:$0xff]  }
 0x110   : > { %4386 = vmatpush3.bf16.msra.mxu0 %v4604_v26  ;;  %4408 = vmatpush3.bf16.msra.mxu1 %v4605_v27 }
 0x111   : > { %v5642_v34 = vpop.f32.mrf.mxu0  ;;  %4387 = vmatprep.subr.bf16.mxu0 %v4606_v28  ;;  %v5650_v39 = vpop.f32.mrf.mxu1  ;;  %4409 = vmatprep.subr.bf16.mxu1 %v4607_v29 }
 0x113   : > { %v1116_v40 = vpop.f32.mrf.mxu0  ;;  %v1157_v41 = vpop.f32.mrf.mxu1 }
 0x114   : > { %4388 = vmatpush3.bf16.msra.mxu0 %v4608_v12  ;;  %4410 = vmatpush3.bf16.msra.mxu1 %v4609_v36 }
 0x115   : > { %v1117_v43 = vpop.f32.mrf.mxu0  ;;  %4389 = vmatprep.subr.bf16.mxu0 %v4610_v37  ;;  %v1158_v46 = vpop.f32.mrf.mxu1  ;;  %4411 = vmatprep.subr.bf16.mxu1 %v4611_v19  ;;  %v4636_v19 = vld [vmem:[%s6076_s3 + $0x138] sm:$0xff]  }
 0x116   : > { %v4639_v43 = vld [vmem:[%s6076_s3 + $0x1f0] sm:$0xff]   ;;  %v4642_v46 = vld [vmem:[%s6076_s3 + $0x168] sm:$0xff]  }
 0x118   : > { %4390 = vmatpush3.bf16.msra.mxu0 %v4612_v42  ;;  %4412 = vmatpush3.bf16.msra.mxu1 %v4613_v44  ;;  %v4640_v44 = vld [vmem:[%s6076_s3 + $0x130] sm:$0xff]  }
 0x119   : > { %4391 = vmatprep.subr.bf16.mxu0 %v4614_v45  ;;  %4413 = vmatprep.subr.bf16.mxu1 %v4615_v47  ;;  %v4641_v45 = vld [vmem:[%s6076_s3 + $0x1b0] sm:$0xff]   ;;  %v4643_v47 = vld [vmem:[%s6076_s3 + $0x1e8] sm:$0xff]  }
 0x11c   : > { %4392 = vmatpush3.bf16.msra.mxu0 %v4616_v48  ;;  %4414 = vmatpush3.bf16.msra.mxu1 %v4617_v49  ;;  %v4644_v48 = vld [vmem:[%s6076_s3 + $0x128] sm:$0xff]  }
 0x11d   : > { %4393 = vmatprep.subr.bf16.mxu0 %v4618_v50  ;;  %4415 = vmatprep.subr.bf16.mxu1 %v4619_v51  ;;  %v4645_v49 = vld [vmem:[%s6076_s3 + $0x1a8] sm:$0xff]   ;;  %v4646_v50 = vld [vmem:[%s6076_s3 + $0x160] sm:$0xff]  }
 0x11e   : > { %v4647_v51 = vld [vmem:[%s6076_s3 + $0x1e0] sm:$0xff]  }
 0x120   : > { %4394 = vmatpush3.bf16.msra.mxu0 %v4620_v52  ;;  %4416 = vmatpush3.bf16.msra.mxu1 %v4621_v53  ;;  %v4648_v52 = vld [vmem:[%s6076_s3 + $0x120] sm:$0xff]  }
 0x121   : > { %4395 = vmatprep.subr.bf16.mxu0 %v4622_v8  ;;  %4417 = vmatprep.subr.bf16.mxu1 %v4623_v54  ;;  %v4649_v53 = vld [vmem:[%s6076_s3 + $0x1a0] sm:$0xff]   ;;  %v4650_v8 = vld [vmem:[%s6076_s3 + $0x158] sm:$0xff]  }
 0x122   : > { %v4651_v54 = vld [vmem:[%s6076_s3 + $0x1d8] sm:$0xff]  }
 0x124   : > { %4396 = vmatpush3.bf16.msra.mxu0 %v4624_v55  ;;  %4418 = vmatpush3.bf16.msra.mxu1 %v4625_v56  ;;  %v4652_v55 = vld [vmem:[%s6076_s3 + $0x118] sm:$0xff]  }
 0x125   : > { %4397 = vmatprep.subr.bf16.mxu0 %v4626_v57  ;;  %4419 = vmatprep.subr.bf16.mxu1 %v4627_v58  ;;  %v4653_v56 = vld [vmem:[%s6076_s3 + $0x198] sm:$0xff]   ;;  %v4654_v57 = vld [vmem:[%s6076_s3 + $0x150] sm:$0xff]  }
 0x126   : > { %v4655_v58 = vld [vmem:[%s6076_s3 + $0x1d0] sm:$0xff]  }
 0x128   : > { %4398 = vmatpush3.bf16.msra.mxu0 %v4628_v59  ;;  %4420 = vmatpush3.bf16.msra.mxu1 %v4629_v60  ;;  %v4656_v59 = vld [vmem:[%s6076_s3 + $0x110] sm:$0xff]  }
 0x129   : > { %4399 = vmatprep.subr.bf16.mxu0 %v4630_v61  ;;  %4421 = vmatprep.subr.bf16.mxu1 %v4631_v62  ;;  %v4657_v60 = vld [vmem:[%s6076_s3 + $0x190] sm:$0xff]   ;;  %v4658_v61 = vld [vmem:[%s6076_s3 + $0x148] sm:$0xff]  }
 0x12a   : > { %v4659_v62 = vld [vmem:[%s6076_s3 + $0x1c8] sm:$0xff]  }
 0x12c   : > { %4400 = vmatpush3.bf16.msra.mxu0 %v4632_v63  ;;  %4422 = vmatpush3.bf16.msra.mxu1 %v4633_v0  ;;  %v4660_v63 = vld [vmem:[%s6076_s3 + $0x108] sm:$0xff]  }
 0x12d   : > { %4429 = vmatprep.subr.bf16.mxu0 %v4634_v1  ;;  %4451 = vmatprep.subr.bf16.mxu1 %v4635_v2  ;;  %v4661_v0 = vld [vmem:[%s6076_s3 + $0x188] sm:$0xff]   ;;  %v4662_v1 = vld [vmem:[%s6076_s3 + $0x140] sm:$0xff]  }
 0x12e   : > { %v4663_v2 = vld [vmem:[%s6076_s3 + $0x1c0] sm:$0xff]  }
 0x12f   : > { %v5727_v3 = vpop.f32.mrf.mxu0  ;;  %v5729_v4 = vpop.f32.mrf.mxu1 }
 0x131   : > { %v5731_v5 = vpop.f32.mrf.mxu0  ;;  %v5733_v6 = vpop.f32.mrf.mxu1 }
 0x133   : > { %v1198_v7 = vpop.f32.mrf.mxu0  ;;  %v1239_v9 = vpop.f32.mrf.mxu1 }
 0x135   : > { %v1199_v10 = vpop.f32.mrf.mxu0  ;;  %v1240_v11 = vpop.f32.mrf.mxu1 }
 0x136   : > { %v4664_v10 = vld [vmem:[%s6076_s3 + $0x100] sm:$0xff]  }
 0x14f   : > { %v5735_v13 = vpop.f32.mrf.mxu0  ;;  %v5737_v14 = vpop.f32.mrf.mxu1 }
 0x151   : > { %v5739_v15 = vpop.f32.mrf.mxu0  ;;  %v5741_v16 = vpop.f32.mrf.mxu1 }
 0x153   : > { %v1280_v17 = vpop.f32.mrf.mxu0  ;;  %v1321_v18 = vpop.f32.mrf.mxu1 }
 0x154   : > { %v4665_v18 = vld [vmem:[%s6076_s3 + $0x180] sm:$0xff]  }
 0x155   : > { %v1281_v20 = vpop.f32.mrf.mxu0  ;;  %v1322_v21 = vpop.f32.mrf.mxu1 }
 0x156   : > { %v4666_v20 = vld [vmem:[%s6076_s3 + $0x278] sm:$0xff]  }
 0x16f   : > { %v2126_v22 = vpop.f32.mrf.mxu0  ;;  %v2167_v23 = vpop.f32.mrf.mxu1 }
 0x170   : > { %v2420_v24 = vmul.f32 %v2126_v22, %v5537_v31  ;;  %v2422_v26 = vmul.f32 %v2167_v23, %v5546_v33  ;;  %v4637_v31 = vld [vmem:[%s6076_s3 + $0x1b8] sm:$0xff]   ;;  %v4638_v33 = vld [vmem:[%s6076_s3 + $0x170] sm:$0xff]  }
 0x171   : > { %v2128_v25 = vpop.f32.mrf.mxu0  ;;  %v2169_v28 = vpop.f32.mrf.mxu1 }
 0x172   : > { %v2421_v27 = vmul.f32 %v2128_v25, %v5549_v35  ;;  %v2423_v29 = vmul.f32 %v2169_v28, %v5551_v38  ;;  %v2436_v40 = vpack.c.bf16 %v2420_v24, %v2420_v24  ;;  %v2438_v35 = vpack.c.bf16 %v2422_v26, %v2422_v26  ;;  %v4668_v28 = vld [vmem:[%s6076_s3 + $0x238] sm:$0xff]  }
 0x173   : > { %v2130_v12 = vpop.f32.mrf.mxu0  ;;  %v2171_v37 = vpop.f32.mrf.mxu1 }
 0x174   : > { %v2437_v36 = vpack.c.bf16 %v2421_v27, %v2421_v27  ;;  %v2439_v41 = vpack.c.bf16 %v2423_v29, %v2423_v29  ;;  %v4669_v12 = vld [vmem:[%s6076_s3 + $0x2b8] sm:$0xff]  }
 0x175   : > { %v2131_v42 = vpop.f32.mrf.mxu0  ;;  %v2172_v38 = vpop.f32.mrf.mxu1 }
 0x176   : > { %3508 = vmatprep.mubr.bf16.mxu0 %v2437_v36  ;;  %3548 = vmatprep.mubr.bf16.mxu1 %v2439_v41  ;;  %v4673_v41 = vld [vmem:[%s6076_s3 + $0x2b0] sm:$0xff]   ;;  %v4674_v42 = vld [vmem:[%s6076_s3 + $0x268] sm:$0xff]   ;;  %v4678_v38 = vld [vmem:[%s6076_s3 + $0x260] sm:$0xff]  }
 0x177   : > { %3509 = vmatmul.mubr.bf16.vlgmr.msra.gmra.mxu0 %v2436_v40  ;;  %3549 = vmatmul.mubr.bf16.vlgmr.msra.gmra.mxu1 %v2438_v35  ;;  %v4672_v40 = vld [vmem:[%s6076_s3 + $0x230] sm:$0xff]   ;;  %v4677_v35 = vld [vmem:[%s6076_s3 + $0x2a8] sm:$0xff]  }
 0x178   : > { %4430 = vmatpush3.bf16.msra.mxu0 %v4636_v19  ;;  %4452 = vmatpush3.bf16.msra.mxu1 %v4637_v31  ;;  %v4671_v19 = vld [vmem:[%s6076_s3 + $0x2f0] sm:$0xff]   ;;  %v4675_v31 = vld [vmem:[%s6076_s3 + $0x2e8] sm:$0xff]  }
 0x179   : > { %4431 = vmatprep.subr.bf16.mxu0 %v4638_v33  ;;  %4453 = vmatprep.subr.bf16.mxu1 %v4639_v43  ;;  %v4676_v33 = vld [vmem:[%s6076_s3 + $0x228] sm:$0xff]   ;;  %v4679_v43 = vld [vmem:[%s6076_s3 + $0x2e0] sm:$0xff]  }
 0x17c   : > { %4432 = vmatpush3.bf16.msra.mxu0 %v4640_v44  ;;  %4454 = vmatpush3.bf16.msra.mxu1 %v4641_v45  ;;  %v4680_v44 = vld [vmem:[%s6076_s3 + $0x220] sm:$0xff]  }
 0x17d   : > { %4433 = vmatprep.subr.bf16.mxu0 %v4642_v46  ;;  %4455 = vmatprep.subr.bf16.mxu1 %v4643_v47  ;;  %v4681_v45 = vld [vmem:[%s6076_s3 + $0x2a0] sm:$0xff]   ;;  %v4682_v46 = vld [vmem:[%s6076_s3 + $0x258] sm:$0xff]  }
 0x17e   : > { %v4683_v47 = vld [vmem:[%s6076_s3 + $0x2d8] sm:$0xff]  }
 0x180   : > { %4434 = vmatpush3.bf16.msra.mxu0 %v4644_v48  ;;  %4456 = vmatpush3.bf16.msra.mxu1 %v4645_v49  ;;  %v4684_v48 = vld [vmem:[%s6076_s3 + $0x218] sm:$0xff]  }
 0x181   : > { %4435 = vmatprep.subr.bf16.mxu0 %v4646_v50  ;;  %4457 = vmatprep.subr.bf16.mxu1 %v4647_v51  ;;  %v4685_v49 = vld [vmem:[%s6076_s3 + $0x298] sm:$0xff]   ;;  %v4686_v50 = vld [vmem:[%s6076_s3 + $0x250] sm:$0xff]  }
 0x182   : > { %v4687_v51 = vld [vmem:[%s6076_s3 + $0x2d0] sm:$0xff]  }
 0x184   : > { %4436 = vmatpush3.bf16.msra.mxu0 %v4648_v52  ;;  %4458 = vmatpush3.bf16.msra.mxu1 %v4649_v53  ;;  %v4688_v52 = vld [vmem:[%s6076_s3 + $0x210] sm:$0xff]  }
 0x185   : > { %4437 = vmatprep.subr.bf16.mxu0 %v4650_v8  ;;  %4459 = vmatprep.subr.bf16.mxu1 %v4651_v54  ;;  %v4689_v53 = vld [vmem:[%s6076_s3 + $0x290] sm:$0xff]   ;;  %v4690_v8 = vld [vmem:[%s6076_s3 + $0x248] sm:$0xff]  }
 0x186   : > { %v4691_v54 = vld [vmem:[%s6076_s3 + $0x2c8] sm:$0xff]  }
 0x188   : > { %4438 = vmatpush3.bf16.msra.mxu0 %v4652_v55  ;;  %4460 = vmatpush3.bf16.msra.mxu1 %v4653_v56  ;;  %v4692_v55 = vld [vmem:[%s6076_s3 + $0x208] sm:$0xff]  }
 0x189   : > { %4439 = vmatprep.subr.bf16.mxu0 %v4654_v57  ;;  %4461 = vmatprep.subr.bf16.mxu1 %v4655_v58  ;;  %v4693_v56 = vld [vmem:[%s6076_s3 + $0x288] sm:$0xff]   ;;  %v4694_v57 = vld [vmem:[%s6076_s3 + $0x240] sm:$0xff]  }
 0x18a   : > { %v4695_v58 = vld [vmem:[%s6076_s3 + $0x2c0] sm:$0xff]  }
 0x18c   : > { %4440 = vmatpush3.bf16.msra.mxu0 %v4656_v59  ;;  %4462 = vmatpush3.bf16.msra.mxu1 %v4657_v60 }
 0x18d   : > { %4441 = vmatprep.subr.bf16.mxu0 %v4658_v61  ;;  %4463 = vmatprep.subr.bf16.mxu1 %v4659_v62  ;;  %v4696_v61 = vld [vmem:[%s6076_s3 + $0x200] sm:$0xff]  }
 0x18f   : > { %v2208_v7 = vpop.f32.mrf.mxu0  ;;  %v2249_v9 = vpop.f32.mrf.mxu1 }
 0x190   : > { %4442 = vmatpush3.bf16.msra.mxu0 %v4660_v63  ;;  %v2424_v11 = vmul.f32 %v2208_v7, %v5633_v30  ;;  %4464 = vmatpush3.bf16.msra.mxu1 %v4661_v0  ;;  %v2426_v21 = vmul.f32 %v2249_v9, %v5636_v32  ;;  %v4667_v30 = vld [vmem:[%s6076_s3 + $0x2f8] sm:$0xff]   ;;  %v4697_v0 = vld [vmem:[%s6076_s3 + $0x280] sm:$0xff]  }
 0x191   : > { %v2210_v17 = vpop.f32.mrf.mxu0  ;;  %4443 = vmatprep.subr.bf16.mxu0 %v4662_v1  ;;  %v2251_v23 = vpop.f32.mrf.mxu1  ;;  %4465 = vmatprep.subr.bf16.mxu1 %v4663_v2  ;;  %v4698_v1 = vld [vmem:[%s6076_s3 + $0x378] sm:$0xff]  }
 0x192   : > { %v2425_v22 = vmul.f32 %v2210_v17, %v5642_v34  ;;  %v2427_v24 = vmul.f32 %v2251_v23, %v5650_v39  ;;  %v2440_v29 = vpack.c.bf16 %v2424_v11, %v2424_v11  ;;  %v4670_v39 = vld [vmem:[%s6076_s3 + $0x270] sm:$0xff]   ;;  %v2442_v36 = vpack.c.bf16 %v2426_v21, %v2426_v21 }
 0x193   : > { %v2212_v25 = vpop.f32.mrf.mxu0  ;;  %v2253_v27 = vpop.f32.mrf.mxu1 }
 0x194   : > { %v2441_v26 = vpack.c.bf16 %v2425_v22, %v2425_v22  ;;  %4444 = vmatpush3.bf16.msra.mxu0 %v4664_v10  ;;  %v2443_v32 = vpack.c.bf16 %v2427_v24, %v2427_v24  ;;  %4466 = vmatpush3.bf16.msra.mxu1 %v4665_v18  ;;  %v4701_v22 = vld [vmem:[%s6076_s3 + $0x3b8] sm:$0xff]   ;;  %v4703_v24 = vld [vmem:[%s6076_s3 + $0x3f0] sm:$0xff]   ;;  %v4706_v27 = vld [vmem:[%s6076_s3 + $0x368] sm:$0xff]  }
 0x195   : > { %v2213_v34 = vpop.f32.mrf.mxu0  ;;  %4473 = vmatprep.subr.bf16.mxu0 %v4666_v20  ;;  %v2254_v37 = vpop.f32.mrf.mxu1  ;;  %4495 = vmatprep.subr.bf16.mxu1 %v4667_v30  ;;  %v4700_v20 = vld [vmem:[%s6076_s3 + $0x338] sm:$0xff]   ;;  %v4704_v25 = vld [vmem:[%s6076_s3 + $0x330] sm:$0xff]  }
 0x196   : > { %3588 = vmatprep.mubr.bf16.mxu0 %v2441_v26  ;;  %3628 = vmatprep.mubr.bf16.mxu1 %v2443_v32  ;;  %v4705_v26 = vld [vmem:[%s6076_s3 + $0x3b0] sm:$0xff]   ;;  %v4709_v32 = vld [vmem:[%s6076_s3 + $0x3a8] sm:$0xff]   ;;  %v4710_v34 = vld [vmem:[%s6076_s3 + $0x360] sm:$0xff]  }
 0x197   : > { %3589 = vmatmul.mubr.bf16.vlgmr.msra.gmra.mxu0 %v2440_v29  ;;  %3629 = vmatmul.mubr.bf16.vlgmr.msra.gmra.mxu1 %v2442_v36  ;;  %v4708_v29 = vld [vmem:[%s6076_s3 + $0x328] sm:$0xff]   ;;  %v4713_v36 = vld [vmem:[%s6076_s3 + $0x3a0] sm:$0xff]   ;;  %v4714_v37 = vld [vmem:[%s6076_s3 + $0x358] sm:$0xff]  }
 0x198   : > { %4474 = vmatpush3.bf16.msra.mxu0 %v4668_v28  ;;  %4496 = vmatpush3.bf16.msra.mxu1 %v4669_v12  ;;  %v4707_v28 = vld [vmem:[%s6076_s3 + $0x3e8] sm:$0xff]   ;;  %v4711_v12 = vld [vmem:[%s6076_s3 + $0x3e0] sm:$0xff]  }
 0x199   : > { %4475 = vmatprep.subr.bf16.mxu0 %v4670_v39  ;;  %4497 = vmatprep.subr.bf16.mxu1 %v4671_v19  ;;  %v4712_v39 = vld [vmem:[%s6076_s3 + $0x320] sm:$0xff]   ;;  %v4715_v19 = vld [vmem:[%s6076_s3 + $0x3d8] sm:$0xff]  }
 0x19c   : > { %4476 = vmatpush3.bf16.msra.mxu0 %v4672_v40  ;;  %4498 = vmatpush3.bf16.msra.mxu1 %v4673_v41  ;;  %v4716_v40 = vld [vmem:[%s6076_s3 + $0x318] sm:$0xff]  }
 0x19d   : > { %4477 = vmatprep.subr.bf16.mxu0 %v4674_v42  ;;  %4499 = vmatprep.subr.bf16.mxu1 %v4675_v31  ;;  %v4717_v41 = vld [vmem:[%s6076_s3 + $0x398] sm:$0xff]   ;;  %v4718_v42 = vld [vmem:[%s6076_s3 + $0x350] sm:$0xff]  }
 0x19e   : > { %v4719_v31 = vld [vmem:[%s6076_s3 + $0x3d0] sm:$0xff]  }
 0x1a0   : > { %4478 = vmatpush3.bf16.msra.mxu0 %v4676_v33  ;;  %4500 = vmatpush3.bf16.msra.mxu1 %v4677_v35  ;;  %v4720_v33 = vld [vmem:[%s6076_s3 + $0x310] sm:$0xff]  }
 0x1a1   : > { %4479 = vmatprep.subr.bf16.mxu0 %v4678_v38  ;;  %4501 = vmatprep.subr.bf16.mxu1 %v4679_v43  ;;  %v4721_v35 = vld [vmem:[%s6076_s3 + $0x390] sm:$0xff]   ;;  %v4722_v38 = vld [vmem:[%s6076_s3 + $0x348] sm:$0xff]  }
 0x1a2   : > { %v4723_v43 = vld [vmem:[%s6076_s3 + $0x3c8] sm:$0xff]  }
 0x1a4   : > { %4480 = vmatpush3.bf16.msra.mxu0 %v4680_v44  ;;  %4502 = vmatpush3.bf16.msra.mxu1 %v4681_v45  ;;  %v4724_v44 = vld [vmem:[%s6076_s3 + $0x308] sm:$0xff]  }
 0x1a5   : > { %4481 = vmatprep.subr.bf16.mxu0 %v4682_v46  ;;  %4503 = vmatprep.subr.bf16.mxu1 %v4683_v47  ;;  %v4725_v45 = vld [vmem:[%s6076_s3 + $0x388] sm:$0xff]   ;;  %v4726_v46 = vld [vmem:[%s6076_s3 + $0x340] sm:$0xff]  }
 0x1a6   : > { %v4727_v47 = vld [vmem:[%s6076_s3 + $0x3c0] sm:$0xff]  }
 0x1a8   : > { %4482 = vmatpush3.bf16.msra.mxu0 %v4684_v48  ;;  %4504 = vmatpush3.bf16.msra.mxu1 %v4685_v49 }
 0x1a9   : > { %4483 = vmatprep.subr.bf16.mxu0 %v4686_v50  ;;  %4505 = vmatprep.subr.bf16.mxu1 %v4687_v51  ;;  %v4728_v50 = vld [vmem:[%s6076_s3 + $0x300] sm:$0xff]  }
 0x1ac   : > { %4484 = vmatpush3.bf16.msra.mxu0 %v4688_v52  ;;  %4506 = vmatpush3.bf16.msra.mxu1 %v4689_v53  ;;  %v4729_v53 = vld [vmem:[%s6076_s3 + $0x380] sm:$0xff]  }
 0x1ad   : > { %4485 = vmatprep.subr.bf16.mxu0 %v4690_v8  ;;  %4507 = vmatprep.subr.bf16.mxu1 %v4691_v54 }
 0x1af   : > { %v2290_v59 = vpop.f32.mrf.mxu0  ;;  %v2331_v60 = vpop.f32.mrf.mxu1 }
 0x1b0   : > { %4486 = vmatpush3.bf16.msra.mxu0 %v4692_v55  ;;  %v2428_v62 = vmul.f32 %v2290_v59, %v5727_v3  ;;  %4508 = vmatpush3.bf16.msra.mxu1 %v4693_v56  ;;  %v2430_v2 = vmul.f32 %v2331_v60, %v5729_v4  ;;  %v4699_v3 = vld [vmem:[%s6076_s3 + $0x3f8] sm:$0xff]  }
 0x1b1   : > { %v2292_v63 = vpop.f32.mrf.mxu0  ;;  %4487 = vmatprep.subr.bf16.mxu0 %v4694_v57  ;;  %v2333_v9 = vpop.f32.mrf.mxu1  ;;  %4509 = vmatprep.subr.bf16.mxu1 %v4695_v58 }
 0x1b2   : > { %v2429_v7 = vmul.f32 %v2292_v63, %v5731_v5  ;;  %v2431_v10 = vmul.f32 %v2333_v9, %v5733_v6  ;;  %v2444_v21 = vpack.c.bf16 %v2428_v62, %v2428_v62  ;;  %v4702_v6 = vld [vmem:[%s6076_s3 + $0x370] sm:$0xff]   ;;  %v2446_v23 = vpack.c.bf16 %v2430_v2, %v2430_v2  ;;  %v4734_v2 = vld [vmem:[%s6077_s4 + $0x18] sm:$0xff]   ;;  %v4736_v9 = vld [vmem:[%s6077_s4 + $0x8] sm:$0xff]  }
 0x1b3   : > { %v2294_v11 = vpop.f32.mrf.mxu0  ;;  %v2335_v18 = vpop.f32.mrf.mxu1 }
 0x1b4   : > { %v2445_v17 = vpack.c.bf16 %v2429_v7, %v2429_v7  ;;  %4488 = vmatpush3.bf16.msra.mxu0 %v4696_v61  ;;  %v2447_v4 = vpack.c.bf16 %v2431_v10, %v2431_v10  ;;  %4510 = vmatpush3.bf16.msra.mxu1 %v4697_v0  ;;  %v4732_v0 = vld [vmem:[%s6077_s4 + $0x28] sm:$0xff]   ;;  %v4735_v7 = vld [vmem:[%s6077_s4 + $0x10] sm:$0xff]  }
 0x1b5   : > { %v2295_v5 = vpop.f32.mrf.mxu0  ;;  %4517 = vmatprep.subr.bf16.mxu0 %v4698_v1  ;;  %v2336_v30 = vpop.f32.mrf.mxu1  ;;  %4539 = vmatprep.subr.bf16.mxu1 %v4699_v3  ;;  %v4733_v1 = vld [vmem:[%s6077_s4 + $0x20] sm:$0xff]  }
 0x1b6   : > { %3668 = vmatprep.mubr.bf16.mxu0 %v2445_v17  ;;  %3708 = vmatprep.mubr.bf16.mxu1 %v2447_v4  ;;  %v4737_v3 = vld [vmem:[%s6077_s4] sm:$0xff]  }
 0x1b7   : > { %3669 = vmatmul.mubr.bf16.vlgmr.msra.gmra.mxu0 %v2444_v21  ;;  %3709 = vmatmul.mubr.bf16.vlgmr.msra.gmra.mxu1 %v2446_v23 }
 0x1b8   : > { %4518 = vmatpush3.bf16.msra.mxu0 %v4700_v20  ;;  %4540 = vmatpush3.bf16.msra.mxu1 %v4701_v22 }
 0x1b9   : > { %4519 = vmatprep.subr.bf16.mxu0 %v4702_v6  ;;  %4541 = vmatprep.subr.bf16.mxu1 %v4703_v24 }
 0x1bc   : > { %4520 = vmatpush3.bf16.msra.mxu0 %v4704_v25  ;;  %4542 = vmatpush3.bf16.msra.mxu1 %v4705_v26 }
 0x1bd   : > { %4521 = vmatprep.subr.bf16.mxu0 %v4706_v27  ;;  %4543 = vmatprep.subr.bf16.mxu1 %v4707_v28 }
 0x1c0   : > { %4522 = vmatpush3.bf16.msra.mxu0 %v4708_v29  ;;  %4544 = vmatpush3.bf16.msra.mxu1 %v4709_v32 }
 0x1c1   : > { %4523 = vmatprep.subr.bf16.mxu0 %v4710_v34  ;;  %4545 = vmatprep.subr.bf16.mxu1 %v4711_v12 }
 0x1c4   : > { %4524 = vmatpush3.bf16.msra.mxu0 %v4712_v39  ;;  %4546 = vmatpush3.bf16.msra.mxu1 %v4713_v36 }
 0x1c5   : > { %4525 = vmatprep.subr.bf16.mxu0 %v4714_v37  ;;  %4547 = vmatprep.subr.bf16.mxu1 %v4715_v19 }
 0x1c8   : > { %4526 = vmatpush3.bf16.msra.mxu0 %v4716_v40  ;;  %4548 = vmatpush3.bf16.msra.mxu1 %v4717_v41 }
 0x1c9   : > { %4527 = vmatprep.subr.bf16.mxu0 %v4718_v42  ;;  %4549 = vmatprep.subr.bf16.mxu1 %v4719_v31 }
 0x1cc   : > { %4528 = vmatpush3.bf16.msra.mxu0 %v4720_v33  ;;  %4550 = vmatpush3.bf16.msra.mxu1 %v4721_v35 }
 0x1cd   : > { %4529 = vmatprep.subr.bf16.mxu0 %v4722_v38  ;;  %4551 = vmatprep.subr.bf16.mxu1 %v4723_v43 }
 0x1cf   : > { %v2372_v48 = vpop.f32.mrf.mxu0  ;;  %v2413_v49 = vpop.f32.mrf.mxu1 }
 0x1d0   : > { %4530 = vmatpush3.bf16.msra.mxu0 %v4724_v44  ;;  %v2432_v51 = vmul.f32 %v2372_v48, %v5735_v13  ;;  %4552 = vmatpush3.bf16.msra.mxu1 %v4725_v45  ;;  %v2434_v8 = vmul.f32 %v2413_v49, %v5737_v14  ;;  %v4730_v14 = vld [vmem:[%s6077_s4 + $0x38] sm:$0xff]  }
 0x1d1   : > { %v2374_v52 = vpop.f32.mrf.mxu0  ;;  %4531 = vmatprep.subr.bf16.mxu0 %v4726_v46  ;;  %v2415_v55 = vpop.f32.mrf.mxu1  ;;  %4553 = vmatprep.subr.bf16.mxu1 %v4727_v47 }
 0x1d2   : > { %v2433_v54 = vmul.f32 %v2374_v52, %v5739_v15  ;;  %v2435_v56 = vmul.f32 %v2415_v55, %v5741_v16  ;;  %v2448_v13 = vpack.c.bf16 %v2432_v51, %v2432_v51  ;;  %v2450_v62 = vpack.c.bf16 %v2434_v8, %v2434_v8  ;;  %v4731_v16 = vld [vmem:[%s6077_s4 + $0x30] sm:$0xff]  }
 0x1d3   : > { %v2376_v57 = vpop.f32.mrf.mxu0  ;;  %v2417_v59 = vpop.f32.mrf.mxu1  ;;  %v4751_v15 = vmov 0.0  }
 0x1d4   : > { %v2449_v58 = vpack.c.bf16 %v2433_v54, %v2433_v54  ;;  %4532 = vmatpush3.bf16.msra.mxu0 %v4728_v50  ;;  %v2451_v60 = vpack.c.bf16 %v2435_v56, %v2435_v56  ;;  %4554 = vmatpush3.bf16.msra.mxu1 %v4729_v53 }
 0x1d5   : > { %v2377_v61 = vpop.f32.mrf.mxu0  ;;  %v2418_v63 = vpop.f32.mrf.mxu1  ;;  %4570 = vmatprep.subr.bf16.mxu0 %v4751_v15 }
 0x1d6   : > { %3748 = vmatprep.mubr.bf16.mxu0 %v2449_v58  ;;  %3788 = vmatprep.mubr.bf16.mxu1 %v2451_v60  ;;  %v3913_v58 = vld [vmem:[%s4911_s26 + $0x8] sm:$0xf] }
 0x1d7   : > { %3749 = vmatmul.mubr.bf16.vlgmr.msra.gmra.mxu0 %v2448_v13  ;;  %3789 = vmatmul.mubr.bf16.vlgmr.msra.gmra.mxu1 %v2450_v62  ;;  %v3914_v59 = vunpack.c.l.bf16 %v3913_v58 }
 0x1d8   : > { %4571 = vmatpush3.bf16.msra.mxu0 %v4730_v14  ;;  %4586 = vmatprep.mubr.msk.bf16.mxu0 %vm4752_vm0, %v4751_v15 }
 0x1d9   : > { %4572 = vmatprep.subr.bf16.mxu0 %v4751_v15  ;;  %v3915_v13 = vmul.f32 %v3914_v59, %v3914_v59 }
 0x1db   : > { %v3916_v60 = vmul.f32 %v3915_v13, %v3914_v59 }
 0x1dc   : > { %4573 = vmatpush3.bf16.msra.mxu0 %v4731_v16 }
 0x1dd   : > { %4574 = vmatprep.subr.bf16.mxu0 %v4751_v15  ;;  %v3917_v61 = vmul.f32 0.044715, %v3916_v60 }
 0x1df   : > { %v3918_v62 = vadd.f32 %v3917_v61, %v3914_v59 }
 0x1e0   : > { %4575 = vmatpush3.bf16.msra.mxu0 %v4732_v0 }
 0x1e1   : > { %4576 = vmatprep.subr.bf16.mxu0 %v4751_v15  ;;  %v3919_v63 = vmul.f32 0.7978846, %v3918_v62 }
 0x1e3   : > { %4738 = vtanh.f32 %v3919_v63 }
 0x1e4   : > { %4577 = vmatpush3.bf16.msra.mxu0 %v4733_v1 }
 0x1e5   : > { %4578 = vmatprep.subr.bf16.mxu0 %v4751_v15 }
 0x1e8   : > { %4579 = vmatpush3.bf16.msra.mxu0 %v4734_v2 }
 0x1e9   : > { %4580 = vmatprep.subr.bf16.mxu0 %v4751_v15 }
 0x1ec   : > { %4581 = vmatpush3.bf16.msra.mxu0 %v4735_v7 }
 0x1ed   : > { %4582 = vmatprep.subr.bf16.mxu0 %v4751_v15 }
 0x1f0   : > { %4583 = vmatpush3.bf16.msra.mxu0 %v4736_v9  ;;  %v4739_v14 = vpop.eup %4738 }
 0x1f1   : > { %4584 = vmatprep.subr.bf16.mxu0 %v4751_v15  ;;  %v3921_v15 = vadd.f32 1.0, %v4739_v14 }
 0x1f3   : > { %v3922_v16 = vmul.f32 0.5, %v3921_v15 }
 0x1f4   : > { %4585 = vmatpush3.bf16.msra.mxu0 %v4737_v3 }
 0x1f5   : > { %v3923_v0 = vmul.f32 %v3922_v16, %v3914_v59 }
 0x1f7   : > { %v3924_v1 = vpack.c.bf16 %v3923_v0, %v3923_v0 }
 0x1f9   : > { %3926 = vst.msk [vmem:[%s224_s13 + $0x4] sm:$0xf] %vm3925_vm1, %v3924_v1 }
 0x237   : > { %v4401_v10 = vpop.f32.mrf.mxu0  ;;  %v4423_v11 = vpop.f32.mrf.mxu1 }
 0x239   : > { %v4402_v17 = vpop.f32.mrf.mxu0  ;;  %v4424_v20 = vpop.f32.mrf.mxu1 }
 0x23a   : > { %v4403_v18 = vadd.f32 %v4402_v17, %v4401_v10  ;;  %v4425_v21 = vadd.f32 %v4424_v20, %v4423_v11 }
 0x23b   : > { %v4404_v4 = vpop.f32.mrf.mxu0  ;;  %v4426_v5 = vpop.f32.mrf.mxu1 }
 0x23c   : > { %v3551_v22 = vadd.f32 %v4425_v21, %v4403_v18 }
 0x23d   : > { %v4405_v6 = vpop.f32.mrf.mxu0  ;;  %v4427_v23 = vpop.f32.mrf.mxu1 }
 0x257   : > { %v4445_v30 = vpop.f32.mrf.mxu0  ;;  %v4467_v24 = vpop.f32.mrf.mxu1 }
 0x259   : > { %v4446_v25 = vpop.f32.mrf.mxu0  ;;  %v4468_v26 = vpop.f32.mrf.mxu1 }
 0x25a   : > { %v4447_v42 = vadd.f32 %v4446_v25, %v4445_v30  ;;  %v4469_v33 = vadd.f32 %v4468_v26, %v4467_v24 }
 0x25b   : > { %v4448_v27 = vpop.f32.mrf.mxu0  ;;  %v4470_v28 = vpop.f32.mrf.mxu1 }
 0x25c   : > { %v3591_v31 = vadd.f32 %v4447_v42, %v3551_v22 }
 0x25d   : > { %v4449_v29 = vpop.f32.mrf.mxu0  ;;  %v4471_v32 = vpop.f32.mrf.mxu1 }
 0x25e   : > { %v3631_v38 = vadd.f32 %v4469_v33, %v3591_v31 }
 0x277   : > { %v4489_v34 = vpop.f32.mrf.mxu0  ;;  %v4511_v12 = vpop.f32.mrf.mxu1 }
 0x279   : > { %v4490_v39 = vpop.f32.mrf.mxu0  ;;  %v4512_v36 = vpop.f32.mrf.mxu1 }
 0x27a   : > { %v4491_v35 = vadd.f32 %v4490_v39, %v4489_v34  ;;  %v4513_v45 = vadd.f32 %v4512_v36, %v4511_v12 }
 0x27b   : > { %v4492_v37 = vpop.f32.mrf.mxu0  ;;  %v4514_v19 = vpop.f32.mrf.mxu1 }
 0x27c   : > { %v3671_v43 = vadd.f32 %v4491_v35, %v3631_v38 }
 0x27d   : > { %v4493_v40 = vpop.f32.mrf.mxu0  ;;  %v4515_v41 = vpop.f32.mrf.mxu1 }
 0x27e   : > { %v3711_v48 = vadd.f32 %v4513_v45, %v3671_v43 }
 0x297   : > { %v4533_v44 = vpop.f32.mrf.mxu0  ;;  %v4555_v46 = vpop.f32.mrf.mxu1 }
 0x299   : > { %v4534_v47 = vpop.f32.mrf.mxu0  ;;  %v4556_v50 = vpop.f32.mrf.mxu1 }
 0x29a   : > { %v4535_v49 = vadd.f32 %v4534_v47, %v4533_v44  ;;  %v4557_v53 = vadd.f32 %v4556_v50, %v4555_v46 }
 0x29b   : > { %v4536_v51 = vpop.f32.mrf.mxu0  ;;  %v4558_v8 = vpop.f32.mrf.mxu1 }
 0x29c   : > { %v3751_v52 = vadd.f32 %v4535_v49, %v3711_v48 }
 0x29d   : > { %v4537_v54 = vpop.f32.mrf.mxu0  ;;  %v4559_v56 = vpop.f32.mrf.mxu1 }
 0x29e   : > { %v3791_v55 = vadd.f32 %v4557_v53, %v3751_v52 }
 0x2a0   : > { %v3796_v57 = vpack.c.bf16 %v3791_v55, %v3791_v55 }
 0x2a2   : > { %4587 = vmatmul.mubr.bf16.vlgmr.msra.gmra.mxu0 %v3796_v57 }
 0x362   : > { %v3895_v2 = vpop.f32.mrf.mxu0 }
 0x363   : > { %v3901_v7 = vmul.f32 %v3895_v2, %v3895_v2 }
 0x364   : > { %v4588_v9 = vpop.f32.mrf.mxu0 }
 0x365   : > { %v3902_v3 = vmul.f32 %v3901_v7, %v3895_v2 }
 0x366   : > { %v3898_v10 = vpop.f32.mrf.mxu0 }
 0x367   : > { %v3903_v11 = vmul.f32 0.044715, %v3902_v3 }
 0x368   : > { %v4589_v17 = vpop.f32.mrf.mxu0 }
 0x369   : > { %v3904_v18 = vadd.f32 %v3903_v11, %v3895_v2 }
 0x36b   : > { %v3905_v20 = vmul.f32 0.7978846, %v3904_v18 }
 0x36d   : > { %4740 = vtanh.f32 %v3905_v20 }
 0x37a   : > { %v4741_v21 = vpop.eup %4740 }
 0x37b   : > { %v3907_v4 = vadd.f32 1.0, %v4741_v21 }
 0x37d   : > { %v3908_v5 = vmul.f32 0.5, %v3907_v4 }
 0x37f   : > { %v3909_v22 = vmul.f32 %v3908_v5, %v3895_v2 }
 0x381   : > { %v3910_v6 = vmul.f32 %v3909_v22, %v3791_v55 }
 0x383   : > { %v3911_v23 = vpack.c.bf16 %v3910_v6, %v3910_v6 }
 0x385   : > { %3912 = vst [vmem:[%s224_s13] sm:$0xf] %v3911_v23 }
 0x386 PF: > { %s15_s18 = sadd.s32 1, %s4748_s18  }
 0x387   : > { %p12_p4 = scmp.ge.s32.totalorder %s15_s18, 4  }
 0x389   :  { %14 = sbr.rel (!%p12_p4) target bundleno = 1 (0x1), region = 70 }

</bundles_post_ra>
